<compile_context>
chip_gen: v6e
topology: v6e:2x2x1
jax: 0.10.0
libtpu: 0.0.40
codegen_flags: <defaults>
</compile_context>

<pallas_src>
import functools

import jax
import jax.numpy as jnp
from jax.experimental import pallas as pl
from jax.experimental.pallas import tpu as pltpu


def _round_up(x, m):
    return ((x + m - 1) // m) * m


def _bf16_silu_supported():
    """bf16 VPU/EUP math is profitable (and supported) on v6e / v7x only."""
    try:
        kind = jax.devices()[0].device_kind.lower()
    except Exception:
        return False
    return ("v6" in kind) or ("v7" in kind)


def letter_classifier_kernel(x_ref, wh_ref, wc_ref, bc_ref, out_ref, acc_ref,
                             *, silu_dtype):
    # x_ref : [1, tS, Cp]  bf16  one batch row, one spatial tile (channels zero-padded)
    # wh_ref: [Cp, F]      bf16  pointwise "conv_head"-style projection (VMEM resident)
    # wc_ref: [F, NCp]     f32   classifier weight, pre-scaled by 1/S, cols zero-padded
    # bc_ref: [1, NCp]     f32   classifier bias, cols zero-padded
    # out_ref:[1, 1, NCp]  f32   logits row for this batch element
    # acc_ref:[1, F]       f32   pooled-sum accumulator (persists across spatial tiles)
    s = pl.program_id(1)

    @pl.when(s == 0)
    def _init():
        acc_ref[...] = jnp.zeros_like(acc_ref)

    # Projection matmul on the MXU: [tS, Cp] @ [Cp, F].  Result is produced
    # directly in silu_dtype (bf16 on v6e/v7x, f32 on v5e); MXU accumulation is
    # f32 internally either way.
    x2d = x_ref[0]
    feats = jnp.dot(x2d, wh_ref[...], preferred_element_type=silu_dtype)

    # SiLU via the single-EUP-push identity: x*sigmoid(x) = 0.5*x*(1 + tanh(x/2)).
    silu = feats * ((jnp.tanh(feats * 0.5) + 1.0) * 0.5)

    # Partial global-average-pool (spatial SUM; true 1/S folded into wc_ref).
    # Done on the (idle) MXU instead of a VALU/XLU sublane reduce:
    # [1, tS] @ [tS, F] -> [1, F] with f32 accumulation.
    ones_row = jnp.ones((1, silu.shape[0]), dtype=silu.dtype)
    acc_ref[...] += jnp.dot(ones_row, silu, preferred_element_type=jnp.float32)

    @pl.when(s == pl.num_programs(1) - 1)
    def _finalize():
        logits = (
            jnp.dot(acc_ref[...], wc_ref[...], preferred_element_type=jnp.float32)
            + bc_ref[...]
        )
        out_ref[0] = logits.astype(out_ref.dtype)


@functools.partial(jax.jit, static_argnames=("tile_s", "use_bf16_silu"))
def _forward_impl(x_nchw, w_head, w_cls, b_cls, *, tile_s, use_bf16_silu):
    B, C, H, W = x_nchw.shape
    S = H * W
    F = w_head.shape[1]
    NC = w_cls.shape[1]

    Cp = 8                                # pad channels to one sublane group
    NCp = _round_up(NC, 128)              # lane-dense classifier columns
    S_pad = _round_up(S, tile_s)          # pad spatial to tile multiple
    n_s_tiles = S_pad // tile_s
    silu_dtype = jnp.bfloat16 if use_bf16_silu else jnp.float32

    # ---- layout glue in plain JAX (fused by XLA under jit) -----------------
    # NCHW -> NHWC -> [B, S, C]; cast + pad in a single jnp.pad expression.
    # Zero-padded rows/channels project to zero features and SiLU(0)=0, so they
    # contribute nothing to the pooled sum; the true 1/S goes into w_cls below.
    x3d = jnp.transpose(x_nchw, (0, 2, 3, 1)).reshape(B, S, C)
    x_p = jnp.pad(x3d.astype(jnp.bfloat16),
                  ((0, 0), (0, S_pad - S), (0, Cp - C)))

    wh_p = jnp.pad(w_head.astype(jnp.bfloat16), ((0, Cp - C), (0, 0)))
    wc_p = jnp.pad(w_cls.astype(jnp.float32) / jnp.float32(S),
                   ((0, 0), (0, NCp - NC)))
    bc_p = jnp.pad(b_cls.astype(jnp.float32).reshape(1, NC),
                   ((0, 0), (0, NCp - NC)))

    kernel = functools.partial(letter_classifier_kernel, silu_dtype=silu_dtype)

    out_padded = pl.pallas_call(
        kernel,
        out_shape=jax.ShapeDtypeStruct((B, 1, NCp), jnp.float32),
        grid_spec=pltpu.PrefetchScalarGridSpec(
            num_scalar_prefetch=0,
            grid=(B, n_s_tiles),
            in_specs=[
                pl.BlockSpec((1, tile_s, Cp), lambda b, s: (b, s, 0)),  # x tile
                pl.BlockSpec((Cp, F), lambda b, s: (0, 0)),             # w_head (resident)
                pl.BlockSpec((F, NCp), lambda b, s: (0, 0)),            # w_cls (resident)
                pl.BlockSpec((1, NCp), lambda b, s: (0, 0)),            # b_cls (resident)
            ],
            out_specs=pl.BlockSpec((1, 1, NCp), lambda b, s: (b, 0, 0)),
            scratch_shapes=[pltpu.VMEM((1, F), jnp.float32)],           # pooled-sum acc
        ),
        compiler_params=pltpu.CompilerParams(
            # Batch rows are independent -> shard across v7x TensorCores.
            # Spatial axis must stay innermost/"arbitrary": acc_ref carries across it.
            dimension_semantics=("parallel", "arbitrary"),
            vmem_limit_bytes=32 << 20,
        ),
    )(x_p, wh_p, wc_p, bc_p)

    return out_padded.reshape(B, NCp)[:, :NC]


def letter_classifier_forward(x_nchw, w_head, w_cls, b_cls, *, tile_s=None):
    """x_nchw: [B, 3, H, W] float32.  Returns logits [B, num_classes] float32."""
    B, C, H, W = x_nchw.shape
    S = H * W
    if tile_s is None:
        # One tile per batch row for small images; 512 rows per tile otherwise
        # (multiple of 8, amortizes per-grid-step overhead, fits 32 MiB VMEM
        # even with f32 intermediates on v5e).
        tile_s = min(512, _round_up(S, 8))
    return _forward_impl(x_nchw, w_head, w_cls, b_cls,
                         tile_s=int(tile_s),
                         use_bf16_silu=_bf16_silu_supported())


if __name__ == "__main__":
    # Small, deterministic shapes consistent with the module's forward:
    # image batch [B, 3, H, W] -> features [B, 1280] -> logits [B, 29].
    # B=2 keeps both v7x TensorCores busy on the "parallel" batch axis.
    B, C, H, W = 2, 3, 16, 16
    ENET_OUT = 1280
    NUM_CLASSES = 29

    key = jax.random.PRNGKey(0)
    k_x, k_wh, k_wc, k_bc = jax.random.split(key, 4)

    x = jax.random.normal(k_x, (B, C, H, W), dtype=jnp.float32)
    w_head = jax.random.normal(k_wh, (C, ENET_OUT), dtype=jnp.float32) * 0.05
    w_cls = jax.random.normal(k_wc, (ENET_OUT, NUM_CLASSES), dtype=jnp.float32) * 0.02
    b_cls = jax.random.normal(k_bc, (NUM_CLASSES,), dtype=jnp.float32) * 0.01

    logits = letter_classifier_forward(x, w_head, w_cls, b_cls)
    jax.block_until_ready(logits)
    assert logits.shape == (B, NUM_CLASSES), logits.shape

    # Pure-JAX reference of the same synthetic forward (same bf16 quantization
    # of the projection operands as the kernel, f32 math, standard sigmoid).
    x3d = jnp.transpose(x, (0, 2, 3, 1)).reshape(B, H * W, C)
    x3d_q = x3d.astype(jnp.bfloat16).astype(jnp.float32)
    wh_q = w_head.astype(jnp.bfloat16).astype(jnp.float32)
    feats = jnp.einsum("bsc,cf->bsf", x3d_q, wh_q)
    feats = feats * jax.nn.sigmoid(feats)
    pooled = feats.mean(axis=1)
    ref = pooled @ w_cls + b_cls

    max_err = float(jnp.max(jnp.abs(logits - ref)))
    assert jnp.allclose(logits, ref, atol=2e-2, rtol=2e-2), max_err

    print("KERNEL_OK")
</pallas_src>

<mosaic_0001>
module attributes {stable_mosaic.version = 11 : i64} {
  func.func @letter_classifier_kernel(%arg0: i32, %arg1: i32, %arg2: memref<1x256x8xbf16, #tpu.memory_space<vmem>>, %arg3: memref<8x1280xbf16, #tpu.memory_space<vmem>>, %arg4: memref<1280x128xf32, #tpu.memory_space<vmem>>, %arg5: memref<1x128xf32, #tpu.memory_space<vmem>>, %arg6: memref<1x1x128xf32, #tpu.memory_space<vmem>>, %arg7: memref<1x1280xf32, #tpu.memory_space<vmem>>) attributes {dimension_semantics = [#tpu.dimension_semantics<parallel>, #tpu.dimension_semantics<arbitrary>], iteration_bounds = array<i64: 2, 1>, scalar_prefetch = 0 : i64, scratch_operands = 1 : i64, tpu.core_type = #tpu.core_type<tc>, window_params = [{transform_indices = @transform_0, window_bounds = array<i64: 1, 256, 8>}, {pipeline_mode = #tpu.pipeline_mode<synchronous>, transform_indices = @transform_1, window_bounds = array<i64: 8, 1280>}, {pipeline_mode = #tpu.pipeline_mode<synchronous>, transform_indices = @transform_2, window_bounds = array<i64: 1280, 128>}, {pipeline_mode = #tpu.pipeline_mode<synchronous>, transform_indices = @transform_3, window_bounds = array<i64: 1, 128>}, {transform_indices = @transform_4, window_bounds = array<i64: 1, 1, 128>}]} {
    %c0_i32 = arith.constant 0 : i32
    %0 = arith.cmpi eq, %arg1, %c0_i32 : i32
    %1 = arith.extui %0 : i1 to i32
    %c0_i32_0 = arith.constant 0 : i32
    %2 = arith.cmpi ne, %1, %c0_i32_0 : i32
    scf.if %2 {
      %cst_16 = arith.constant 0.000000e+00 : f32
      %23 = vector.broadcast %cst_16 : f32 to vector<1x1280xf32>
      %c0_17 = arith.constant 0 : index
      %c0_18 = arith.constant 0 : index
      %24 = vector.load %arg7[%c0_17, %c0_18] : memref<1x1280xf32, #tpu.memory_space<vmem>>, vector<1x1280xf32>
      tpu.vector_store %arg7[%c0_17, %c0_18], %23 {strides = array<i32>} : memref<1x1280xf32, #tpu.memory_space<vmem>>, vector<1x1280xf32>,
    } else {
    }
    %c0 = arith.constant 0 : index
    %c0_1 = arith.constant 0 : index
    %c0_2 = arith.constant 0 : index
    %3 = vector.load %arg2[%c0, %c0_1, %c0_2] : memref<1x256x8xbf16, #tpu.memory_space<vmem>>, vector<1x256x8xbf16>
    %4 = vector.shape_cast %3 : vector<1x256x8xbf16> to vector<256x8xbf16>
    %c0_3 = arith.constant 0 : index
    %c0_4 = arith.constant 0 : index
    %5 = vector.load %arg3[%c0_3, %c0_4] : memref<8x1280xbf16, #tpu.memory_space<vmem>>, vector<8x1280xbf16>
    %cst = arith.constant dense<0.000000e+00> : vector<256x1280xf32>
    %6 = tpu.matmul %4, %5, %cst {dimension_numbers = #tpu.dot_dimension_numbers<[1], [0], [0], [1], [0, 0, 1, 1], [], []>} : vector<256x8xbf16>, vector<8x1280xbf16>, vector<256x1280xf32> -> vector<256x1280xf32>
    %cst_5 = arith.constant 5.000000e-01 : f32
    %7 = vector.broadcast %cst_5 : f32 to vector<256x1280xf32>
    %8 = arith.mulf %6, %7 : vector<256x1280xf32>
    %9 = math.tanh %8 : vector<256x1280xf32>
    %cst_6 = arith.constant 1.000000e+00 : f32
    %10 = vector.broadcast %cst_6 : f32 to vector<256x1280xf32>
    %11 = arith.addf %9, %10 : vector<256x1280xf32>
    %cst_7 = arith.constant 5.000000e-01 : f32
    %12 = vector.broadcast %cst_7 : f32 to vector<256x1280xf32>
    %13 = arith.mulf %11, %12 : vector<256x1280xf32>
    %14 = arith.mulf %6, %13 : vector<256x1280xf32>
    %cst_8 = arith.constant 1.000000e+00 : f32
    %15 = vector.broadcast %cst_8 : f32 to vector<1x256xf32>
    %c0_9 = arith.constant 0 : index
    %c0_10 = arith.constant 0 : index
    %16 = vector.load %arg7[%c0_9, %c0_10] : memref<1x1280xf32, #tpu.memory_space<vmem>>, vector<1x1280xf32>
    %cst_11 = arith.constant dense<0.000000e+00> : vector<1x1280xf32>
    %17 = tpu.matmul %15, %14, %cst_11 {dimension_numbers = #tpu.dot_dimension_numbers<[1], [0], [0], [1], [0, 0, 1, 1], [], []>} : vector<1x256xf32>, vector<256x1280xf32>, vector<1x1280xf32> -> vector<1x1280xf32>
    %18 = arith.addf %16, %17 : vector<1x1280xf32>
    %c0_12 = arith.constant 0 : index
    %c0_13 = arith.constant 0 : index
    %19 = vector.load %arg7[%c0_12, %c0_13] : memref<1x1280xf32, #tpu.memory_space<vmem>>, vector<1x1280xf32>
    tpu.vector_store %arg7[%c0_12, %c0_13], %18 {strides = array<i32>} : memref<1x1280xf32, #tpu.memory_space<vmem>>, vector<1x1280xf32>,
    %c0_i32_14 = arith.constant 0 : i32
    %20 = arith.cmpi eq, %arg1, %c0_i32_14 : i32
    %21 = arith.extui %20 : i1 to i32
    %c0_i32_15 = arith.constant 0 : i32
    %22 = arith.cmpi ne, %21, %c0_i32_15 : i32
    scf.if %22 {
      %c0_16 = arith.constant 0 : index
      %c0_17 = arith.constant 0 : index
      %23 = vector.load %arg7[%c0_16, %c0_17] : memref<1x1280xf32, #tpu.memory_space<vmem>>, vector<1x1280xf32>
      %c0_18 = arith.constant 0 : index
      %c0_19 = arith.constant 0 : index
      %24 = vector.load %arg4[%c0_18, %c0_19] : memref<1280x128xf32, #tpu.memory_space<vmem>>, vector<1280x128xf32>
      %cst_20 = arith.constant dense<0.000000e+00> : vector<1x128xf32>
      %25 = tpu.matmul %23, %24, %cst_20 {dimension_numbers = #tpu.dot_dimension_numbers<[1], [0], [0], [1], [0, 0, 1, 1], [], []>} : vector<1x1280xf32>, vector<1280x128xf32>, vector<1x128xf32> -> vector<1x128xf32>
      %c0_21 = arith.constant 0 : index
      %c0_22 = arith.constant 0 : index
      %26 = vector.load %arg5[%c0_21, %c0_22] : memref<1x128xf32, #tpu.memory_space<vmem>>, vector<1x128xf32>
      %27 = arith.addf %25, %26 : vector<1x128xf32>
      %c0_23 = arith.constant 0 : index
      %c0_24 = arith.constant 0 : index
      %c0_25 = arith.constant 0 : index
      %28 = vector.load %arg6[%c0_23, %c0_24, %c0_25] : memref<1x1x128xf32, #tpu.memory_space<vmem>>, vector<1x1x128xf32>
      %29 = vector.shape_cast %28 : vector<1x1x128xf32> to vector<1x128xf32>
      %30 = vector.shape_cast %27 : vector<1x128xf32> to vector<1x1x128xf32>
      tpu.vector_store %arg6[%c0_23, %c0_24, %c0_25], %30 {strides = array<i32>} : memref<1x1x128xf32, #tpu.memory_space<vmem>>, vector<1x1x128xf32>,
    } else {
    }
    return
  }
  func.func @transform_0(%arg0: i32, %arg1: i32) -> (i32, i32, i32) {
    %c0_i32 = arith.constant 0 : i32
    %c0_i32_0 = arith.constant 0 : i32
    return %arg0, %arg1, %c0_i32 : i32, i32, i32
  }
  func.func @transform_1(%arg0: i32, %arg1: i32) -> (i32, i32) {
    %c0_i32 = arith.constant 0 : i32
    %c0_i32_0 = arith.constant 0 : i32
    %c0_i32_1 = arith.constant 0 : i32
    return %c0_i32, %c0_i32_0 : i32, i32
  }
  func.func @transform_2(%arg0: i32, %arg1: i32) -> (i32, i32) {
    %c0_i32 = arith.constant 0 : i32
    %c0_i32_0 = arith.constant 0 : i32
    %c0_i32_1 = arith.constant 0 : i32
    return %c0_i32, %c0_i32_0 : i32, i32
  }
  func.func @transform_3(%arg0: i32, %arg1: i32) -> (i32, i32) {
    %c0_i32 = arith.constant 0 : i32
    %c0_i32_0 = arith.constant 0 : i32
    %c0_i32_1 = arith.constant 0 : i32
    return %c0_i32, %c0_i32_0 : i32, i32
  }
  func.func @transform_4(%arg0: i32, %arg1: i32) -> (i32, i32, i32) {
    %c0_i32 = arith.constant 0 : i32
    %c0_i32_0 = arith.constant 0 : i32
    %c0_i32_1 = arith.constant 0 : i32
    return %arg0, %c0_i32, %c0_i32_0 : i32, i32, i32
  }
}

</mosaic_0001>

<bundles_post_ra>
// kernel: _forward_impl.1
= control target key start
LH: loop header
LB: loop body
LE: loop exit
PB: predicated region body
PF: predicated region fallthrough
CT: control target
= control target key end

     0   :  { %9 = vsyncpa [#allocation4], 0  ;;  %s8410_s0 = inlined_call_operand.vmem [shape: bf16[2,256,8], index: 0, kind: input, shape index: {}]   ;;  %s8411_s1 = inlined_call_operand.vmem [shape: bf16[8,1280], index: 1, kind: input, shape index: {}]   ;;  %s8412_s2 = inlined_call_operand.vmem [shape: f32[1280,128], index: 2, kind: input, shape index: {}]   ;;  %s8413_s3 = inlined_call_operand.vmem [shape: f32[1,128], index: 3, kind: input, shape index: {}]   ;;  %s8414_s4 = inlined_call_operand.hbm [shape: f32[2,1,128], index: 4, kind: output, shape index: {}]  }
   0x1   :  { %11 = vsyncpa [#allocation4 + $0x1], 0  ;;  %s5254_s15 = smov 0   ;;  %s5256_s16 = smov 0  }
   0x2   :  { %s5258_s17 = smov 0   ;;  %s5260_s18 = smov 0  }
   0x3   :  { %s5262_s19 = smov 0   ;;  %s5264_s20 = smov 0  }
   0x4 LB: > { %s4113_s21 = sadd.s32 4294967295, %s5222_s20   ;;  %s4114_s22 = sadd.s32 4294967294, %s5222_s20   ;;  %s5222_s20 = sphi %s5264_s20, %s17_s20   ;;  %s5218_s19 = sphi %s5262_s19, %s9423_s19   ;;  %s5214_s18 = sphi %s5260_s18, %s9422_s18   ;;  %s5210_s17 = sphi %s5258_s17, %s9421_s17   ;;  %s5206_s16 = sphi %s5256_s16, %s9420_s16   ;;  %s5202_s15 = sphi %s5254_s15, %s9419_s15  }
   0x5   : > { %s29_s23 = sadd.s32 1, %s5218_s19  ;;  %s127_s24 = sadd.s32 1, %s5210_s17 }
   0x6   : > { %p31_p0 = scmp.ge.s32.totalorder %s29_s23, 2  ;;  %p137_p1 = scmp.ne.s32.totalorder %s5210_s17, %s5206_s16 }
   0x7   : > { %p138_p2 = scmp.eq.s32.totalorder %s4113_s21, 1  ;;  %p143_p3 = scmp.ne.s32.totalorder %s5206_s16, %s5202_s15 }
   0x8   : > { %s9425_s23 = smov (%p31_p0, %s29_s23), 0  ;;  %p144_p5 = scmp.eq.s32.totalorder %s4114_s22, 1 }
   0x9   : > { %p5294_p4 = por %p138_p2, %p137_p1  ;;  %s124_s26 = ssub.s32 %s5218_s19, %s9425_s23 }
   0xa   : > { %p4117_p6 = scmp.ge.s32.totalorder %s5222_s20, 1  ;;  %p125_p7 = scmp.eq.s32.totalorder %s124_s26, 0 }
   0xb   : > { %p5301_p8 = por %p144_p5, %p143_p3  ;;  %p184_p9 = scmp.lt.s32.totalorder %s5222_s20, 3 }
   0xc   : > { %s5307_s28 = scalar_select %p125_p7, %s5210_s17, %s127_s24  }
   0xd   : > { %p185_p10 = pnand %p4117_p6, %p184_p9 }
   0xf   : > { %188 = sbr.rel (%p185_p10) target bundleno = 1102 (0x44e), region = 36 }
  0x14   : > { %v266_v0 = vld [vmem:[%s8411_s1] sm:$0xff]  ;;  %vm425_vm0 = vcmask 1043456   ;;  %v268_v1 = vld [vmem:[%s8411_s1 + $0x10] sm:$0xff]  ;;  %p214_p11 = scmp.lt.s32.totalorder %s5214_s18, 1  ;;  %v8418_v4 = vmov 0   ;;  %v267_v6 = vld [vmem:[%s8411_s1 + $0x8] sm:$0xff] }
  0x15   : > { %v4137_v2 = vcombine.high %v266_v0, %v266_v0  ;;  %v4136_v3 = vcombine.low %v266_v0, %v266_v0  ;;  %488 = vmatprep.mubr.bf16.mxu0 %v8418_v4  ;;  %628 = vmatprep.mubr.bf16.mxu1 %v8418_v4  ;;  %v4141_v5 = vcombine.high %v268_v1, %v268_v1  ;;  %v270_v7 = vld [vmem:[%s8411_s1 + $0x20] sm:$0xff]  ;;  %vm376_vm1 = vcmask 64512   ;;  %v269_v13 = vld [vmem:[%s8411_s1 + $0x18] sm:$0xff]  ;;  %s211_s30 = sand.u32 1, %s5206_s16   ;;  %s4231_s5 = sshll.u32 %s5214_s18, 4 }
  0x16   : > { %s215_s11 = scalar_select %p214_p11, %s5214_s18, 1  ;;  %v4140_v8 = vcombine.low %v268_v1, %v268_v1  ;;  %v4139_v9 = vcombine.high %v267_v6, %v267_v6  ;;  %v4144_v11 = vcombine.low %v270_v7, %v270_v7  ;;  %v4138_v12 = vcombine.low %v267_v6, %v267_v6 }
  0x17   : > { %4146 = vmatprep.subr.msk.bf16.mxu0 %vm425_vm0, %v4137_v2  ;;  %4410 = vmatprep.subr.msk.bf16.mxu1 %vm425_vm0, %v4137_v2  ;;  %v427_v10 = vsel %vm425_vm0, %v4136_v3, 0  ;;  %v4145_v18 = vcombine.high %v270_v7, %v270_v7  ;;  %v4143_v20 = vcombine.high %v269_v13, %v269_v13  ;;  %v4142_v23 = vcombine.low %v269_v13, %v269_v13  ;;  %s212_s6 = scalar_lea.vmem [#allocation3], %s211_s30  ;;  %s4042_s10 = scalar_lea.hbm %s8414_s4, %s4231_s5 }
  0x18   : > { %471 = vmatpush1.bf16.msra.mxu0 %v427_v10  ;;  %4411 = vmatpush1.bf16.msra.mxu1 %v427_v10  ;;  %s4234_s12 = sshll.u32 %s215_s11, 7  ;;  %v5339_v14 = vsel %vm425_vm0, %v4144_v11, 0  ;;  %v439_v16 = vsel %vm425_vm0, %v4140_v8, 0  ;;  %v433_v19 = vsel %vm425_vm0, %v4138_v12, 0  ;;  %s4044_s7 = sshll.u32 %s212_s6, 4  ;;  %s4045_s7 = int_to_ptr.vmem [resolvable:$true] %s4044_s7 }
  0x19   : > { %4180 = vmatprep.subr.msk.bf16.mxu0 %vm425_vm0, %v4141_v5  ;;  %s5332_s21 = scalar_lea.vmem %s8410_s0, %s4234_s12  ;;  %4163 = vmatprep.subr.msk.bf16.mxu1 %vm425_vm0, %v4139_v9  ;;  %v445_v25 = vsel %vm425_vm0, %v4142_v23, 0  ;;  %s4032_s11 = scalar_lea.sflag [#allocation4], %s211_s30 }
  0x1a   : > { %v5342_v15 = vld [vmem:[%s5332_s21] sm:$0xff]   ;;  %v5346_v17 = vld [vmem:[%s5332_s21 + $0x70] sm:$0xff]   ;;  %v5357_v21 = vld [vmem:[%s5332_s21 + $0x8] sm:$0xff]   ;;  %s5146_s12 = scalar_lea.vmem %s4045_s7, 16  ;;  %s5228_s13 = smov [#allocation3]  }
  0x1b   : > { %4147 = vmatmul.mubr.msk.bf16.vlgmr.msra.gmra.mxu0 %vm376_vm1, %v5342_v15  ;;  %4161 = vmatmul.mubr.msk.bf16.vlgmr.msra.gmra.mxu1 %vm376_vm1, %v5346_v17  ;;  %v5361_v22 = vld [vmem:[%s5332_s21 + $0x78] sm:$0xff]   ;;  %v5370_v24 = vld [vmem:[%s5332_s21 + $0x10] sm:$0xff]   ;;  %v5389_v27 = vld [vmem:[%s5332_s21 + $0x20] sm:$0xff]   ;;  %p5147_p12 = scmp.ne.s32.totalorder %s4045_s7, %s5146_s12  ;;  %s5150_s14 = sshll.u32 %s5228_s13, 4  ;;  %s5151_s14 = int_to_ptr.vmem [resolvable:$false] %s5150_s14 }
  0x1c   : > { %857 = vmatpush1.bf16.msra.mxu0 %v439_v16  ;;  %498 = vmatprep.mubr.bf16.mxu0 %v8418_v4  ;;  %v5380_v26 = vld [vmem:[%s5332_s21 + $0x18] sm:$0xff]   ;;  %8658 = vst [vmem:[#allocation6_spill] sm:$0xff] %v5389_v27  ;;  %v5398_v28 = vld [vmem:[%s5332_s21 + $0x28] sm:$0xff]   ;;  %v5407_v29 = vld [vmem:[%s5332_s21 + $0x30] sm:$0xff]   ;;  %s5152_s18 = scalar_lea.vmem %s5151_s14, 32  ;;  %p5153_p1 = scmp.lt.s32.totalorder %s4045_s7, %s5151_s14 }
  0x1d   : > { %638 = vmatprep.mubr.bf16.mxu1 %v8418_v4  ;;  %664 = vmatpush1.bf16.msra.mxu1 %v433_v19  ;;  %8659 = vst [vmem:[#allocation7_spill] sm:$0xff] %v5398_v28  ;;  %8660 = vst [vmem:[#allocation8_spill] sm:$0xff] %v5407_v29  ;;  %v5416_v30 = vld [vmem:[%s5332_s21 + $0x38] sm:$0xff]   ;;  %v5425_v31 = vld [vmem:[%s5332_s21 + $0x40] sm:$0xff]   ;;  %p5148_p13 = pnand %p5147_p12, %p5294_p4  ;;  %p5154_p2 = scmp.lt.s32.totalorder %s5152_s18, %s5146_s12 }
  0x1e   : > { %4214 = vmatprep.subr.msk.bf16.mxu0 %vm425_vm0, %v4145_v18  ;;  %4197 = vmatprep.subr.msk.bf16.mxu1 %vm425_vm0, %v4143_v20  ;;  %v5434_v32 = vld [vmem:[%s5332_s21 + $0x48] sm:$0xff]   ;;  %v5443_v33 = vld [vmem:[%s5332_s21 + $0x50] sm:$0xff]   ;;  %v5452_v34 = vld [vmem:[%s5332_s21 + $0x58] sm:$0xff]  }
  0x1f   : > { %v5461_v35 = vld [vmem:[%s5332_s21 + $0x60] sm:$0xff]   ;;  %v5470_v36 = vld [vmem:[%s5332_s21 + $0x68] sm:$0xff]   ;;  %p5149_p0 = pneg %p5148_p13  ;;  %p5155_p3 = por %p5154_p2, %p5153_p1 }
  0x21   : > { %p5156_p5 = pnand %p5155_p3, %p5149_p0 }
  0x23   : > { %4148 = vmatmul.mubr.msk.bf16.gmra.mxu0 %vm376_vm1, %v5357_v21  ;;  %4162 = vmatmul.mubr.msk.bf16.gmra.mxu1 %vm376_vm1, %v5361_v22 }
  0x24   : > { %508 = vmatprep.mubr.bf16.mxu0 %v8418_v4  ;;  %681 = vmatprep.mubr.bf16.mxu1 %v8418_v4 }
  0x2b   : > { %4149 = vmatmul.mubr.msk.bf16.gmra.mxu0 %vm376_vm1, %v5370_v24  ;;  %4164 = vmatmul.mubr.msk.bf16.vlgmr.msra.gmra.mxu1 %vm376_vm1, %v5342_v15 }
  0x2c   : > { %518 = vmatprep.mubr.bf16.mxu0 %v8418_v4  ;;  %691 = vmatprep.mubr.bf16.mxu1 %v8418_v4 }
  0x2d   : > { %1050 = vmatpush1.bf16.msra.mxu1 %v445_v25 }
  0x33   : > { %4150 = vmatmul.mubr.msk.bf16.gmra.mxu0 %vm376_vm1, %v5380_v26  ;;  %4165 = vmatmul.mubr.msk.bf16.gmra.mxu1 %vm376_vm1, %v5357_v21 }
  0x34   : > { %528 = vmatprep.mubr.bf16.mxu0 %v8418_v4  ;;  %701 = vmatprep.mubr.bf16.mxu1 %v8418_v4 }
  0x3b   : > { %4151 = vmatmul.mubr.msk.bf16.gmra.mxu0 %vm376_vm1, %v5389_v27  ;;  %4166 = vmatmul.mubr.msk.bf16.gmra.mxu1 %vm376_vm1, %v5370_v24 }
  0x3c   : > { %538 = vmatprep.mubr.bf16.mxu0 %v8418_v4  ;;  %711 = vmatprep.mubr.bf16.mxu1 %v8418_v4 }
  0x43   : > { %4152 = vmatmul.mubr.msk.bf16.gmra.mxu0 %vm376_vm1, %v5398_v28  ;;  %4167 = vmatmul.mubr.msk.bf16.gmra.mxu1 %vm376_vm1, %v5380_v26 }
  0x44   : > { %548 = vmatprep.mubr.bf16.mxu0 %v8418_v4  ;;  %721 = vmatprep.mubr.bf16.mxu1 %v8418_v4 }
  0x4b   : > { %4153 = vmatmul.mubr.msk.bf16.gmra.mxu0 %vm376_vm1, %v5407_v29  ;;  %4168 = vmatmul.mubr.msk.bf16.gmra.mxu1 %vm376_vm1, %v5389_v27 }
  0x4c   : > { %558 = vmatprep.mubr.bf16.mxu0 %v8418_v4  ;;  %731 = vmatprep.mubr.bf16.mxu1 %v8418_v4 }
  0x53   : > { %4154 = vmatmul.mubr.msk.bf16.gmra.mxu0 %vm376_vm1, %v5416_v30  ;;  %4169 = vmatmul.mubr.msk.bf16.gmra.mxu1 %vm376_vm1, %v5398_v28 }
  0x54   : > { %568 = vmatprep.mubr.bf16.mxu0 %v8418_v4  ;;  %741 = vmatprep.mubr.bf16.mxu1 %v8418_v4 }
  0x5b   : > { %4155 = vmatmul.mubr.msk.bf16.gmra.mxu0 %vm376_vm1, %v5425_v31  ;;  %4170 = vmatmul.mubr.msk.bf16.gmra.mxu1 %vm376_vm1, %v5407_v29 }
  0x5c   : > { %578 = vmatprep.mubr.bf16.mxu0 %v8418_v4  ;;  %751 = vmatprep.mubr.bf16.mxu1 %v8418_v4 }
  0x63   : > { %4156 = vmatmul.mubr.msk.bf16.gmra.mxu0 %vm376_vm1, %v5434_v32  ;;  %4171 = vmatmul.mubr.msk.bf16.gmra.mxu1 %vm376_vm1, %v5416_v30 }
  0x64   : > { %588 = vmatprep.mubr.bf16.mxu0 %v8418_v4  ;;  %761 = vmatprep.mubr.bf16.mxu1 %v8418_v4 }
  0x6b   : > { %4157 = vmatmul.mubr.msk.bf16.gmra.mxu0 %vm376_vm1, %v5443_v33  ;;  %4172 = vmatmul.mubr.msk.bf16.gmra.mxu1 %vm376_vm1, %v5425_v31 }
  0x6c   : > { %598 = vmatprep.mubr.bf16.mxu0 %v8418_v4  ;;  %771 = vmatprep.mubr.bf16.mxu1 %v8418_v4 }
  0x73   : > { %4158 = vmatmul.mubr.msk.bf16.gmra.mxu0 %vm376_vm1, %v5452_v34  ;;  %4173 = vmatmul.mubr.msk.bf16.gmra.mxu1 %vm376_vm1, %v5434_v32 }
  0x74   : > { %608 = vmatprep.mubr.bf16.mxu0 %v8418_v4  ;;  %781 = vmatprep.mubr.bf16.mxu1 %v8418_v4 }
  0x7b   : > { %4159 = vmatmul.mubr.msk.bf16.gmra.mxu0 %vm376_vm1, %v5461_v35  ;;  %4174 = vmatmul.mubr.msk.bf16.gmra.mxu1 %vm376_vm1, %v5443_v33 }
  0x7c   : > { %618 = vmatprep.mubr.bf16.mxu0 %v8418_v4  ;;  %791 = vmatprep.mubr.bf16.mxu1 %v8418_v4 }
  0x83   : > { %4160 = vmatmul.mubr.msk.bf16.gmra.mxu0 %vm376_vm1, %v5470_v36  ;;  %4175 = vmatmul.mubr.msk.bf16.gmra.mxu1 %vm376_vm1, %v5452_v34 }
  0x84   : > { %874 = vmatprep.mubr.bf16.mxu0 %v8418_v4  ;;  %801 = vmatprep.mubr.bf16.mxu1 %v8418_v4 }
  0x8b   : > { %4181 = vmatmul.mubr.msk.bf16.vlgmr.msra.gmra.mxu0 %vm376_vm1, %v5342_v15  ;;  %4176 = vmatmul.mubr.msk.bf16.gmra.mxu1 %vm376_vm1, %v5461_v35 }
  0x8c   : > { %1243 = vmatpush1.bf16.msra.mxu0 %v5339_v14  ;;  %811 = vmatprep.mubr.bf16.mxu1 %v8418_v4 }
  0x8d   : > { %884 = vmatprep.mubr.bf16.mxu0 %v8418_v4 }
  0x93   : > { %4182 = vmatmul.mubr.msk.bf16.gmra.mxu0 %vm376_vm1, %v5357_v21  ;;  %4177 = vmatmul.mubr.msk.bf16.gmra.mxu1 %vm376_vm1, %v5470_v36 }
  0x94   : > { %894 = vmatprep.mubr.bf16.mxu0 %v8418_v4  ;;  %821 = vmatprep.mubr.bf16.mxu1 %v8418_v4 }
  0x9b   : > { %4183 = vmatmul.mubr.msk.bf16.gmra.mxu0 %vm376_vm1, %v5370_v24  ;;  %4178 = vmatmul.mubr.msk.bf16.gmra.mxu1 %vm376_vm1, %v5346_v17 }
  0x9c   : > { %904 = vmatprep.mubr.bf16.mxu0 %v8418_v4  ;;  %831 = vmatprep.mubr.bf16.mxu1 %v8418_v4 }
  0xa3   : > { %4184 = vmatmul.mubr.msk.bf16.gmra.mxu0 %vm376_vm1, %v5380_v26  ;;  %4179 = vmatmul.mubr.msk.bf16.gmra.mxu1 %vm376_vm1, %v5361_v22 }
  0xa4   : > { %914 = vmatprep.mubr.bf16.mxu0 %v8418_v4  ;;  %1067 = vmatprep.mubr.bf16.mxu1 %v8418_v4 }
  0xab   : > { %4185 = vmatmul.mubr.msk.bf16.gmra.mxu0 %vm376_vm1, %v5389_v27  ;;  %4198 = vmatmul.mubr.msk.bf16.vlgmr.msra.gmra.mxu1 %vm376_vm1, %v5342_v15 }
  0xac   : > { %924 = vmatprep.mubr.bf16.mxu0 %v8418_v4  ;;  %1077 = vmatprep.mubr.bf16.mxu1 %v8418_v4 }
  0xb3   : > { %4186 = vmatmul.mubr.msk.bf16.gmra.mxu0 %vm376_vm1, %v5398_v28  ;;  %4199 = vmatmul.mubr.msk.bf16.gmra.mxu1 %vm376_vm1, %v5357_v21 }
  0xb4   : > { %934 = vmatprep.mubr.bf16.mxu0 %v8418_v4  ;;  %1087 = vmatprep.mubr.bf16.mxu1 %v8418_v4 }
  0xbb   : > { %4187 = vmatmul.mubr.msk.bf16.gmra.mxu0 %vm376_vm1, %v5407_v29  ;;  %4200 = vmatmul.mubr.msk.bf16.gmra.mxu1 %vm376_vm1, %v5370_v24 }
  0xbc   : > { %944 = vmatprep.mubr.bf16.mxu0 %v8418_v4  ;;  %1097 = vmatprep.mubr.bf16.mxu1 %v8418_v4 }
  0xc3   : > { %4188 = vmatmul.mubr.msk.bf16.gmra.mxu0 %vm376_vm1, %v5416_v30  ;;  %4201 = vmatmul.mubr.msk.bf16.gmra.mxu1 %vm376_vm1, %v5380_v26 }
  0xc4   : > { %954 = vmatprep.mubr.bf16.mxu0 %v8418_v4  ;;  %1107 = vmatprep.mubr.bf16.mxu1 %v8418_v4 }
  0xcb   : > { %4189 = vmatmul.mubr.msk.bf16.gmra.mxu0 %vm376_vm1, %v5425_v31  ;;  %4202 = vmatmul.mubr.msk.bf16.gmra.mxu1 %vm376_vm1, %v5389_v27 }
  0xcc   : > { %964 = vmatprep.mubr.bf16.mxu0 %v8418_v4  ;;  %1117 = vmatprep.mubr.bf16.mxu1 %v8418_v4 }
  0xd3   : > { %4190 = vmatmul.mubr.msk.bf16.gmra.mxu0 %vm376_vm1, %v5434_v32  ;;  %4203 = vmatmul.mubr.msk.bf16.gmra.mxu1 %vm376_vm1, %v5398_v28 }
  0xd4   : > { %974 = vmatprep.mubr.bf16.mxu0 %v8418_v4  ;;  %1127 = vmatprep.mubr.bf16.mxu1 %v8418_v4 }
  0xdb   : > { %v5539_v37 = vpop.f32.mrf.mxu0  ;;  %4191 = vmatmul.mubr.msk.bf16.gmra.mxu0 %vm376_vm1, %v5443_v33  ;;  %v5543_v38 = vpop.f32.mrf.mxu1  ;;  %4204 = vmatmul.mubr.msk.bf16.gmra.mxu1 %vm376_vm1, %v5407_v29 }
  0xdc   : > { %984 = vmatprep.mubr.bf16.mxu0 %v8418_v4  ;;  %1137 = vmatprep.mubr.bf16.mxu1 %v8418_v4  ;;  %v1421_v63 = vmul.f32 0.5, %v5539_v37  ;;  %v1701_v2 = vmul.f32 0.5, %v5543_v38 }
  0xdd   : > { %v5548_v39 = vpop.f32.mrf.mxu0  ;;  %v5551_v40 = vpop.f32.mrf.mxu1 }
  0xde   : > { %4497 = vtanh.f32 %v1421_v63  ;;  %v1422_v6 = vmul.f32 0.5, %v5548_v39  ;;  %v1702_v8 = vmul.f32 0.5, %v5551_v40 }
  0xdf   : > { %v5553_v41 = vpop.f32.mrf.mxu0  ;;  %v5555_v42 = vpop.f32.mrf.mxu1  ;;  %4499 = vtanh.f32 %v1701_v2 }
  0xe0   : > { %v1431_v10 = vmul.f32 0.5, %v5553_v41  ;;  %v1711_v12 = vmul.f32 0.5, %v5555_v42  ;;  %4501 = vtanh.f32 %v1422_v6 }
  0xe1   : > { %v5557_v43 = vpop.f32.mrf.mxu0  ;;  %v5559_v44 = vpop.f32.mrf.mxu1  ;;  %4503 = vtanh.f32 %v1702_v8 }
  0xe2   : > { %v1432_v14 = vmul.f32 0.5, %v5557_v43  ;;  %v1712_v18 = vmul.f32 0.5, %v5559_v44  ;;  %4505 = vtanh.f32 %v1431_v10 }
  0xe3   : > { %v5561_v45 = vpop.f32.mrf.mxu0  ;;  %4192 = vmatmul.mubr.msk.bf16.gmra.mxu0 %vm376_vm1, %v5452_v34  ;;  %v5565_v46 = vpop.f32.mrf.mxu1  ;;  %4205 = vmatmul.mubr.msk.bf16.gmra.mxu1 %vm376_vm1, %v5416_v30  ;;  %4507 = vtanh.f32 %v1711_v12 }
  0xe4   : > { %994 = vmatprep.mubr.bf16.mxu0 %v8418_v4  ;;  %1147 = vmatprep.mubr.bf16.mxu1 %v8418_v4  ;;  %v1441_v20 = vmul.f32 0.5, %v5561_v45  ;;  %4509 = vtanh.f32 %v1432_v14  ;;  %v1721_v30 = vmul.f32 0.5, %v5565_v46 }
  0xe5   : > { %v5570_v47 = vpop.f32.mrf.mxu0  ;;  %v5573_v48 = vpop.f32.mrf.mxu1  ;;  %4511 = vtanh.f32 %v1712_v18 }
  0xe6   : > { %4513 = vtanh.f32 %v1441_v20  ;;  %v1442_v2 = vmul.f32 0.5, %v5570_v47  ;;  %v1722_v10 = vmul.f32 0.5, %v5573_v48 }
  0xe7   : > { %v5575_v49 = vpop.f32.mrf.mxu0  ;;  %v5577_v50 = vpop.f32.mrf.mxu1  ;;  %4515 = vtanh.f32 %v1721_v30 }
  0xe8   : > { %v1451_v14 = vmul.f32 0.5, %v5575_v49  ;;  %4517 = vtanh.f32 %v1442_v2 }
  0xe9   : > { %v5579_v51 = vpop.f32.mrf.mxu0  ;;  %v5581_v52 = vpop.f32.mrf.mxu1  ;;  %4519 = vtanh.f32 %v1722_v10  ;;  %v8685_v10 = vmov 0  }
  0xea   : > { %8661 = vst [vmem:[#allocation9_spill] sm:$0xff] %v5581_v52  ;;  %v1452_v28 = vmul.f32 0.5, %v5579_v51  ;;  %4521 = vtanh.f32 %v1451_v14 }
  0xeb   : > { %v5583_v53 = vpop.f32.mrf.mxu0  ;;  %4193 = vmatmul.mubr.msk.bf16.gmra.mxu0 %vm376_vm1, %v5461_v35  ;;  %v5587_v54 = vpop.f32.mrf.mxu1  ;;  %4206 = vmatmul.mubr.msk.bf16.gmra.mxu1 %vm376_vm1, %v5425_v31 }
  0xec   : > { %8662 = vst [vmem:[#allocation10_spill] sm:$0xff] %v5583_v53  ;;  %8663 = vst [vmem:[#allocation11_spill] sm:$0xff] %v5587_v54  ;;  %1004 = vmatprep.mubr.bf16.mxu0 %v8418_v4  ;;  %1157 = vmatprep.mubr.bf16.mxu1 %v8418_v4  ;;  %v4498_v8 = vpop.eup %4497  ;;  %v1423_v14 = vmul.f32 0.5, %v5587_v54 }
  0xed   : > { %v5592_v55 = vpop.f32.mrf.mxu0  ;;  %v5595_v56 = vpop.f32.mrf.mxu1  ;;  %v2061_v30 = vadd.f32 1.0, %v4498_v8 }
  0xee   : > { %8664 = vst [vmem:[#allocation12_spill] sm:$0xff] %v5592_v55  ;;  %8665 = vst [vmem:[#allocation13_spill] sm:$0xff] %v5595_v56  ;;  %v4500_v20 = vpop.eup %4499  ;;  %v1424_v54 = vmul.f32 0.5, %v5595_v56 }
  0xef   : > { %v5597_v57 = vpop.f32.mrf.mxu0  ;;  %v5599_v58 = vpop.f32.mrf.mxu1 }
  0xf1   : > { %v5601_v59 = vpop.f32.mrf.mxu0  ;;  %v5603_v60 = vpop.f32.mrf.mxu1 }
  0xf3   : > { %v5605_v61 = vpop.f32.mrf.mxu0  ;;  %4194 = vmatmul.mubr.msk.bf16.gmra.mxu0 %vm376_vm1, %v5470_v36  ;;  %v5609_v62 = vpop.f32.mrf.mxu1  ;;  %4207 = vmatmul.mubr.msk.bf16.gmra.mxu1 %vm376_vm1, %v5434_v32 }
  0xf4   : > { %1014 = vmatprep.mubr.bf16.mxu0 %v8418_v4  ;;  %1167 = vmatprep.mubr.bf16.mxu1 %v8418_v4 }
  0xf5   : > { %v5615_v0 = vpop.f32.mrf.mxu0  ;;  %v5618_v1 = vpop.f32.mrf.mxu1 }
  0xf7   : > { %v5621_v3 = vpop.f32.mrf.mxu0  ;;  %v5623_v5 = vpop.f32.mrf.mxu1 }
  0xf8   : > { %8666 = vst [vmem:[#allocation14_spill] sm:$0xff] %v5623_v5 }
  0xf9   : > { %v5626_v7 = vpop.f32.mrf.mxu0  ;;  %v5629_v9 = vpop.f32.mrf.mxu1 }
  0xfa   : > { %8667 = vst [vmem:[#allocation15_spill] sm:$0xff] %v5629_v9 }
  0xfb   : > { %v5632_v11 = vpop.f32.mrf.mxu0  ;;  %4195 = vmatmul.mubr.msk.bf16.gmra.mxu0 %vm376_vm1, %v5346_v17  ;;  %v5637_v13 = vpop.f32.mrf.mxu1  ;;  %4208 = vmatmul.mubr.msk.bf16.gmra.mxu1 %vm376_vm1, %v5443_v33 }
  0xfc   : > { %8668 = vst [vmem:[#allocation16_spill] sm:$0xff] %v5632_v11  ;;  %8669 = vst [vmem:[#allocation17_spill] sm:$0xff] %v5637_v13  ;;  %1024 = vmatprep.mubr.bf16.mxu0 %v8418_v4  ;;  %1177 = vmatprep.mubr.bf16.mxu1 %v8418_v4 }
  0xfd   : > { %v5643_v16 = vpop.f32.mrf.mxu0  ;;  %v5647_v19 = vpop.f32.mrf.mxu1 }
  0xfe   : > { %8670 = vst [vmem:[#allocation18_spill] sm:$0xff] %v5647_v19 }
  0xff   : > { %v5650_v23 = vpop.f32.mrf.mxu0  ;;  %v5652_v25 = vpop.f32.mrf.mxu1 }
 0x100   : > { %8671 = vst [vmem:[#allocation19_spill] sm:$0xff] %v5650_v23  ;;  %8672 = vst [vmem:[#allocation20_spill] sm:$0xff] %v5652_v25 }
 0x101   : > { %v5655_v31 = vpop.f32.mrf.mxu0  ;;  %v5657_v32 = vpop.f32.mrf.mxu1 }
 0x102   : > { %8673 = vst [vmem:[#allocation21_spill] sm:$0xff] %v5655_v31  ;;  %8674 = vst [vmem:[#allocation22_spill] sm:$0xff] %v5657_v32  ;;  %v1732_v32 = vmul.f32 0.5, %v5581_v52  ;;  %v2341_v31 = vadd.f32 1.0, %v4500_v20 }
 0x103   : > { %v5659_v33 = vpop.f32.mrf.mxu0  ;;  %4196 = vmatmul.mubr.msk.bf16.gmra.mxu0 %vm376_vm1, %v5361_v22  ;;  %v5663_v63 = vpop.f32.mrf.mxu1  ;;  %4209 = vmatmul.mubr.msk.bf16.gmra.mxu1 %vm376_vm1, %v5452_v34  ;;  %v1731_v34 = vmul.f32 0.5, %v5577_v50 }
 0x104   : > { %8675 = vst [vmem:[#allocation23_spill] sm:$0xff] %v5659_v33  ;;  %8676 = vst [vmem:[#allocation24_spill] sm:$0xff] %v5663_v63  ;;  %1260 = vmatprep.mubr.bf16.mxu0 %v8418_v4  ;;  %1187 = vmatprep.mubr.bf16.mxu1 %v8418_v4  ;;  %v4502_v4 = vpop.eup %4501  ;;  %v1461_v33 = vmul.f32 0.5, %v5583_v53 }
 0x105   : > { %v5669_v6 = vpop.f32.mrf.mxu0  ;;  %v5673_v12 = vpop.f32.mrf.mxu1  ;;  %4523 = vtanh.f32 %v1731_v34  ;;  %v2062_v20 = vadd.f32 1.0, %v4502_v4  ;;  %v1462_v34 = vmul.f32 0.5, %v5592_v55 }
 0x106   : > { %8677 = vst [vmem:[#allocation25_spill] sm:$0xff] %v5669_v6  ;;  %8678 = vst [vmem:[#allocation26_spill] sm:$0xff] %v5673_v12  ;;  %v4504_v25 = vpop.eup %4503  ;;  %4525 = vtanh.f32 %v1452_v28 }
 0x107   : > { %v5676_v18 = vpop.f32.mrf.mxu0  ;;  %v5679_v29 = vpop.f32.mrf.mxu1  ;;  %4527 = vtanh.f32 %v1732_v32  ;;  %v2382_v32 = vmul.f32 0.5, %v2062_v20 }
 0x108   : > { %8679 = vst [vmem:[#allocation27_spill] sm:$0xff] %v5676_v18  ;;  %8680 = vst [vmem:[#allocation28_spill] sm:$0xff] %v5679_v29  ;;  %v4506_v2 = vpop.eup %4505  ;;  %v2381_v29 = vmul.f32 0.5, %v2061_v30  ;;  %4529 = vtanh.f32 %v1461_v33 }
 0x109   : > { %v5682_v63 = vpop.f32.mrf.mxu0  ;;  %v5685_v12 = vpop.f32.mrf.mxu1  ;;  %v2071_v28 = vadd.f32 1.0, %v4506_v2  ;;  %4531 = vtanh.f32 %v1423_v14  ;;  %v1433_v2 = vmul.f32 0.5, %v5599_v58 }
 0x10a   : > { %8681 = vst [vmem:[#allocation29_spill] sm:$0xff] %v5682_v63  ;;  %8682 = vst [vmem:[#allocation30_spill] sm:$0xff] %v5685_v12  ;;  %v4508_v12 = vpop.eup %4507  ;;  %v2342_v63 = vadd.f32 1.0, %v4504_v25  ;;  %v5710_v52 = vmul.f32 %v2381_v29, %v5539_v37  ;;  %4533 = vtanh.f32 %v1462_v34  ;;  %v1472_v37 = vmul.f32 0.5, %v5601_v59 }
 0x10b   : > { %v5688_v6 = vpop.f32.mrf.mxu0  ;;  %4215 = vmatmul.mubr.msk.bf16.vlgmr.msra.gmra.mxu0 %vm376_vm1, %v5342_v15  ;;  %v5692_v8 = vpop.f32.mrf.mxu1  ;;  %4210 = vmatmul.mubr.msk.bf16.gmra.mxu1 %vm376_vm1, %v5461_v35  ;;  %v2661_v35 = vmul.f32 0.5, %v2341_v31  ;;  %v2351_v30 = vadd.f32 1.0, %v4508_v12  ;;  %v2391_v14 = vmul.f32 0.5, %v2071_v28  ;;  %4535 = vtanh.f32 %v1424_v54 }
 0x10c   : > { %8683 = vst [vmem:[#allocation31_spill] sm:$0xff] %v5688_v6  ;;  %8684 = vst [vmem:[#allocation32_spill] sm:$0xff] %v5692_v8  ;;  %1270 = vmatprep.mubr.bf16.mxu0 %v8685_v10  ;;  %1197 = vmatprep.mubr.bf16.mxu1 %v8685_v10  ;;  %v4510_v15 = vpop.eup %4509 }
 0x10d   : > { %v5698_v27 = vpop.f32.mrf.mxu0  ;;  %v5702_v8 = vpop.f32.mrf.mxu1  ;;  %8688 = vst [vmem:[#allocation35_spill] sm:$0xff] %v5710_v52  ;;  %v2072_v31 = vadd.f32 1.0, %v4510_v15  ;;  %v5719_v56 = vmul.f32 %v2661_v35, %v5543_v38  ;;  %v2671_v15 = vmul.f32 0.5, %v2351_v30  ;;  %v5733_v38 = vmul.f32 %v2382_v32, %v5548_v39 }
 0x10e   : > { %8686 = vst [vmem:[#allocation33_spill] sm:$0xff] %v5702_v8  ;;  %v4512_v18 = vpop.eup %4511  ;;  %v1471_v8 = vmul.f32 0.5, %v5597_v57  ;;  %v1481_v35 = vmul.f32 0.5, %v5605_v61  ;;  %v1443_v30 = vmul.f32 0.5, %v5609_v62 }
 0x10f   : > { %v5704_v6 = vpop.f32.mrf.mxu0  ;;  %v4514_v4 = vpop.eup %4513  ;;  %v2352_v33 = vadd.f32 1.0, %v4512_v18  ;;  %8689 = vst [vmem:[#allocation36_spill] sm:$0xff] %v5719_v56  ;;  %v1434_v18 = vmul.f32 0.5, %v5603_v60  ;;  %8690 = vst [vmem:[#allocation37_spill] sm:$0xff] %v5733_v38  ;;  %v5749_v38 = vmul.f32 %v2391_v14, %v5553_v41  ;;  %v1453_v14 = vmul.f32 0.5, %v5623_v5 }
 0x110   : > { %v5707_v53 = vpop.f32.mrf.mxu1  ;;  %v4516_v25 = vpop.eup %4515  ;;  %v2081_v29 = vadd.f32 1.0, %v4514_v4  ;;  %4537 = vtanh.f32 %v1471_v8  ;;  %v2392_v4 = vmul.f32 0.5, %v2072_v31  ;;  %v1482_v8 = vmul.f32 0.5, %v5615_v0 }
 0x111   : > { %8687 = vst [vmem:[#allocation34_spill] sm:$0xff] %v5707_v53  ;;  %v5713_v55 = vpop.f32.mrf.mxu0  ;;  %v2662_v53 = vmul.f32 0.5, %v2342_v63  ;;  %v2361_v63 = vadd.f32 1.0, %v4516_v25  ;;  %v4518_v54 = vpop.eup %4517  ;;  %v2672_v28 = vmul.f32 0.5, %v2352_v33  ;;  %4539 = vtanh.f32 %v1433_v2  ;;  %8693 = vst [vmem:[#allocation40_spill] sm:$0xff] %v5749_v38 }
 0x112   : > { %v5716_v12 = vpop.f32.mrf.mxu1  ;;  %v4520_v56 = vpop.eup %4519  ;;  %v2401_v32 = vmul.f32 0.5, %v2081_v29  ;;  %4541 = vtanh.f32 %v1472_v37  ;;  %v5752_v31 = vmul.f32 %v2671_v15, %v5555_v42  ;;  %v1444_v33 = vmul.f32 0.5, %v5618_v1 }
 0x113   : > { %v5722_v20 = vpop.f32.mrf.mxu0  ;;  %4216 = vmatmul.mubr.msk.bf16.gmra.mxu0 %vm376_vm1, %v5357_v21  ;;  %4211 = vmatmul.mubr.msk.bf16.gmra.mxu1 %vm376_vm1, %v5470_v36  ;;  %v5743_v39 = vmul.f32 %v2662_v53, %v5551_v40  ;;  %v4522_v52 = vpop.eup %4521  ;;  %4543 = vtanh.f32 %v1434_v18  ;;  %v2681_v53 = vmul.f32 0.5, %v2361_v63  ;;  %v2082_v29 = vadd.f32 1.0, %v4518_v54 }
 0x114   : > { %v5727_v34 = vpop.f32.mrf.mxu1  ;;  %1280 = vmatprep.mubr.bf16.mxu0 %v8685_v10  ;;  %1207 = vmatprep.mubr.bf16.mxu1 %v8685_v10  ;;  %8694 = vst [vmem:[#allocation41_spill] sm:$0xff] %v5752_v31  ;;  %v4524_v40 = vpop.eup %4523  ;;  %4545 = vtanh.f32 %v1481_v35  ;;  %v1491_v37 = vmul.f32 0.5, %v5621_v3  ;;  %v5761_v41 = vmul.f32 %v2392_v4, %v5557_v43  ;;  %v5764_v42 = vmul.f32 %v2672_v28, %v5559_v44 }
 0x115   : > { %v5736_v21 = vpop.f32.mrf.mxu0  ;;  %8692 = vst [vmem:[#allocation39_spill] sm:$0xff] %v5743_v39  ;;  %4547 = vtanh.f32 %v1443_v30  ;;  %v5770_v63 = vmul.f32 %v2401_v32, %v5561_v45  ;;  %v2362_v35 = vadd.f32 1.0, %v4520_v56  ;;  %v1492_v54 = vmul.f32 0.5, %v5626_v7 }
 0x116   : > { %v5740_v36 = vpop.f32.mrf.mxu1  ;;  %8695 = vst [vmem:[#allocation42_spill] sm:$0xff] %v5761_v41  ;;  %8696 = vst [vmem:[#allocation43_spill] sm:$0xff] %v5764_v42  ;;  %4549 = vtanh.f32 %v1482_v8  ;;  %v2091_v44 = vadd.f32 1.0, %v4522_v52  ;;  %v2371_v4 = vadd.f32 1.0, %v4524_v40  ;;  %v1454_v28 = vmul.f32 0.5, %v5629_v9 }
 0x117   : > { %8691 = vst [vmem:[#allocation38_spill] sm:$0xff] %v5740_v36  ;;  %v5746_v25 = vpop.f32.mrf.mxu0  ;;  %v4526_v36 = vpop.eup %4525  ;;  %8697 = vst [vmem:[#allocation44_spill] sm:$0xff] %v5770_v63  ;;  %4551 = vtanh.f32 %v1444_v33  ;;  %v5784_v45 = vmul.f32 %v2681_v53, %v5565_v46  ;;  %v2402_v56 = vmul.f32 0.5, %v2082_v29  ;;  %v1463_v40 = vmul.f32 0.5, %v5637_v13 }
 0x118   : > { %v5755_v2 = vpop.f32.mrf.mxu1  ;;  %v4528_v18 = vpop.eup %4527  ;;  %4553 = vtanh.f32 %v1491_v37  ;;  %v2092_v8 = vadd.f32 1.0, %v4526_v36  ;;  %v2682_v38 = vmul.f32 0.5, %v2362_v35  ;;  %v1502_v53 = vmul.f32 0.5, %v5643_v16 }
 0x119   : > { %v5758_v39 = vpop.f32.mrf.mxu0  ;;  %v4530_v43 = vpop.eup %4529  ;;  %8698 = vst [vmem:[#allocation45_spill] sm:$0xff] %v5784_v45  ;;  %v2372_v33 = vadd.f32 1.0, %v4528_v18  ;;  %4555 = vtanh.f32 %v1453_v14  ;;  %v2411_v37 = vmul.f32 0.5, %v2091_v44  ;;  %v2691_v45 = vmul.f32 0.5, %v2371_v4 }
 0x11a   : > { %v5767_v15 = vpop.f32.mrf.mxu1  ;;  %v4532_v52 = vpop.eup %4531  ;;  %v2101_v46 = vadd.f32 1.0, %v4530_v43  ;;  %4557 = vtanh.f32 %v1492_v54  ;;  %v1464_v41 = vmul.f32 0.5, %v5647_v19  ;;  %v5800_v18 = vmul.f32 %v2402_v56, %v5570_v47 }
 0x11b   : > { %v5773_v31 = vpop.f32.mrf.mxu0  ;;  %4217 = vmatmul.mubr.msk.bf16.gmra.mxu0 %vm376_vm1, %v5370_v24  ;;  %4212 = vmatmul.mubr.msk.bf16.gmra.mxu1 %vm376_vm1, %v5346_v17  ;;  %v1501_v24 = vmul.f32 0.5, %v5632_v11  ;;  %v4534_v42 = vpop.eup %4533  ;;  %4559 = vtanh.f32 %v1454_v28  ;;  %v2063_v63 = vadd.f32 1.0, %v4532_v52  ;;  %v1511_v35 = vmul.f32 0.5, %v5650_v23  ;;  %v8734_v11 = vld [vmem:[#allocation21_spill] sm:$0xff] }
 0x11c   : > { %v5778_v30 = vpop.f32.mrf.mxu1  ;;  %1290 = vmatprep.mubr.bf16.mxu0 %v8685_v10  ;;  %1217 = vmatprep.mubr.bf16.mxu1 %v8685_v10  ;;  %v4536_v14 = vpop.eup %4535  ;;  %8700 = vst [vmem:[#allocation47_spill] sm:$0xff] %v5800_v18  ;;  %v2412_v13 = vmul.f32 0.5, %v2092_v8  ;;  %v2692_v9 = vmul.f32 0.5, %v2372_v33  ;;  %v1542_v44 = vmul.f32 0.5, %v5698_v27  ;;  %v2421_v19 = vmul.f32 0.5, %v2101_v46 }
 0x11d   : > { %v5787_v32 = vpop.f32.mrf.mxu0  ;;  %4561 = vtanh.f32 %v1501_v24  ;;  %v4538_v43 = vpop.eup %4537  ;;  %v2102_v5 = vadd.f32 1.0, %v4534_v42  ;;  %v1552_v47 = vmul.f32 0.5, %v5713_v55  ;;  %v5814_v52 = vmul.f32 %v2682_v38, %v5573_v48 }
 0x11e   : > { %v5791_v17 = vpop.f32.mrf.mxu1  ;;  %4563 = vtanh.f32 %v1463_v40  ;;  %v4540_v28 = vpop.eup %4539  ;;  %v5817_v8 = vmul.f32 %v2411_v37, %v5575_v49  ;;  %v5820_v33 = vmul.f32 %v2691_v45, %v5577_v50  ;;  %v2064_v46 = vadd.f32 1.0, %v4536_v14 }
 0x11f   : > { %v5794_v29 = vpop.f32.mrf.mxu0  ;;  %4565 = vtanh.f32 %v1502_v53  ;;  %v4542_v24 = vpop.eup %4541  ;;  %8704 = vst [vmem:[#allocation51_spill] sm:$0xff] %v5814_v52  ;;  %v1561_v48 = vmul.f32 0.5, %v5722_v20  ;;  %v5831_v50 = vmul.f32 %v2412_v13, %v5579_v51  ;;  %v1551_v52 = vmul.f32 0.5, %v5704_v6 }
 0x120   : > { %v5797_v36 = vpop.f32.mrf.mxu1  ;;  %8705 = vst [vmem:[#allocation52_spill] sm:$0xff] %v5817_v8  ;;  %8706 = vst [vmem:[#allocation53_spill] sm:$0xff] %v5820_v33  ;;  %4567 = vtanh.f32 %v1464_v41  ;;  %v4544_v40 = vpop.eup %4543  ;;  %v8710_v41 = vld [vmem:[#allocation9_spill] sm:$0xff]  ;;  %v2111_v13 = vadd.f32 1.0, %v4538_v43  ;;  %v2073_v18 = vadd.f32 1.0, %v4540_v28  ;;  %v1572_v28 = vmul.f32 0.5, %v5758_v39 }
 0x121   : > { %8699 = vst [vmem:[#allocation46_spill] sm:$0xff] %v5797_v36  ;;  %v5803_v54 = vpop.f32.mrf.mxu0  ;;  %4569 = vtanh.f32 %v1511_v35  ;;  %v4546_v49 = vpop.eup %4545  ;;  %8709 = vst [vmem:[#allocation56_spill] sm:$0xff] %v5831_v50  ;;  %v5834_v45 = vmul.f32 %v2692_v9, %v8710_v41  ;;  %v2422_v35 = vmul.f32 0.5, %v2102_v5  ;;  %v1571_v9 = vmul.f32 0.5, %v5746_v25 }
 0x122   : > { %8701 = vst [vmem:[#allocation48_spill] sm:$0xff] %v5803_v54  ;;  %v5806_v4 = vpop.f32.mrf.mxu1  ;;  %4571 = vtanh.f32 %v1542_v44  ;;  %v4548_v37 = vpop.eup %4547 }
 0x123   : > { %8702 = vst [vmem:[#allocation49_spill] sm:$0xff] %v5806_v4  ;;  %v5809_v56 = vpop.f32.mrf.mxu0  ;;  %4218 = vmatmul.mubr.msk.bf16.gmra.mxu0 %vm376_vm1, %v5380_v26  ;;  %4213 = vmatmul.mubr.msk.bf16.gmra.mxu1 %vm376_vm1, %v5361_v22  ;;  %v2383_v26 = vmul.f32 0.5, %v2063_v63  ;;  %8711 = vst [vmem:[#allocation9_spill] sm:$0xff] %v5834_v45  ;;  %v1562_v22 = vmul.f32 0.5, %v5736_v21  ;;  %v8713_v63 = vld [vmem:[#allocation10_spill] sm:$0xff]  ;;  %4573 = vtanh.f32 %v1552_v47  ;;  %v4550_v51 = vpop.eup %4549  ;;  %v8717_v45 = vld [vmem:[#allocation11_spill] sm:$0xff] }
 0x124   : > { %8703 = vst [vmem:[#allocation50_spill] sm:$0xff] %v5809_v56  ;;  %v5822_v42 = vpop.f32.mrf.mxu1  ;;  %1300 = vmatprep.mubr.bf16.mxu0 %v8685_v10  ;;  %v5840_v14 = vmul.f32 %v2421_v19, %v8713_v63  ;;  %v4552_v41 = vpop.eup %4551  ;;  %v2384_v19 = vmul.f32 0.5, %v2064_v46  ;;  %v8719_v63 = vld [vmem:[#allocation31_spill] sm:$0xff] }
 0x125   : > { %8707 = vst [vmem:[#allocation54_spill] sm:$0xff] %v5822_v42  ;;  %v5828_v38 = vpop.f32.mrf.mxu0  ;;  %4575 = vtanh.f32 %v1562_v22  ;;  %v5849_v8 = vmul.f32 %v2383_v26, %v8717_v45  ;;  %v1541_v5 = vmul.f32 0.5, %v8719_v63  ;;  %v4554_v47 = vpop.eup %4553  ;;  %v2074_v26 = vadd.f32 1.0, %v4544_v40  ;;  %v8725_v46 = vld [vmem:[#allocation27_spill] sm:$0xff]  ;;  %v8728_v42 = vld [vmem:[#allocation25_spill] sm:$0xff] }
 0x126   : > { %8708 = vst [vmem:[#allocation55_spill] sm:$0xff] %v5828_v38  ;;  %v5837_v53 = vpop.f32.mrf.mxu1  ;;  %8714 = vst [vmem:[#allocation10_spill] sm:$0xff] %v5840_v14  ;;  %4577 = vtanh.f32 %v1561_v48  ;;  %v2112_v14 = vadd.f32 1.0, %v4542_v24  ;;  %v1531_v45 = vmul.f32 0.5, %v8725_v46  ;;  %v1522_v56 = vmul.f32 0.5, %v8728_v42  ;;  %v8730_v40 = vld [vmem:[#allocation13_spill] sm:$0xff] }
 0x127   : > { %8712 = vst [vmem:[#allocation57_spill] sm:$0xff] %v5837_v53  ;;  %v5843_v33 = vpop.f32.mrf.mxu0  ;;  %8718 = vst [vmem:[#allocation11_spill] sm:$0xff] %v5849_v8  ;;  %4579 = vtanh.f32 %v1571_v9  ;;  %v8723_v53 = vld [vmem:[#allocation12_spill] sm:$0xff]  ;;  %v8727_v8 = vld [vmem:[#allocation6_spill] sm:$0xff]  ;;  %v2393_v9 = vmul.f32 0.5, %v2073_v18  ;;  %v2394_v36 = vmul.f32 0.5, %v2074_v26 }
 0x128   : > { %8715 = vst [vmem:[#allocation58_spill] sm:$0xff] %v5843_v33  ;;  %v5846_v44 = vpop.f32.mrf.mxu1  ;;  %v8721_v33 = vld [vmem:[#allocation29_spill] sm:$0xff]  ;;  %v5859_v38 = vmul.f32 %v2422_v35, %v8723_v53  ;;  %4581 = vtanh.f32 %v1551_v52  ;;  %v5871_v35 = vmul.f32 %v2384_v19, %v8730_v40  ;;  %v2121_v52 = vadd.f32 1.0, %v4546_v49  ;;  %v8741_v26 = vld [vmem:[#allocation22_spill] sm:$0xff] }
 0x129   : > { %8716 = vst [vmem:[#allocation59_spill] sm:$0xff] %v5846_v44  ;;  %v5852_v50 = vpop.f32.mrf.mxu0  ;;  %v1532_v43 = vmul.f32 0.5, %v8721_v33  ;;  %v4556_v44 = vpop.eup %4555  ;;  %4583 = vtanh.f32 %v1572_v28  ;;  %v2432_v18 = vmul.f32 0.5, %v2112_v14  ;;  %v1512_v28 = vmul.f32 0.5, %v8734_v11  ;;  %v8739_v14 = vld [vmem:[#allocation20_spill] sm:$0xff] }
 0x12a   : > { %8720 = vst [vmem:[#allocation31_spill] sm:$0xff] %v5852_v50  ;;  %v5856_v22 = vpop.f32.mrf.mxu1  ;;  %8724 = vst [vmem:[#allocation12_spill] sm:$0xff] %v5859_v38  ;;  %v4558_v24 = vpop.eup %4557  ;;  %v2431_v50 = vmul.f32 0.5, %v2111_v13  ;;  %v8732_v38 = vld [vmem:[#allocation23_spill] sm:$0xff]  ;;  %4585 = vtanh.f32 %v1541_v5  ;;  %v2083_v13 = vadd.f32 1.0, %v4548_v37  ;;  %v2122_v19 = vadd.f32 1.0, %v4550_v51 }
 0x12b   : > { %8722 = vst [vmem:[#allocation29_spill] sm:$0xff] %v5856_v22  ;;  %v5862_v48 = vpop.f32.mrf.mxu0  ;;  %4219 = vmatmul.mubr.msk.bf16.gmra.mxu0 %vm376_vm1, %v8727_v8  ;;  %v4560_v53 = vpop.eup %4559  ;;  %8731 = vst [vmem:[#allocation25_spill] sm:$0xff] %v5871_v35  ;;  %4587 = vtanh.f32 %v1532_v43  ;;  %v2084_v40 = vadd.f32 1.0, %v4552_v41  ;;  %v5891_v37 = vmul.f32 %v2393_v9, %v5599_v58  ;;  %v1473_v43 = vmul.f32 0.5, %v8739_v14 }
 0x12c   : > { %8726 = vst [vmem:[#allocation27_spill] sm:$0xff] %v5862_v48  ;;  %v5867_v22 = vpop.f32.mrf.mxu1  ;;  %1310 = vmatprep.mubr.bf16.mxu0 %v8685_v10  ;;  %v1521_v48 = vmul.f32 0.5, %v8732_v38  ;;  %v5876_v8 = vpop.eup %4561  ;;  %4589 = vtanh.f32 %v1531_v45  ;;  %v5888_v35 = vmul.f32 %v2431_v50, %v5597_v57  ;;  %v2441_v51 = vmul.f32 0.5, %v2121_v52  ;;  %v8744_v50 = vld [vmem:[#allocation24_spill] sm:$0xff] }
 0x12d   : > { %8729 = vst [vmem:[#allocation6_spill] sm:$0xff] %v5867_v22  ;;  %v5874_v4 = vpop.f32.mrf.mxu0  ;;  %v5881_v54 = vpop.eup %4563  ;;  %8738 = vst [vmem:[#allocation61_spill] sm:$0xff] %v5891_v37  ;;  %4591 = vtanh.f32 %v1522_v56  ;;  %v2131_v41 = vadd.f32 1.0, %v4554_v47  ;;  %v1474_v45 = vmul.f32 0.5, %v8741_v26  ;;  %v5904_v57 = vmul.f32 %v2432_v18, %v5601_v59  ;;  %v8749_v26 = vld [vmem:[#allocation7_spill] sm:$0xff] }
 0x12e   : > { %8733 = vst [vmem:[#allocation13_spill] sm:$0xff] %v5874_v4  ;;  %v5879_v22 = vpop.f32.mrf.mxu1  ;;  %v5885_v5 = vpop.eup %4565  ;;  %8737 = vst [vmem:[#allocation60_spill] sm:$0xff] %v5888_v35  ;;  %4593 = vtanh.f32 %v1521_v48  ;;  %v2403_v58 = vmul.f32 0.5, %v2083_v13  ;;  %v1483_v56 = vmul.f32 0.5, %v8744_v50  ;;  %v5910_v52 = vmul.f32 %v2394_v36, %v5603_v60  ;;  %v8747_v48 = vld [vmem:[#allocation26_spill] sm:$0xff] }
 0x12f   : > { %8735 = vst [vmem:[#allocation23_spill] sm:$0xff] %v5879_v22  ;;  %v5883_v49 = vpop.f32.mrf.mxu0  ;;  %v5896_v4 = vpop.eup %4567  ;;  %8743 = vst [vmem:[#allocation63_spill] sm:$0xff] %v5904_v57  ;;  %4595 = vtanh.f32 %v1512_v28  ;;  %v2442_v47 = vmul.f32 0.5, %v2122_v19  ;;  %v1484_v35 = vmul.f32 0.5, %v8747_v48  ;;  %v2093_v18 = vadd.f32 1.0, %v4556_v44  ;;  %v8750_v28 = vld [vmem:[#allocation28_spill] sm:$0xff] }
 0x130   : > { %8736 = vst [vmem:[#allocation21_spill] sm:$0xff] %v5883_v49  ;;  %v5894_v22 = vpop.f32.mrf.mxu1  ;;  %v5901_v23 = vpop.eup %4569  ;;  %8746 = vst [vmem:[#allocation64_spill] sm:$0xff] %v5910_v52  ;;  %v2132_v13 = vadd.f32 1.0, %v4558_v24  ;;  %4597 = vtanh.f32 %v1473_v43  ;;  %v1493_v57 = vmul.f32 0.5, %v8750_v28  ;;  %v5922_v36 = vmul.f32 %v2441_v51, %v5605_v61  ;;  %v8755_v43 = vld [vmem:[#allocation32_spill] sm:$0xff] }
 0x131   : > { %8740 = vst [vmem:[#allocation20_spill] sm:$0xff] %v5894_v22  ;;  %v5899_v49 = vpop.f32.mrf.mxu0  ;;  %v4572_v37 = vpop.eup %4571  ;;  %v2404_v22 = vmul.f32 0.5, %v2084_v40  ;;  %v2451_v19 = vmul.f32 0.5, %v2131_v41  ;;  %4599 = vtanh.f32 %v1474_v45  ;;  %v8752_v40 = vld [vmem:[#allocation30_spill] sm:$0xff]  ;;  %v5928_v44 = vmul.f32 %v2403_v58, %v5609_v62  ;;  %v8758_v41 = vld [vmem:[#allocation33_spill] sm:$0xff] }
 0x132   : > { %8742 = vst [vmem:[#allocation62_spill] sm:$0xff] %v5899_v49  ;;  %v5907_v9 = vpop.f32.mrf.mxu1  ;;  %v4574_v59 = vpop.eup %4573  ;;  %v1494_v52 = vmul.f32 0.5, %v8752_v40  ;;  %v2094_v24 = vadd.f32 1.0, %v4560_v53  ;;  %4601 = vtanh.f32 %v1483_v56  ;;  %v5934_v61 = vmul.f32 %v2442_v47, %v5615_v0 }
 0x133   : > { %8745 = vst [vmem:[#allocation24_spill] sm:$0xff] %v5907_v9  ;;  %v5913_v49 = vpop.f32.mrf.mxu0  ;;  %4220 = vmatmul.mubr.msk.bf16.gmra.mxu0 %vm376_vm1, %v8749_v26  ;;  %v4576_v60 = vpop.eup %4575  ;;  %8754 = vst [vmem:[#allocation67_spill] sm:$0xff] %v5928_v44  ;;  %v5937_v51 = vmul.f32 %v2404_v22, %v5618_v1  ;;  %4603 = vtanh.f32 %v1484_v35  ;;  %v5940_v45 = vmul.f32 0.5, %v8758_v41  ;;  %v5944_v53 = vmul.f32 0.5, %v2093_v18 }
 0x134   : > { %8748 = vst [vmem:[#allocation65_spill] sm:$0xff] %v5913_v49  ;;  %v5918_v9 = vpop.f32.mrf.mxu1  ;;  %1320 = vmatprep.mubr.bf16.mxu0 %v8685_v10  ;;  %v4578_v26 = vpop.eup %4577  ;;  %v2452_v58 = vmul.f32 0.5, %v2132_v13  ;;  %v2202_v56 = vadd.f32 1.0, %v4576_v60  ;;  %v5949_v0 = vmul.f32 %v2451_v19, %v5621_v3  ;;  %v2141_v1 = vadd.f32 1.0, %v5876_v8  ;;  %v8764_v19 = vld [vmem:[#allocation8_spill] sm:$0xff] }
 0x135   : > { %8751 = vst [vmem:[#allocation7_spill] sm:$0xff] %v5918_v9  ;;  %v5925_v49 = vpop.f32.mrf.mxu0  ;;  %v1503_v9 = vmul.f32 0.5, %v8755_v43  ;;  %v4580_v48 = vpop.eup %4579  ;;  %8757 = vst [vmem:[#allocation69_spill] sm:$0xff] %v5937_v51  ;;  %4605 = vtanh.f32 %v1493_v57  ;;  %v2201_v22 = vadd.f32 1.0, %v4578_v26  ;;  %v5954_v51 = vmul.f32 0.5, %v2094_v24 }
 0x136   : > { %8753 = vst [vmem:[#allocation66_spill] sm:$0xff] %v5925_v49  ;;  %v5931_v28 = vpop.f32.mrf.mxu1  ;;  %v4582_v62 = vpop.eup %4581  ;;  %v2211_v44 = vadd.f32 1.0, %v4580_v48  ;;  %v2142_v18 = vadd.f32 1.0, %v5885_v5  ;;  %v2192_v13 = vadd.f32 1.0, %v4574_v59  ;;  %4607 = vtanh.f32 %v1494_v52 }
 0x137   : > { %8756 = vst [vmem:[#allocation68_spill] sm:$0xff] %v5931_v28  ;;  %v5942_v49 = vpop.f32.mrf.mxu0  ;;  %v4584_v43 = vpop.eup %4583  ;;  %v2191_v3 = vadd.f32 1.0, %v4582_v62  ;;  %v5967_v24 = vmul.f32 %v2452_v58, %v5626_v7  ;;  %v2182_v5 = vadd.f32 1.0, %v4572_v37  ;;  %v2522_v59 = vmul.f32 0.5, %v2202_v56 }
 0x138   : > { %8759 = vst [vmem:[#allocation70_spill] sm:$0xff] %v5942_v49  ;;  %v5946_v28 = vpop.f32.mrf.mxu1  ;;  %v4586_v47 = vpop.eup %4585  ;;  %v2212_v60 = vadd.f32 1.0, %v4584_v43  ;;  %v5960_v49 = vadd.f32 1.0, %v5881_v54  ;;  %v2531_v8 = vmul.f32 0.5, %v2211_v44  ;;  %v5972_v52 = vmul.f32 0.5, %v2141_v1 }
 0x139   : > { %8760 = vst [vmem:[#allocation71_spill] sm:$0xff] %v5946_v28  ;;  %v5952_v35 = vpop.f32.mrf.mxu0  ;;  %v4588_v28 = vpop.eup %4587  ;;  %v2181_v44 = vadd.f32 1.0, %v4586_v47  ;;  %4609 = vtanh.f32 %v1503_v9  ;;  %v2521_v62 = vmul.f32 0.5, %v2201_v22  ;;  %v2512_v58 = vmul.f32 0.5, %v2192_v13 }
 0x13a   : > { %8761 = vst [vmem:[#allocation72_spill] sm:$0xff] %v5952_v35  ;;  %v5957_v48 = vpop.f32.mrf.mxu1  ;;  %v4590_v26 = vpop.eup %4589  ;;  %v2532_v43 = vmul.f32 0.5, %v2212_v60  ;;  %v2172_v7 = vadd.f32 1.0, %v4588_v28  ;;  %v2511_v1 = vmul.f32 0.5, %v2191_v3  ;;  %v2851_v47 = vmul.f32 %v2531_v8, %v5746_v25 }
 0x13b   : > { %8762 = vst [vmem:[#allocation73_spill] sm:$0xff] %v5957_v48  ;;  %v5962_v57 = vpop.f32.mrf.mxu0  ;;  %4221 = vmatmul.mubr.msk.bf16.gmra.mxu0 %vm376_vm1, %v8764_v19  ;;  %v4592_v54 = vpop.eup %4591  ;;  %v2171_v41 = vadd.f32 1.0, %v4590_v26  ;;  %v2502_v40 = vmul.f32 0.5, %v2182_v5  ;;  %v2842_v28 = vmul.f32 %v2522_v59, %v5736_v21  ;;  %v2841_v3 = vmul.f32 %v2521_v62, %v5722_v20  ;;  %v8769_v62 = vld [vmem:[#allocation38_spill] sm:$0xff] }
 0x13c   : > { %8763 = vst [vmem:[#allocation74_spill] sm:$0xff] %v5962_v57  ;;  %v5969_v48 = vpop.f32.mrf.mxu1  ;;  %1330 = vmatprep.mubr.bf16.mxu0 %v8685_v10  ;;  %v4594_v19 = vpop.eup %4593  ;;  %v5976_v57 = vmul.f32 0.5, %v2142_v18  ;;  %v2852_v37 = vmul.f32 %v2532_v43, %v5758_v39  ;;  %v2162_v22 = vadd.f32 1.0, %v4592_v54  ;;  %v2492_v5 = vmul.f32 0.5, %v2172_v7  ;;  %v5137_v7 = vld [vmem:[%s5332_s21 + $0x38] sm:$0xff]  }
 0x13d   : > { %8765 = vst [vmem:[#allocation8_spill] sm:$0xff] %v5969_v48  ;;  %v5974_v35 = vpop.f32.mrf.mxu0  ;;  %v4596_v60 = vpop.eup %4595  ;;  %v2151_v48 = vadd.f32 1.0, %v5901_v23  ;;  %v2161_v43 = vadd.f32 1.0, %v4594_v19  ;;  %v1514_v23 = vmul.f32 0.5, %v5716_v12  ;;  %v2832_v21 = vmul.f32 %v2512_v58, %v5713_v55 }
 0x13e   : > { %8766 = vst [vmem:[#allocation75_spill] sm:$0xff] %v5974_v35  ;;  %v5979_v56 = vpop.f32.mrf.mxu1  ;;  %v8768_v35 = vld [vmem:[#allocation34_spill] sm:$0xff]  ;;  %3023 = vmatprep.subr.mxu1 %v2852_v37  ;;  %v5989_v39 = vpop.eup %4597  ;;  %v2152_v26 = vadd.f32 1.0, %v4596_v60  ;;  %v1523_v59 = vmul.f32 0.5, %v5727_v34  ;;  %v2491_v19 = vmul.f32 0.5, %v2171_v41  ;;  %4611 = vtanh.f32 %v5940_v45 }
 0x13f   : > { %8767 = vst [vmem:[#allocation76_spill] sm:$0xff] %v5979_v56  ;;  %v5983_v9 = vpop.f32.mrf.mxu0  ;;  %v1513_v18 = vmul.f32 0.5, %v8768_v35  ;;  %v2501_v56 = vmul.f32 0.5, %v2181_v44  ;;  %3024 = vmatpush1.msra.mxu1 %v2851_v47  ;;  %v5995_v8 = vpop.eup %4599  ;;  %v2831_v20 = vmul.f32 %v2511_v1, %v5704_v6  ;;  %v1524_v37 = vmul.f32 0.5, %v8769_v62 }
 0x140   : > { %v5987_v13 = vpop.f32.mrf.mxu1  ;;  %3025 = vmatprep.subr.mxu1 %v2842_v28  ;;  %v6001_v44 = vpop.eup %4601  ;;  %v2482_v58 = vmul.f32 0.5, %v2162_v22  ;;  %v2822_v60 = vmul.f32 %v2502_v40, %v5698_v27  ;;  %v1533_v41 = vmul.f32 0.5, %v5755_v2  ;;  %v2481_v6 = vmul.f32 0.5, %v2161_v43 }
 0x141   : > { %v5993_v25 = vpop.f32.mrf.mxu0  ;;  %3026 = vmatpush1.msra.mxu1 %v2841_v3  ;;  %v6010_v55 = vpop.eup %4603  ;;  %4613 = vtanh.f32 %v1513_v18  ;;  %v2821_v1 = vmul.f32 %v2501_v56, %v8719_v63  ;;  %v1534_v28 = vmul.f32 0.5, %v5767_v15  ;;  %v2472_v27 = vmul.f32 0.5, %v2152_v26 }
 0x142   : > { %v5999_v54 = vpop.f32.mrf.mxu1  ;;  %3027 = vmatprep.subr.mxu1 %v2832_v21  ;;  %4615 = vtanh.f32 %v1514_v23  ;;  %v6021_v22 = vpop.eup %4605  ;;  %v2812_v40 = vmul.f32 %v2492_v5, %v8721_v33  ;;  %v1581_v18 = vmul.f32 0.5, %v5773_v31  ;;  %v2471_v43 = vmul.f32 0.5, %v2151_v48 }
 0x143   : > { %v6006_v47 = vpop.f32.mrf.mxu0  ;;  %4222 = vmatmul.mubr.msk.bf16.gmra.mxu0 %vm376_vm1, %v5137_v7  ;;  %3028 = vmatpush1.msra.mxu1 %v2831_v20  ;;  %4617 = vtanh.f32 %v1523_v59  ;;  %v2811_v63 = vmul.f32 %v2491_v19, %v8725_v46  ;;  %v1543_v56 = vmul.f32 0.5, %v5778_v30  ;;  %v6031_v20 = vpop.eup %4607  ;;  %v2423_v26 = vmul.f32 0.5, %v5960_v49 }
 0x144   : > { %v6014_v45 = vpop.f32.mrf.mxu1  ;;  %1340 = vmatprep.mubr.bf16.mxu0 %v8685_v10  ;;  %3029 = vmatprep.subr.mxu1 %v2822_v60  ;;  %4619 = vtanh.f32 %v1524_v37  ;;  %v2802_v33 = vmul.f32 %v2482_v58, %v8728_v42  ;;  %v1582_v5 = vmul.f32 0.5, %v5787_v32  ;;  %v2104_v46 = vadd.f32 1.0, %v5896_v4  ;;  %v8771_v60 = vld [vmem:[#allocation19_spill] sm:$0xff] }
 0x145   : > { %v6019_v3 = vpop.f32.mrf.mxu0  ;;  %3030 = vmatpush1.msra.mxu1 %v2821_v1  ;;  %4621 = vtanh.f32 %v1533_v41  ;;  %v2801_v48 = vmul.f32 %v2481_v6, %v8732_v38  ;;  %v1544_v19 = vmul.f32 0.5, %v5791_v17  ;;  %v2113_v42 = vadd.f32 1.0, %v5989_v39  ;;  %v8772_v6 = vld [vmem:[#allocation46_spill] sm:$0xff]  ;;  %v5138_v39 = vld [vmem:[%s5332_s21 + $0x40] sm:$0xff]  }
 0x146   : > { %v6025_v21 = vpop.f32.mrf.mxu1  ;;  %3031 = vmatprep.subr.mxu1 %v2812_v40  ;;  %4623 = vtanh.f32 %v1534_v28  ;;  %v6043_v49 = vpop.eup %4609  ;;  %v2792_v7 = vmul.f32 %v2472_v27, %v8734_v11  ;;  %v1591_v58 = vmul.f32 0.5, %v5794_v29  ;;  %v2782_v38 = vmul.f32 %v5976_v57, %v5643_v16  ;;  %v8774_v40 = vld [vmem:[#allocation48_spill] sm:$0xff] }
 0x147   : > { %v6029_v23 = vpop.f32.mrf.mxu0  ;;  %3032 = vmatpush1.msra.mxu1 %v2811_v63  ;;  %4625 = vtanh.f32 %v1581_v18  ;;  %v2791_v41 = vmul.f32 %v2471_v43, %v8771_v60  ;;  %v1553_v1 = vmul.f32 0.5, %v8772_v6  ;;  %v2114_v11 = vadd.f32 1.0, %v5995_v8  ;;  %v8776_v57 = vld [vmem:[#allocation16_spill] sm:$0xff] }
 0x148   : > { %v6036_v59 = vpop.f32.mrf.mxu1  ;;  %3033 = vmatprep.subr.mxu1 %v2802_v33  ;;  %4627 = vtanh.f32 %v1543_v56  ;;  %v2123_v27 = vadd.f32 1.0, %v6001_v44  ;;  %v1592_v18 = vmul.f32 0.5, %v8774_v40  ;;  %v2781_v43 = vmul.f32 %v5972_v52, %v8776_v57  ;;  %v8777_v56 = vld [vmem:[#allocation49_spill] sm:$0xff]  ;;  %v8783_v52 = vld [vmem:[#allocation15_spill] sm:$0xff] }
 0x149   : > { %v6041_v37 = vpop.f32.mrf.mxu0  ;;  %3034 = vmatpush1.msra.mxu1 %v2801_v48  ;;  %4629 = vtanh.f32 %v1582_v5  ;;  %v2424_v63 = vmul.f32 0.5, %v2104_v46  ;;  %v1554_v33 = vmul.f32 0.5, %v8777_v56  ;;  %v2433_v8 = vmul.f32 0.5, %v2113_v42  ;;  %v8779_v5 = vld [vmem:[#allocation50_spill] sm:$0xff] }
 0x14a   : > { %v6048_v4 = vpop.f32.mrf.mxu1  ;;  %3035 = vmatprep.subr.mxu1 %v2792_v7  ;;  %4631 = vtanh.f32 %v1544_v19  ;;  %v2124_v44 = vadd.f32 1.0, %v6010_v55  ;;  %v1601_v7 = vmul.f32 0.5, %v8779_v5  ;;  %v6079_v46 = vmul.f32 %v5954_v51, %v8783_v52  ;;  %v8785_v19 = vld [vmem:[#allocation54_spill] sm:$0xff] }
 0x14b   : > { %8770 = vst [vmem:[#allocation34_spill] sm:$0xff] %v6048_v4  ;;  %v6054_v28 = vpop.f32.mrf.mxu0  ;;  %4223 = vmatmul.mubr.msk.bf16.gmra.mxu0 %vm376_vm1, %v5138_v39  ;;  %3036 = vmatpush1.msra.mxu1 %v2791_v41  ;;  %4633 = vtanh.f32 %v1591_v58  ;;  %v8781_v39 = vld [vmem:[#allocation14_spill] sm:$0xff]  ;;  %v1563_v41 = vmul.f32 0.5, %v8785_v19  ;;  %v4612_v55 = vpop.eup %4611  ;;  %v2434_v58 = vmul.f32 0.5, %v2114_v11  ;;  %v2443_v57 = vmul.f32 0.5, %v2123_v27  ;;  %v8868_v4 = vld [vmem:[#allocation39_spill] sm:$0xff] }
 0x14c   : > { %8773 = vst [vmem:[#allocation38_spill] sm:$0xff] %v6054_v28  ;;  %v6061_v16 = vpop.f32.mrf.mxu1  ;;  %1350 = vmatprep.mubr.bf16.mxu0 %v8685_v10  ;;  %3037 = vmatprep.subr.mxu1 %v2782_v38  ;;  %v6075_v28 = vmul.f32 %v5944_v53, %v8781_v39  ;;  %8784 = vst [vmem:[#allocation49_spill] sm:$0xff] %v6079_v46  ;;  %4635 = vtanh.f32 %v1553_v1  ;;  %v8787_v38 = vld [vmem:[#allocation55_spill] sm:$0xff]  ;;  %v8791_v1 = vld [vmem:[#allocation18_spill] sm:$0xff] }
 0x14d   : > { %8775 = vst [vmem:[#allocation19_spill] sm:$0xff] %v6061_v16  ;;  %v6067_v48 = vpop.f32.mrf.mxu0  ;;  %3038 = vmatpush1.msra.mxu1 %v2781_v43  ;;  %4637 = vtanh.f32 %v1592_v18  ;;  %v6092_v52 = vmul.f32 %v2424_v63, %v8791_v1  ;;  %v8793_v43 = vld [vmem:[#allocation57_spill] sm:$0xff]  ;;  %v2444_v18 = vmul.f32 0.5, %v2124_v44  ;;  %v8798_v1 = vld [vmem:[#allocation59_spill] sm:$0xff] }
 0x14e   : > { %8778 = vst [vmem:[#allocation46_spill] sm:$0xff] %v6067_v48  ;;  %v6071_v60 = vpop.f32.mrf.mxu1  ;;  %8782 = vst [vmem:[#allocation16_spill] sm:$0xff] %v6075_v28  ;;  %v1602_v48 = vmul.f32 0.5, %v8787_v38  ;;  %3039 = vmatprep.subr.mxu1 %v5967_v24  ;;  %v4614_v39 = vpop.eup %4613  ;;  %v8789_v28 = vld [vmem:[#allocation17_spill] sm:$0xff]  ;;  %4639 = vtanh.f32 %v1554_v33  ;;  %v1564_v46 = vmul.f32 0.5, %v8793_v43  ;;  %v6099_v24 = vmul.f32 %v2433_v8, %v8739_v14 }
 0x14f   : > { %8780 = vst [vmem:[#allocation48_spill] sm:$0xff] %v6071_v60  ;;  %v6082_v42 = vpop.f32.mrf.mxu0  ;;  %v6089_v51 = vmul.f32 %v2423_v26, %v8789_v28  ;;  %8792 = vst [vmem:[#allocation54_spill] sm:$0xff] %v6092_v52  ;;  %3040 = vmatpush1.msra.mxu1 %v5949_v0  ;;  %v4616_v27 = vpop.eup %4615  ;;  %4641 = vtanh.f32 %v1601_v7  ;;  %v2133_v33 = vadd.f32 1.0, %v6021_v22  ;;  %v2134_v0 = vadd.f32 1.0, %v6031_v20  ;;  %v5139_v8 = vld [vmem:[%s5332_s21 + $0x48] sm:$0xff]   ;;  %v8803_v22 = vld [vmem:[#allocation31_spill] sm:$0xff] }
 0x150   : > { %8786 = vst [vmem:[#allocation50_spill] sm:$0xff] %v6082_v42  ;;  %v6086_v53 = vpop.f32.mrf.mxu1  ;;  %8795 = vst [vmem:[#allocation17_spill] sm:$0xff] %v6099_v24  ;;  %v8796_v42 = vld [vmem:[#allocation58_spill] sm:$0xff]  ;;  %3041 = vmatprep.subr.mxu1 %v5934_v61  ;;  %v4618_v63 = vpop.eup %4617  ;;  %4643 = vtanh.f32 %v1563_v41  ;;  %v6117_v52 = vmul.f32 %v2443_v57, %v8744_v50  ;;  %v1612_v20 = vmul.f32 0.5, %v8803_v22  ;;  %v8804_v41 = vld [vmem:[#allocation63_spill] sm:$0xff] }
 0x151   : > { %8788 = vst [vmem:[#allocation14_spill] sm:$0xff] %v6086_v53  ;;  %8790 = vst [vmem:[#allocation15_spill] sm:$0xff] %v6089_v51  ;;  %v6096_v11 = vpop.f32.mrf.mxu0  ;;  %v1611_v26 = vmul.f32 0.5, %v8796_v42  ;;  %v1573_v51 = vmul.f32 0.5, %v8798_v1  ;;  %3042 = vmatpush1.msra.mxu1 %v5922_v36  ;;  %v4620_v44 = vpop.eup %4619  ;;  %v8800_v7 = vld [vmem:[#allocation22_spill] sm:$0xff]  ;;  %4645 = vtanh.f32 %v1602_v48  ;;  %v8821_v60 = vld [vmem:[#allocation52_spill] sm:$0xff] }
 0x152   : > { %8794 = vst [vmem:[#allocation55_spill] sm:$0xff] %v6096_v11  ;;  %v6103_v28 = vpop.f32.mrf.mxu1  ;;  %v6114_v61 = vmul.f32 %v2434_v58, %v8800_v7  ;;  %8802 = vst [vmem:[#allocation78_spill] sm:$0xff] %v6117_v52  ;;  %3043 = vmatprep.subr.mxu1 %v8804_v41  ;;  %v6124_v36 = vpop.eup %4621  ;;  %4647 = vtanh.f32 %v1564_v46  ;;  %v8806_v58 = vld [vmem:[#allocation29_spill] sm:$0xff]  ;;  %v8809_v57 = vld [vmem:[#allocation26_spill] sm:$0xff]  ;;  %v2153_v52 = vadd.f32 1.0, %v4614_v39  ;;  %v2154_v39 = vadd.f32 1.0, %v4616_v27 }
 0x153   : > { %8797 = vst [vmem:[#allocation18_spill] sm:$0xff] %v6103_v28  ;;  %v6109_v14 = vpop.f32.mrf.mxu0  ;;  %4224 = vmatmul.mubr.msk.bf16.gmra.mxu0 %vm376_vm1, %v5139_v8  ;;  %v2143_v8 = vadd.f32 1.0, %v6043_v49  ;;  %v1574_v7 = vmul.f32 0.5, %v8806_v58  ;;  %v6131_v48 = vpop.eup %4623  ;;  %v6134_v41 = vmul.f32 %v2444_v18, %v8809_v57  ;;  %4649 = vtanh.f32 %v1611_v26  ;;  %v8812_v28 = vld [vmem:[#allocation12_spill] sm:$0xff]  ;;  %v8815_v1 = vld [vmem:[#allocation10_spill] sm:$0xff]  ;;  %v8817_v57 = vld [vmem:[#allocation21_spill] sm:$0xff] }
 0x154   : > { %8799 = vst [vmem:[#allocation77_spill] sm:$0xff] %v6109_v14  ;;  %8801 = vst [vmem:[#allocation22_spill] sm:$0xff] %v6114_v61  ;;  %v6121_v24 = vpop.f32.mrf.mxu1  ;;  %1360 = vmatprep.mubr.bf16.mxu0 %v8685_v10  ;;  %v2144_v14 = vadd.f32 1.0, %v4612_v55  ;;  %v8807_v61 = vld [vmem:[#allocation60_spill] sm:$0xff]  ;;  %v6140_v46 = vpop.eup %4625  ;;  %v2453_v55 = vmul.f32 0.5, %v2133_v33  ;;  %v2454_v58 = vmul.f32 0.5, %v2134_v0  ;;  %4651 = vtanh.f32 %v1573_v51 }
 0x155   : > { %8805 = vst [vmem:[#allocation63_spill] sm:$0xff] %v6121_v24  ;;  %3044 = vmatpush1.msra.mxu1 %v8807_v61  ;;  %v6129_v50 = vpop.f32.mrf.mxu0  ;;  %8810 = vst [vmem:[#allocation26_spill] sm:$0xff] %v6134_v41  ;;  %v8811_v24 = vld [vmem:[#allocation27_spill] sm:$0xff]  ;;  %v8814_v61 = vld [vmem:[#allocation6_spill] sm:$0xff]  ;;  %v6146_v18 = vpop.eup %4627  ;;  %v2163_v26 = vadd.f32 1.0, %v4618_v63  ;;  %4653 = vtanh.f32 %v1612_v20  ;;  %v2463_v51 = vmul.f32 0.5, %v2143_v8 }
 0x156   : > { %8808 = vst [vmem:[#allocation60_spill] sm:$0xff] %v6129_v50  ;;  %v1621_v11 = vmul.f32 0.5, %v8811_v24  ;;  %3045 = vmatprep.subr.mxu1 %v8812_v28  ;;  %v6138_v49 = vpop.f32.mrf.mxu1  ;;  %v1583_v50 = vmul.f32 0.5, %v8814_v61  ;;  %v1631_v28 = vmul.f32 0.5, %v8817_v57  ;;  %v8818_v41 = vld [vmem:[#allocation56_spill] sm:$0xff]  ;;  %v6152_v33 = vpop.eup %4629  ;;  %v2464_v0 = vmul.f32 0.5, %v2144_v14 }
 0x157   : > { %8813 = vst [vmem:[#allocation12_spill] sm:$0xff] %v6138_v49  ;;  %3046 = vmatpush1.msra.mxu1 %v8815_v1  ;;  %v6144_v53 = vpop.f32.mrf.mxu0  ;;  %4655 = vtanh.f32 %v1574_v7  ;;  %v8820_v61 = vld [vmem:[#allocation62_spill] sm:$0xff]  ;;  %v6158_v27 = vpop.eup %4631  ;;  %v2473_v63 = vmul.f32 0.5, %v2153_v52  ;;  %v2164_v20 = vadd.f32 1.0, %v4620_v44  ;;  %v8826_v8 = vld [vmem:[#allocation28_spill] sm:$0xff]  ;;  %v2483_v57 = vmul.f32 0.5, %v2163_v26 }
 0x158   : > { %8816 = vst [vmem:[#allocation10_spill] sm:$0xff] %v6144_v53  ;;  %3047 = vmatprep.subr.mxu1 %v8818_v41  ;;  %v6150_v49 = vpop.f32.mrf.mxu1  ;;  %v1632_v1 = vmul.f32 0.5, %v8820_v61  ;;  %4657 = vtanh.f32 %v1621_v11  ;;  %v8823_v41 = vld [vmem:[#allocation75_spill] sm:$0xff]  ;;  %v6164_v14 = vpop.eup %4633  ;;  %v6167_v7 = vmul.f32 %v2453_v55, %v8826_v8  ;;  %v8830_v52 = vld [vmem:[#allocation44_spill] sm:$0xff]  ;;  %v1682_v55 = vmul.f32 0.5, %v6019_v3  ;;  %v8832_v8 = vld [vmem:[#allocation42_spill] sm:$0xff] }
 0x159   : > { %8819 = vst [vmem:[#allocation56_spill] sm:$0xff] %v6150_v49  ;;  %3048 = vmatpush1.msra.mxu1 %v8821_v60  ;;  %v6156_v53 = vpop.f32.mrf.mxu0  ;;  %v1662_v22 = vmul.f32 0.5, %v8823_v41  ;;  %v8824_v49 = vld [vmem:[#allocation47_spill] sm:$0xff]  ;;  %v8828_v60 = vld [vmem:[#allocation30_spill] sm:$0xff]  ;;  %4659 = vtanh.f32 %v1583_v50  ;;  %v8838_v26 = vld [vmem:[#allocation40_spill] sm:$0xff] }
 0x15a   : > { %8822 = vst [vmem:[#allocation52_spill] sm:$0xff] %v6156_v53  ;;  %3049 = vmatprep.subr.mxu1 %v8824_v49  ;;  %v6162_v24 = vpop.f32.mrf.mxu1  ;;  %8827 = vst [vmem:[#allocation47_spill] sm:$0xff] %v6167_v7  ;;  %v6170_v42 = vmul.f32 %v2454_v58, %v8828_v60  ;;  %v1672_v53 = vmul.f32 0.5, %v5993_v25  ;;  %v5140_v44 = vld [vmem:[%s5332_s21 + $0x50] sm:$0xff]   ;;  %v6178_v49 = vpop.eup %4635  ;;  %4661 = vtanh.f32 %v1631_v28  ;;  %v8834_v60 = vld [vmem:[#allocation32_spill] sm:$0xff] }
 0x15b   : > { %8825 = vst [vmem:[#allocation75_spill] sm:$0xff] %v6162_v24  ;;  %3050 = vmatpush1.msra.mxu1 %v8830_v52  ;;  %v6174_v11 = vpop.f32.mrf.mxu0  ;;  %4225 = vmatmul.mubr.msk.bf16.gmra.mxu0 %vm376_vm1, %v5140_v44  ;;  %v2474_v24 = vmul.f32 0.5, %v2154_v39  ;;  %v6185_v50 = vpop.eup %4637  ;;  %v6188_v52 = vmul.f32 %v2463_v51, %v8834_v60  ;;  %v8836_v7 = vld [vmem:[#allocation33_spill] sm:$0xff]  ;;  %4663 = vtanh.f32 %v1632_v1  ;;  %v1681_v39 = vmul.f32 0.5, %v6006_v47 }
 0x15c   : > { %8829 = vst [vmem:[#allocation28_spill] sm:$0xff] %v6170_v42  ;;  %8831 = vst [vmem:[#allocation30_spill] sm:$0xff] %v6174_v11  ;;  %3051 = vmatprep.subr.mxu1 %v8832_v8  ;;  %v6182_v58 = vpop.f32.mrf.mxu1  ;;  %1370 = vmatprep.mubr.bf16.mxu0 %v8685_v10  ;;  %v6191_v44 = vmul.f32 %v2464_v0, %v8836_v7  ;;  %v6197_v8 = vpop.eup %4639  ;;  %v6200_v42 = vmul.f32 %v2473_v63, %v8768_v35  ;;  %v2484_v11 = vmul.f32 0.5, %v2164_v20  ;;  %v8841_v60 = vld [vmem:[#allocation37_spill] sm:$0xff] }
 0x15d   : > { %8833 = vst [vmem:[#allocation44_spill] sm:$0xff] %v6182_v58  ;;  %8835 = vst [vmem:[#allocation42_spill] sm:$0xff] %v6188_v52  ;;  %3052 = vmatpush1.msra.mxu1 %v8838_v26  ;;  %v6195_v28 = vpop.f32.mrf.mxu0  ;;  %4665 = vtanh.f32 %v1662_v22  ;;  %v1691_v51 = vmul.f32 0.5, %v6029_v23  ;;  %v4642_v1 = vpop.eup %4641  ;;  %v2173_v7 = vadd.f32 1.0, %v6124_v36  ;;  %v2174_v26 = vadd.f32 1.0, %v6131_v48  ;;  %v8847_v36 = vld [vmem:[#allocation9_spill] sm:$0xff] }
 0x15e   : > { %8837 = vst [vmem:[#allocation32_spill] sm:$0xff] %v6191_v44  ;;  %8839 = vst [vmem:[#allocation33_spill] sm:$0xff] %v6195_v28  ;;  %3053 = vmatprep.subr.mxu1 %v8841_v60  ;;  %v6204_v0 = vpop.f32.mrf.mxu1  ;;  %v1671_v52 = vmul.f32 0.5, %v5983_v9  ;;  %4667 = vtanh.f32 %v1672_v53  ;;  %v8843_v44 = vld [vmem:[#allocation35_spill] sm:$0xff]  ;;  %v4644_v63 = vpop.eup %4643  ;;  %v6213_v22 = vmul.f32 %v2474_v24, %v5716_v12  ;;  %v6216_v20 = vmul.f32 %v2483_v57, %v5727_v34  ;;  %v8849_v53 = vld [vmem:[#allocation13_spill] sm:$0xff] }
 0x15f   : > { %8840 = vst [vmem:[#allocation40_spill] sm:$0xff] %v6200_v42  ;;  %8842 = vst [vmem:[#allocation37_spill] sm:$0xff] %v6204_v0  ;;  %3054 = vmatpush1.msra.mxu1 %v8843_v44  ;;  %v6210_v35 = vpop.f32.mrf.mxu0  ;;  %4669 = vtanh.f32 %v1682_v55  ;;  %v1692_v60 = vmul.f32 0.5, %v6041_v37  ;;  %v6222_v42 = vpop.eup %4645  ;;  %v6225_v44 = vmul.f32 0.5, %v8849_v53  ;;  %v8851_v12 = vld [vmem:[#allocation74_spill] sm:$0xff]  ;;  %v8852_v34 = vld [vmem:[#allocation53_spill] sm:$0xff] }
 0x160   : > { %8844 = vst [vmem:[#allocation35_spill] sm:$0xff] %v6210_v35  ;;  %8845 = vst [vmem:[#allocation79_spill] sm:$0xff] %v6213_v22  ;;  %3055 = vmatprep.subr.mxu1 %v8847_v36  ;;  %v6220_v48 = vpop.f32.mrf.mxu1  ;;  %v8850_v35 = vld [vmem:[#allocation23_spill] sm:$0xff]  ;;  %v1661_v24 = vmul.f32 0.5, %v8851_v12  ;;  %4671 = vtanh.f32 %v1681_v39  ;;  %v6234_v55 = vpop.eup %4647  ;;  %v6237_v36 = vmul.f32 %v2484_v11, %v8769_v62  ;;  %v2221_v22 = vadd.f32 1.0, %v6140_v46  ;;  %v8858_v53 = vld [vmem:[#allocation70_spill] sm:$0xff] }
 0x161   : > { %8846 = vst [vmem:[#allocation80_spill] sm:$0xff] %v6216_v20  ;;  %8848 = vst [vmem:[#allocation9_spill] sm:$0xff] %v6220_v48  ;;  %v6228_v28 = vmul.f32 0.5, %v8850_v35  ;;  %3056 = vmatpush2.msra.mxu1 %v8852_v34  ;;  %v6232_v57 = vpop.f32.mrf.mxu0  ;;  %v8855_v20 = vld [vmem:[#allocation72_spill] sm:$0xff]  ;;  %4673 = vtanh.f32 %v1691_v51  ;;  %v8856_v0 = vld [vmem:[#allocation51_spill] sm:$0xff]  ;;  %v6244_v39 = vpop.eup %4649  ;;  %v2493_v34 = vmul.f32 0.5, %v2173_v7 }
 0x162   : > { %8853 = vst [vmem:[#allocation74_spill] sm:$0xff] %v6232_v57  ;;  %8854 = vst [vmem:[#allocation53_spill] sm:$0xff] %v6237_v36  ;;  %v1652_v48 = vmul.f32 0.5, %v8855_v20  ;;  %3057 = vmatprep.subr.mxu1 %v8856_v0  ;;  %v6242_v58 = vpop.f32.mrf.mxu1  ;;  %v2494_v35 = vmul.f32 0.5, %v2174_v26  ;;  %v1651_v57 = vmul.f32 0.5, %v8858_v53  ;;  %4675 = vtanh.f32 %v1671_v52  ;;  %v8859_v16 = vld [vmem:[#allocation45_spill] sm:$0xff]  ;;  %v6252_v46 = vpop.eup %4651 }
 0x163   : > { %8857 = vst [vmem:[#allocation72_spill] sm:$0xff] %v6242_v58  ;;  %3058 = vmatpush2.msra.mxu1 %v8859_v16  ;;  %v6248_v62 = vpop.f32.mrf.mxu0  ;;  %v5141_v11 = vld [vmem:[%s5332_s21 + $0x58] sm:$0xff]   ;;  %v2183_v51 = vadd.f32 1.0, %v6146_v18  ;;  %v2222_v0 = vadd.f32 1.0, %v6152_v33  ;;  %v8861_v36 = vld [vmem:[#allocation66_spill] sm:$0xff]  ;;  %4677 = vtanh.f32 %v1692_v60  ;;  %v6261_v16 = vpop.eup %4653  ;;  %v2184_v52 = vadd.f32 1.0, %v6158_v27 }
 0x164   : > { %8860 = vst [vmem:[#allocation51_spill] sm:$0xff] %v6248_v62  ;;  %4226 = vmatmul.mubr.msk.bf16.gmra.mxu0 %vm376_vm1, %v5141_v11  ;;  %v1642_v58 = vmul.f32 0.5, %v8861_v36  ;;  %v8862_v7 = vld [vmem:[#allocation43_spill] sm:$0xff]  ;;  %v6258_v26 = vpop.f32.mrf.mxu1  ;;  %v2231_v11 = vadd.f32 1.0, %v6164_v14  ;;  %v8864_v62 = vld [vmem:[#allocation65_spill] sm:$0xff]  ;;  %4679 = vtanh.f32 %v1661_v24  ;;  %v6269_v60 = vpop.eup %4655  ;;  %v2232_v43 = vadd.f32 1.0, %v6185_v50 }
 0x165   : > { %3059 = vmatprep.subr.mxu1 %v8862_v7  ;;  %8863 = vst [vmem:[#allocation70_spill] sm:$0xff] %v6258_v26  ;;  %1380 = vmatprep.mubr.bf16.mxu0 %v8685_v10  ;;  %v1641_v61 = vmul.f32 0.5, %v8864_v62  ;;  %v8865_v18 = vld [vmem:[#allocation41_spill] sm:$0xff]  ;;  %v6267_v33 = vpop.f32.mrf.mxu0  ;;  %8867 = vst [vmem:[#allocation66_spill] sm:$0xff] %v6269_v60  ;;  %v2541_v7 = vmul.f32 0.5, %v2221_v22  ;;  %v2193_v26 = vadd.f32 1.0, %v6178_v49  ;;  %4681 = vtanh.f32 %v1652_v48  ;;  %v6276_v14 = vpop.eup %4657 }
 0x166   : > { %3060 = vmatpush2.msra.mxu1 %v8865_v18  ;;  %8866 = vst [vmem:[#allocation45_spill] sm:$0xff] %v6267_v33  ;;  %v6274_v27 = vpop.f32.mrf.mxu1  ;;  %v6279_v24 = vmul.f32 %v2493_v34, %v5755_v2  ;;  %v2194_v18 = vadd.f32 1.0, %v6197_v8  ;;  %v2241_v33 = vadd.f32 1.0, %v4642_v1  ;;  %4683 = vtanh.f32 %v1651_v57  ;;  %v8871_v60 = vld [vmem:[#allocation36_spill] sm:$0xff]  ;;  %v6285_v49 = vpop.eup %4659 }
 0x167   : > { %3061 = vmatprep.subr.mxu1 %v8868_v4  ;;  %8869 = vst [vmem:[#allocation43_spill] sm:$0xff] %v6274_v27  ;;  %v6283_v22 = vpop.f32.mrf.mxu0  ;;  %v2503_v50 = vmul.f32 0.5, %v2183_v51  ;;  %v2542_v48 = vmul.f32 0.5, %v2222_v0  ;;  %v2203_v4 = vadd.f32 1.0, %v4644_v63  ;;  %4685 = vtanh.f32 %v1642_v58  ;;  %v6289_v62 = vpop.eup %4661  ;;  %v8876_v0 = vld [vmem:[#allocation20_spill] sm:$0xff] }
 0x168   : > { %8870 = vst [vmem:[#allocation41_spill] sm:$0xff] %v6279_v24  ;;  %3062 = vmatpush2.msra.mxu1 %v8871_v60  ;;  %8872 = vst [vmem:[#allocation39_spill] sm:$0xff] %v6283_v22  ;;  %v6287_v27 = vpop.f32.mrf.mxu1  ;;  %v6292_v2 = vmul.f32 %v2494_v35, %v5767_v15  ;;  %v2504_v8 = vmul.f32 0.5, %v2184_v52  ;;  %v2551_v1 = vmul.f32 0.5, %v2231_v11  ;;  %4687 = vtanh.f32 %v1641_v61  ;;  %v6296_v34 = vpop.eup %4663  ;;  %v5142_v11 = vld [vmem:[%s5332_s21 + $0x60] sm:$0xff]  }
 0x169   : > { %8873 = vst [vmem:[#allocation36_spill] sm:$0xff] %v6287_v27  ;;  %v6294_v57 = vpop.f32.mrf.mxu0  ;;  %v6299_v51 = vmul.f32 %v2541_v7, %v5773_v31  ;;  %v2513_v63 = vmul.f32 0.5, %v2193_v26  ;;  %v2552_v58 = vmul.f32 0.5, %v2232_v43  ;;  %v1593_v60 = vmul.f32 0.5, %v8876_v0 }
 0x16a   : > { %8874 = vst [vmem:[#allocation81_spill] sm:$0xff] %v6292_v2  ;;  %8875 = vst [vmem:[#allocation82_spill] sm:$0xff] %v6294_v57  ;;  %v6302_v24 = vpop.f32.mrf.mxu1  ;;  %v4666_v22 = vpop.eup %4665  ;;  %v2514_v15 = vmul.f32 0.5, %v2194_v18  ;;  %v2561_v35 = vmul.f32 0.5, %v2241_v33  ;;  %v2242_v52 = vadd.f32 1.0, %v6222_v42  ;;  %4689 = vtanh.f32 %v6225_v44 }
 0x16b   : > { %8877 = vst [vmem:[#allocation20_spill] sm:$0xff] %v6302_v24  ;;  %v6306_v61 = vpop.f32.mrf.mxu0  ;;  %v4668_v31 = vpop.eup %4667  ;;  %v6311_v26 = vmul.f32 %v2503_v50, %v5778_v30  ;;  %v6314_v43 = vmul.f32 %v2542_v48, %v5787_v32  ;;  %v2523_v7 = vmul.f32 0.5, %v2203_v4  ;;  %4691 = vtanh.f32 %v6228_v28  ;;  %v8882_v50 = vld [vmem:[#allocation24_spill] sm:$0xff] }
 0x16c   : > { %8878 = vst [vmem:[#allocation83_spill] sm:$0xff] %v6306_v61  ;;  %4227 = vmatmul.mubr.msk.bf16.gmra.mxu0 %vm376_vm1, %v5142_v11  ;;  %v6317_v33 = vpop.f32.mrf.mxu1  ;;  %v4670_v42 = vpop.eup %4669  ;;  %v6321_v44 = vmul.f32 %v2504_v8, %v5791_v17  ;;  %v6324_v18 = vmul.f32 %v2551_v1, %v5794_v29  ;;  %v2204_v30 = vadd.f32 1.0, %v6234_v55  ;;  %v1594_v11 = vmul.f32 0.5, %v8882_v50  ;;  %v8901_v24 = vld [vmem:[#allocation76_spill] sm:$0xff] }
 0x16d   : > { %8879 = vst [vmem:[#allocation84_spill] sm:$0xff] %v6311_v26  ;;  %8880 = vst [vmem:[#allocation85_spill] sm:$0xff] %v6317_v33  ;;  %1390 = vmatprep.mubr.bf16.mxu0 %v8685_v10  ;;  %v6328_v32 = vpop.f32.mrf.mxu0  ;;  %v4672_v48 = vpop.eup %4671  ;;  %v6331_v28 = vmul.f32 %v2513_v63, %v8772_v6  ;;  %v6334_v4 = vmul.f32 %v2552_v58, %v8774_v40  ;;  %4693 = vtanh.f32 %v1593_v60  ;;  %v8885_v33 = vld [vmem:[#allocation7_spill] sm:$0xff]  ;;  %v2562_v2 = vmul.f32 0.5, %v2242_v52  ;;  %v8888_v26 = vld [vmem:[#allocation68_spill] sm:$0xff] }
 0x16e   : > { %8881 = vst [vmem:[#allocation86_spill] sm:$0xff] %v6321_v44  ;;  %8883 = vst [vmem:[#allocation24_spill] sm:$0xff] %v6328_v32  ;;  %v1603_v17 = vmul.f32 0.5, %v8885_v33  ;;  %v6337_v8 = vpop.f32.mrf.mxu1  ;;  %v4674_v29 = vpop.eup %4673  ;;  %v6340_v1 = vmul.f32 %v2514_v15, %v8777_v56  ;;  %v6343_v55 = vmul.f32 %v2561_v35, %v8779_v5  ;;  %v1604_v44 = vmul.f32 0.5, %v8888_v26  ;;  %v8892_v5 = vld [vmem:[#allocation71_spill] sm:$0xff] }
 0x16f   : > { %8884 = vst [vmem:[#allocation87_spill] sm:$0xff] %v6331_v28  ;;  %8886 = vst [vmem:[#allocation7_spill] sm:$0xff] %v6337_v8  ;;  %v6346_v6 = vpop.f32.mrf.mxu0  ;;  %v4676_v63 = vpop.eup %4675  ;;  %v6349_v40 = vmul.f32 %v2523_v7, %v8785_v19  ;;  %v6352_v58 = vadd.f32 1.0, %v6244_v39  ;;  %v2322_v60 = vadd.f32 1.0, %v4670_v42  ;;  %v2331_v8 = vadd.f32 1.0, %v4674_v29 }
 0x170   : > { %8887 = vst [vmem:[#allocation88_spill] sm:$0xff] %v6340_v1  ;;  %8889 = vst [vmem:[#allocation68_spill] sm:$0xff] %v6346_v6  ;;  %v6354_v28 = vpop.f32.mrf.mxu1  ;;  %v4678_v56 = vpop.eup %4677  ;;  %v6356_v15 = vmul.f32 0.5, %v2204_v30  ;;  %4695 = vtanh.f32 %v1594_v11  ;;  %v1613_v35 = vmul.f32 0.5, %v8892_v5  ;;  %v2321_v52 = vadd.f32 1.0, %v4672_v48  ;;  %v5143_v48 = vld [vmem:[%s5332_s21 + $0x68] sm:$0xff]  }
 0x171   : > { %8890 = vst [vmem:[#allocation89_spill] sm:$0xff] %v6349_v40  ;;  %8891 = vst [vmem:[#allocation90_spill] sm:$0xff] %v6354_v28  ;;  %v6359_v6 = vpop.f32.mrf.mxu0  ;;  %v4680_v1 = vpop.eup %4679  ;;  %v6362_v19 = vadd.f32 1.0, %v6252_v46  ;;  %4697 = vtanh.f32 %v1603_v17  ;;  %v2312_v39 = vadd.f32 1.0, %v4668_v31  ;;  %v2332_v7 = vadd.f32 1.0, %v4678_v56  ;;  %v8896_v46 = vld [vmem:[#allocation73_spill] sm:$0xff] }
 0x172   : > { %8893 = vst [vmem:[#allocation71_spill] sm:$0xff] %v6359_v6  ;;  %v6364_v42 = vpop.f32.mrf.mxu1  ;;  %v4682_v29 = vpop.eup %4681  ;;  %v6367_v30 = vmul.f32 %v2562_v2, %v8787_v38  ;;  %4699 = vtanh.f32 %v1604_v44  ;;  %v2311_v11 = vadd.f32 1.0, %v4676_v63  ;;  %v2651_v28 = vmul.f32 0.5, %v2331_v8 }
 0x173   : > { %8894 = vst [vmem:[#allocation91_spill] sm:$0xff] %v6364_v42  ;;  %v6369_v32 = vpop.f32.mrf.mxu0  ;;  %v4684_v6 = vpop.eup %4683  ;;  %v1614_v40 = vmul.f32 0.5, %v8896_v46  ;;  %v2302_v17 = vadd.f32 1.0, %v4666_v22  ;;  %v2642_v31 = vmul.f32 0.5, %v2322_v60  ;;  %v2652_v56 = vmul.f32 0.5, %v2332_v7 }
 0x174   : > { %8895 = vst [vmem:[#allocation92_spill] sm:$0xff] %v6369_v32  ;;  %4228 = vmatmul.mubr.msk.bf16.gmra.mxu0 %vm376_vm1, %v5143_v48  ;;  %v6374_v61 = vpop.f32.mrf.mxu1  ;;  %v4686_v38 = vpop.eup %4685  ;;  %v6378_v2 = vadd.f32 1.0, %v6289_v62  ;;  %4701 = vtanh.f32 %v1613_v35  ;;  %v2301_v44 = vadd.f32 1.0, %v4680_v1  ;;  %v2641_v8 = vmul.f32 0.5, %v2321_v52  ;;  %v8899_v32 = vld [vmem:[#allocation8_spill] sm:$0xff] }
 0x175   : > { %8897 = vst [vmem:[#allocation93_spill] sm:$0xff] %v6374_v61  ;;  %1400 = vmatprep.mubr.bf16.mxu0 %v8685_v10  ;;  %v6380_v63 = vpop.f32.mrf.mxu0  ;;  %v4688_v48 = vpop.eup %4687  ;;  %v2292_v42 = vadd.f32 1.0, %v4682_v29  ;;  %v1623_v57 = vmul.f32 0.5, %v8899_v32  ;;  %v2632_v22 = vmul.f32 0.5, %v2312_v39  ;;  %v2972_v60 = vmul.f32 %v2652_v56, %v6041_v37 }
 0x176   : > { %8898 = vst [vmem:[#allocation94_spill] sm:$0xff] %v6380_v63  ;;  %v6384_v7 = vpop.f32.mrf.mxu1  ;;  %v2291_v61 = vadd.f32 1.0, %v4684_v6  ;;  %v1624_v27 = vmul.f32 0.5, %v8901_v24  ;;  %v2631_v46 = vmul.f32 0.5, %v2311_v11  ;;  %v2971_v62 = vmul.f32 %v2651_v28, %v6029_v23 }
 0x177   : > { %8900 = vst [vmem:[#allocation8_spill] sm:$0xff] %v6384_v7  ;;  %v6388_v35 = vpop.f32.mrf.mxu0  ;;  %v4690_v1 = vpop.eup %4689  ;;  %v2282_v52 = vadd.f32 1.0, %v4686_v38  ;;  %4703 = vtanh.f32 %v1614_v40  ;;  %v2622_v63 = vmul.f32 0.5, %v2302_v17  ;;  %v2962_v29 = vmul.f32 %v2642_v31, %v6019_v3  ;;  %3063 = vmatprep.subr.mxu1 %v2972_v60 }
 0x178   : > { %v6391_v39 = vpop.f32.mrf.mxu1  ;;  %v6393_v37 = vpop.eup %4691  ;;  %v2272_v6 = vadd.f32 1.0, %v6296_v34  ;;  %v2281_v56 = vadd.f32 1.0, %v4688_v48  ;;  %v2621_v7 = vmul.f32 0.5, %v2301_v44  ;;  %v2961_v11 = vmul.f32 %v2641_v8, %v6006_v47  ;;  %3064 = vmatpush2.msra.mxu1 %v2971_v62 }
 0x179   : > { %8902 = vst [vmem:[#allocation76_spill] sm:$0xff] %v6391_v39  ;;  %v6397_v23 = vpop.f32.mrf.mxu0  ;;  %v2612_v28 = vmul.f32 0.5, %v2292_v42  ;;  %4705 = vtanh.f32 %v1623_v57  ;;  %v1633_v40 = vmul.f32 0.5, %v5987_v13  ;;  %v2952_v3 = vmul.f32 %v2632_v22, %v5993_v25  ;;  %3065 = vmatprep.subr.mxu1 %v2962_v29  ;;  %v5144_v42 = vld [vmem:[%s5332_s21 + $0x70] sm:$0xff]  }
 0x17a   : > { %v6401_v17 = vpop.f32.mrf.mxu1  ;;  %v6403_v31 = vpop.eup %4693  ;;  %v2611_v34 = vmul.f32 0.5, %v2291_v61  ;;  %4707 = vtanh.f32 %v1624_v27  ;;  %v2951_v38 = vmul.f32 %v2631_v46, %v5983_v9  ;;  %v1634_v47 = vmul.f32 0.5, %v5999_v54  ;;  %3066 = vmatpush2.msra.mxu1 %v2961_v11 }
 0x17b   : > { %8903 = vst [vmem:[#allocation95_spill] sm:$0xff] %v6401_v17  ;;  %v6407_v44 = vpop.f32.mrf.mxu0  ;;  %v2262_v57 = vadd.f32 1.0, %v4690_v1  ;;  %v2602_v8 = vmul.f32 0.5, %v2282_v52  ;;  %v2942_v25 = vmul.f32 %v2622_v63, %v8823_v41  ;;  %v1643_v48 = vmul.f32 0.5, %v6014_v45  ;;  %3067 = vmatprep.subr.mxu1 %v2952_v3 }
 0x17c   : > { %4229 = vmatmul.mubr.msk.bf16.gmra.mxu0 %vm376_vm1, %v5144_v42  ;;  %v6413_v22 = vpop.f32.mrf.mxu1  ;;  %v2261_v9 = vadd.f32 1.0, %v6276_v14  ;;  %v2601_v27 = vmul.f32 0.5, %v2281_v56  ;;  %v2941_v61 = vmul.f32 %v2621_v7, %v8851_v12  ;;  %v1644_v46 = vmul.f32 0.5, %v6025_v21  ;;  %3068 = vmatpush2.msra.mxu1 %v2951_v38  ;;  %v8909_v38 = vld [vmem:[#allocation57_spill] sm:$0xff]  ;;  %v8910_v42 = vld [vmem:[#allocation62_spill] sm:$0xff] }
 0x17d   : > { %8904 = vst [vmem:[#allocation96_spill] sm:$0xff] %v6413_v22  ;;  %1410 = vmatprep.mubr.bf16.mxu0 %v8685_v10  ;;  %v6419_v60 = vpop.f32.mrf.mxu0  ;;  %v4696_v62 = vpop.eup %4695  ;;  %v2252_v41 = vadd.f32 1.0, %v6261_v16  ;;  %v2592_v63 = vmul.f32 0.5, %v2272_v6  ;;  %v2932_v1 = vmul.f32 %v2612_v28, %v8855_v20  ;;  %4709 = vtanh.f32 %v1633_v40  ;;  %3069 = vmatprep.subr.mxu1 %v2942_v25 }
 0x17e   : > { %v6423_v52 = vpop.f32.mrf.mxu1  ;;  %v4698_v10 = vpop.eup %4697  ;;  %v2571_v14 = vmul.f32 0.5, %v6352_v58  ;;  %v2591_v12 = vmul.f32 0.5, %v6378_v2  ;;  %v2931_v7 = vmul.f32 %v2611_v34, %v8858_v53  ;;  %4711 = vtanh.f32 %v1634_v47  ;;  %3070 = vmatpush2.msra.mxu1 %v2941_v61  ;;  %v8907_v58 = vld [vmem:[#allocation65_spill] sm:$0xff]  ;;  %v8908_v2 = vld [vmem:[#allocation34_spill] sm:$0xff] }
 0x17f   : > { %8905 = vst [vmem:[#allocation97_spill] sm:$0xff] %v6423_v52  ;;  %v6428_v29 = vpop.f32.mrf.mxu0  ;;  %v4700_v56 = vpop.eup %4699  ;;  %v2582_v16 = vmul.f32 0.5, %v2262_v57  ;;  %v2922_v6 = vmul.f32 %v2602_v8, %v8861_v36  ;;  %4713 = vtanh.f32 %v1643_v48  ;;  %v1653_v20 = vmul.f32 0.5, %v6036_v59  ;;  %3071 = vmatprep.subr.mxu1 %v2932_v1  ;;  %v8911_v8 = vld [vmem:[#allocation19_spill] sm:$0xff] }
 0x180   : > { %v6432_v11 = vpop.f32.mrf.mxu1  ;;  %v2581_v28 = vmul.f32 0.5, %v2261_v9  ;;  %v2921_v40 = vmul.f32 %v2601_v27, %v8907_v58  ;;  %4715 = vtanh.f32 %v1644_v46  ;;  %v1654_v53 = vmul.f32 0.5, %v8908_v2  ;;  %3072 = vmatpush2.msra.mxu1 %v2931_v7  ;;  %v8913_v27 = vld [vmem:[#allocation66_spill] sm:$0xff]  ;;  %v8914_v46 = vld [vmem:[#allocation21_spill] sm:$0xff] }
 0x181   : > { %8906 = vst [vmem:[#allocation98_spill] sm:$0xff] %v6432_v11  ;;  %v6436_v3 = vpop.f32.mrf.mxu0  ;;  %v4702_v34 = vpop.eup %4701  ;;  %v6440_v36 = vmul.f32 %v6356_v15, %v8909_v38  ;;  %v2572_v47 = vmul.f32 0.5, %v2252_v41  ;;  %v2912_v57 = vmul.f32 %v2592_v63, %v8910_v42  ;;  %v1663_v25 = vmul.f32 0.5, %v8911_v8  ;;  %3073 = vmatprep.subr.mxu1 %v2922_v6  ;;  %v8915_v7 = vld [vmem:[#allocation38_spill] sm:$0xff]  ;;  %v5145_v15 = vld [vmem:[%s5332_s21 + $0x78] sm:$0xff]   ;;  %v8916_v63 = vld [vmem:[#allocation13_spill] sm:$0xff] }
 0x182   : > { %v6444_v48 = vpop.f32.mrf.mxu1  ;;  %v2533_v9 = vmul.f32 0.5, %v6362_v19  ;;  %v2214_v61 = vadd.f32 1.0, %v8913_v27  ;;  %v2911_v1 = vmul.f32 %v2591_v12, %v8914_v46  ;;  %v1425_v58 = vmul.f32 0.5, %v8915_v7  ;;  %3074 = vmatpush2.msra.mxu1 %v2921_v40  ;;  %v8918_v12 = vld [vmem:[#allocation58_spill] sm:$0xff]  ;;  %v8919_v46 = vld [vmem:[#allocation27_spill] sm:$0xff] }
 0x183   : > { %8912 = vst [vmem:[#allocation65_spill] sm:$0xff] %v6444_v48  ;;  %v6450_v11 = vpop.f32.mrf.mxu0  ;;  %v2223_v41 = vadd.f32 1.0, %v6285_v49  ;;  %v2902_v6 = vmul.f32 %v2582_v16, %v8916_v63  ;;  %v2224_v38 = vadd.f32 1.0, %v6393_v37  ;;  %4717 = vtanh.f32 %v1653_v20  ;;  %3075 = vmatprep.subr.mxu1 %v2912_v57  ;;  %v8920_v49 = vld [vmem:[#allocation31_spill] sm:$0xff]  ;;  %v8921_v37 = vld [vmem:[#allocation48_spill] sm:$0xff] }
 0x184   : > { %4230 = vmatmul.mubr.msk.bf16.gmra.mxu0 %vm376_vm1, %v5145_v15  ;;  %v6457_v19 = vpop.f32.mrf.mxu1  ;;  %v4704_v42 = vpop.eup %4703  ;;  %v2891_v27 = vmul.f32 %v2571_v14, %v8918_v12  ;;  %v2901_v40 = vmul.f32 %v2581_v28, %v8919_v46  ;;  %v2233_v48 = vadd.f32 1.0, %v6403_v31  ;;  %4719 = vtanh.f32 %v1654_v53  ;;  %3076 = vmatpush2.msra.mxu1 %v2911_v1  ;;  %v8923_v28 = vld [vmem:[#allocation46_spill] sm:$0xff] }
 0x185   : > { %8917 = vst [vmem:[#allocation34_spill] sm:$0xff] %v6457_v19  ;;  %v6462_v15 = vpop.f32.mrf.mxu0  ;;  %v2892_v52 = vmul.f32 %v2572_v47, %v8920_v49  ;;  %v2234_v16 = vadd.f32 1.0, %v4696_v62  ;;  %4721 = vtanh.f32 %v1663_v25  ;;  %v1664_v20 = vmul.f32 0.5, %v8921_v37  ;;  %3077 = vmatprep.subr.mxu1 %v2902_v6  ;;  %v8924_v62 = vld [vmem:[#allocation14_spill] sm:$0xff]  ;;  %v8926_v6 = vld [vmem:[#allocation59_spill] sm:$0xff] }
 0x186   : > { %v6466_v57 = vpop.f32.mrf.mxu1  ;;  %v4706_v63 = vpop.eup %4705  ;;  %v2534_v19 = vmul.f32 0.5, %v2214_v61  ;;  %v2243_v14 = vadd.f32 1.0, %v4698_v10  ;;  %4723 = vtanh.f32 %v1425_v58  ;;  %v1426_v12 = vmul.f32 0.5, %v8923_v28  ;;  %3078 = vmatpush2.msra.mxu1 %v2901_v40  ;;  %v8927_v58 = vld [vmem:[#allocation50_spill] sm:$0xff] }
 0x187   : > { %8922 = vst [vmem:[#allocation57_spill] sm:$0xff] %v6466_v57  ;;  %v6469_v31 = vpop.f32.mrf.mxu0  ;;  %v4708_v53 = vpop.eup %4707  ;;  %v2543_v1 = vmul.f32 0.5, %v2223_v41  ;;  %v2544_v46 = vmul.f32 0.5, %v2224_v38  ;;  %v2244_v47 = vadd.f32 1.0, %v4700_v56  ;;  %v1673_v25 = vmul.f32 0.5, %v8924_v62  ;;  %3079 = vmatprep.subr.mxu1 %v2892_v52  ;;  %v8928_v38 = vld [vmem:[#allocation29_spill] sm:$0xff] }
 0x188   : > { %v6472_v49 = vpop.f32.mrf.mxu1  ;;  %v6475_v57 = vmul.f32 %v2533_v9, %v8926_v6  ;;  %v2553_v61 = vmul.f32 0.5, %v2233_v48  ;;  %v2253_v10 = vadd.f32 1.0, %v4702_v34  ;;  %v1435_v22 = vmul.f32 0.5, %v8927_v58  ;;  %3080 = vmatpush2.msra.mxu1 %v2891_v27  ;;  %v8930_v27 = vld [vmem:[#allocation6_spill] sm:$0xff] }
 0x189   : > { %8925 = vst [vmem:[#allocation62_spill] sm:$0xff] %v6472_v49  ;;  %v6478_v40 = vpop.f32.mrf.mxu0  ;;  %v2554_v17 = vmul.f32 0.5, %v2234_v16  ;;  %v2254_v39 = vadd.f32 1.0, %v4704_v42  ;;  %v2263_v41 = vadd.f32 1.0, %v4706_v63  ;;  %4725 = vtanh.f32 %v1664_v20  ;;  %3081 = vmatprep.subr.mxu1 %v6367_v30  ;;  %v8932_v42 = vld [vmem:[#allocation23_spill] sm:$0xff] }
 0x18a   : > { %v6481_v56 = vpop.f32.mrf.mxu1  ;;  %v4710_v52 = vpop.eup %4709  ;;  %v2854_v49 = vmul.f32 %v2534_v19, %v8928_v38  ;;  %v2563_v9 = vmul.f32 0.5, %v2243_v14  ;;  %v2264_v6 = vadd.f32 1.0, %v4708_v53  ;;  %4727 = vtanh.f32 %v1426_v12  ;;  %3082 = vmatpush2.msra.mxu1 %v6343_v55  ;;  %v8935_v12 = vld [vmem:[#allocation18_spill] sm:$0xff]  ;;  %v8938_v38 = vld [vmem:[#allocation55_spill] sm:$0xff] }
 0x18b   : > { %v6485_v34 = vpop.f32.mrf.mxu0  ;;  %v4712_v48 = vpop.eup %4711  ;;  %v6488_v16 = vmul.f32 %v2543_v1, %v8930_v27  ;;  %v6491_v20 = vmul.f32 %v2544_v46, %v8932_v42  ;;  %v2564_v30 = vmul.f32 0.5, %v2244_v47  ;;  %4729 = vtanh.f32 %v1673_v25  ;;  %3083 = vmatprep.subr.mxu1 %v6334_v4 }
 0x18c   : > { %8929 = vst [vmem:[#allocation19_spill] sm:$0xff] %v6485_v34  ;;  %v6494_v63 = vpop.f32.mrf.mxu1  ;;  %v4714_v19 = vpop.eup %4713  ;;  %v6497_v14 = vmul.f32 %v2553_v61, %v8876_v0  ;;  %v2573_v55 = vmul.f32 0.5, %v2253_v10  ;;  %4731 = vtanh.f32 %v1435_v22  ;;  %v1674_v53 = vmul.f32 0.5, %v8935_v12  ;;  %3084 = vmatpush2.msra.mxu1 %v6324_v18  ;;  %v8940_v18 = vld [vmem:[#allocation63_spill] sm:$0xff] }
 0x18d   : > { %8931 = vst [vmem:[#allocation66_spill] sm:$0xff] %v6488_v16  ;;  %8933 = vst [vmem:[#allocation21_spill] sm:$0xff] %v6491_v20  ;;  %v6501_v1 = vpop.f32.mrf.mxu0  ;;  %v4716_v46 = vpop.eup %4715  ;;  %v6504_v47 = vmul.f32 %v2554_v17, %v8882_v50  ;;  %v2574_v25 = vmul.f32 0.5, %v2254_v39  ;;  %v2583_v4 = vmul.f32 0.5, %v2263_v41  ;;  %v1436_v27 = vmul.f32 0.5, %v8938_v38  ;;  %3085 = vmatprep.subr.mxu1 %v6314_v43  ;;  %v8943_v41 = vld [vmem:[#allocation77_spill] sm:$0xff] }
 0x18e   : > { %8934 = vst [vmem:[#allocation38_spill] sm:$0xff] %v6497_v14  ;;  %8936 = vst [vmem:[#allocation13_spill] sm:$0xff] %v6501_v1  ;;  %v6508_v0 = vpop.f32.mrf.mxu1  ;;  %v6511_v22 = vmul.f32 %v2563_v9, %v8885_v33  ;;  %v2584_v61 = vmul.f32 0.5, %v2264_v6  ;;  %v2273_v10 = vadd.f32 1.0, %v4710_v52  ;;  %v1683_v42 = vmul.f32 0.5, %v8940_v18  ;;  %3086 = vmatpush2.msra.mxu1 %v6299_v51  ;;  %v8946_v6 = vld [vmem:[#allocation12_spill] sm:$0xff] }
 0x18f   : > { %8937 = vst [vmem:[#allocation58_spill] sm:$0xff] %v6504_v47  ;;  %v6515_v16 = vpop.f32.mrf.mxu0  ;;  %v6518_v50 = vmul.f32 %v2564_v30, %v8888_v26  ;;  %v2274_v39 = vadd.f32 1.0, %v4712_v48  ;;  %v2283_v17 = vadd.f32 1.0, %v4714_v19  ;;  %v1445_v43 = vmul.f32 0.5, %v8943_v41  ;;  %3094 = vmatprep.subr.mxu1 %v2854_v49  ;;  %v8948_v26 = vld [vmem:[#allocation73_spill] sm:$0xff]  ;;  %v8951_v49 = vld [vmem:[#allocation60_spill] sm:$0xff] }
 0x190   : > { %8939 = vst [vmem:[#allocation27_spill] sm:$0xff] %v6511_v22  ;;  %8941 = vst [vmem:[#allocation31_spill] sm:$0xff] %v6515_v16  ;;  %v6521_v20 = vpop.f32.mrf.mxu1  ;;  %v4718_v33 = vpop.eup %4717  ;;  %v6524_v9 = vmul.f32 %v2573_v55, %v8892_v5  ;;  %v2284_v52 = vadd.f32 1.0, %v4716_v46  ;;  %4733 = vtanh.f32 %v1674_v53  ;;  %v1684_v51 = vmul.f32 0.5, %v8946_v6  ;;  %v8954_v46 = vld [vmem:[#allocation56_spill] sm:$0xff] }
 0x191   : > { %8942 = vst [vmem:[#allocation48_spill] sm:$0xff] %v6518_v50  ;;  %8944 = vst [vmem:[#allocation46_spill] sm:$0xff] %v6521_v20  ;;  %v6527_v1 = vpop.f32.mrf.mxu0  ;;  %v4720_v16 = vpop.eup %4719  ;;  %v6530_v30 = vmul.f32 %v2574_v25, %v8948_v26  ;;  %v6533_v48 = vmul.f32 %v2583_v4, %v8899_v32  ;;  %4735 = vtanh.f32 %v1436_v27  ;;  %v1446_v19 = vmul.f32 0.5, %v8951_v49  ;;  %v8956_v32 = vld [vmem:[#allocation10_spill] sm:$0xff] }
 0x192   : > { %8945 = vst [vmem:[#allocation14_spill] sm:$0xff] %v6524_v9  ;;  %8947 = vst [vmem:[#allocation59_spill] sm:$0xff] %v6527_v1  ;;  %v6536_v14 = vpop.f32.mrf.mxu1  ;;  %v4722_v5 = vpop.eup %4721  ;;  %v6539_v55 = vmul.f32 %v2584_v61, %v8901_v24  ;;  %v2593_v53 = vmul.f32 0.5, %v2273_v10  ;;  %4737 = vtanh.f32 %v1683_v42  ;;  %v1693_v1 = vmul.f32 0.5, %v8954_v46  ;;  %v8958_v9 = vld [vmem:[#allocation75_spill] sm:$0xff] }
 0x193   : > { %8949 = vst [vmem:[#allocation50_spill] sm:$0xff] %v6530_v30  ;;  %8950 = vst [vmem:[#allocation29_spill] sm:$0xff] %v6533_v48  ;;  %v6542_v34 = vpop.f32.mrf.mxu0  ;;  %v4724_v25 = vpop.eup %4723  ;;  %v2594_v26 = vmul.f32 0.5, %v2274_v39  ;;  %v2603_v47 = vmul.f32 0.5, %v2283_v17  ;;  %4739 = vtanh.f32 %v1445_v43  ;;  %v1455_v4 = vmul.f32 0.5, %v8956_v32  ;;  %v8960_v30 = vld [vmem:[#allocation52_spill] sm:$0xff] }
 0x194   : > { %8952 = vst [vmem:[#allocation6_spill] sm:$0xff] %v6536_v14  ;;  %8953 = vst [vmem:[#allocation23_spill] sm:$0xff] %v6539_v55  ;;  %v6545_v27 = vpop.f32.mrf.mxu1  ;;  %v2604_v22 = vmul.f32 0.5, %v2284_v52  ;;  %v2293_v50 = vadd.f32 1.0, %v4718_v33  ;;  %4741 = vtanh.f32 %v1684_v51  ;;  %v1694_v24 = vmul.f32 0.5, %v8958_v9  ;;  %v8963_v52 = vld [vmem:[#allocation44_spill] sm:$0xff] }
 0x195   : > { %8955 = vst [vmem:[#allocation18_spill] sm:$0xff] %v6542_v34  ;;  %8957 = vst [vmem:[#allocation55_spill] sm:$0xff] %v6545_v27  ;;  %v6548_v61 = vpop.f32.mrf.mxu0  ;;  %v2294_v10 = vadd.f32 1.0, %v4720_v16  ;;  %v2303_v42 = vadd.f32 1.0, %v4722_v5  ;;  %4743 = vtanh.f32 %v1446_v19  ;;  %v1456_v34 = vmul.f32 0.5, %v8960_v30  ;;  %v8967_v19 = vld [vmem:[#allocation30_spill] sm:$0xff] }
 0x196   : > { %8959 = vst [vmem:[#allocation63_spill] sm:$0xff] %v6548_v61  ;;  %v6551_v48 = vpop.f32.mrf.mxu1  ;;  %v4726_v39 = vpop.eup %4725  ;;  %v6554_v17 = vmul.f32 %v2593_v53, %v5987_v13  ;;  %v2065_v43 = vadd.f32 1.0, %v4724_v25  ;;  %4745 = vtanh.f32 %v1693_v1  ;;  %v1703_v33 = vmul.f32 0.5, %v8963_v52  ;;  %v8970_v25 = vld [vmem:[#allocation37_spill] sm:$0xff]  ;;  %v9042_v14 = vld [vmem:[#allocation94_spill] sm:$0xff] }
 0x197   : > { %8961 = vst [vmem:[#allocation77_spill] sm:$0xff] %v6551_v48  ;;  %v6557_v51 = vpop.f32.mrf.mxu0  ;;  %v4728_v27 = vpop.eup %4727  ;;  %v6560_v61 = vmul.f32 %v2594_v26, %v5999_v54  ;;  %v6563_v16 = vmul.f32 %v2603_v47, %v6014_v45  ;;  %4747 = vtanh.f32 %v1455_v4  ;;  %v1465_v5 = vmul.f32 0.5, %v8967_v19  ;;  %v8972_v45 = vld [vmem:[#allocation33_spill] sm:$0xff] }
 0x198   : > { %8962 = vst [vmem:[#allocation12_spill] sm:$0xff] %v6554_v17  ;;  %8964 = vst [vmem:[#allocation73_spill] sm:$0xff] %v6557_v51  ;;  %v6566_v30 = vpop.f32.mrf.mxu1  ;;  %v4730_v13 = vpop.eup %4729  ;;  %v6569_v53 = vmul.f32 %v2604_v22, %v6025_v21  ;;  %v2613_v1 = vmul.f32 0.5, %v2293_v50  ;;  %4749 = vtanh.f32 %v1694_v24  ;;  %v1704_v51 = vmul.f32 0.5, %v8970_v25  ;;  %v8974_v17 = vld [vmem:[#allocation9_spill] sm:$0xff] }
 0x199   : > { %8965 = vst [vmem:[#allocation60_spill] sm:$0xff] %v6560_v61  ;;  %8966 = vst [vmem:[#allocation56_spill] sm:$0xff] %v6563_v16  ;;  %v6572_v48 = vpop.f32.mrf.mxu0  ;;  %v4732_v54 = vpop.eup %4731  ;;  %v2614_v26 = vmul.f32 0.5, %v2294_v10  ;;  %v2623_v55 = vmul.f32 0.5, %v2303_v42  ;;  %4751 = vtanh.f32 %v1456_v34  ;;  %v1466_v47 = vmul.f32 0.5, %v8972_v45  ;;  %v8976_v61 = vld [vmem:[#allocation35_spill] sm:$0xff] }
 0x19a   : > { %8968 = vst [vmem:[#allocation10_spill] sm:$0xff] %v6566_v30  ;;  %8969 = vst [vmem:[#allocation75_spill] sm:$0xff] %v6569_v53  ;;  %v6575_v4 = vpop.f32.mrf.mxu1  ;;  %v2385_v19 = vmul.f32 0.5, %v2065_v43  ;;  %v2304_v30 = vadd.f32 1.0, %v4726_v39  ;;  %4753 = vtanh.f32 %v1703_v33  ;;  %v1713_v21 = vmul.f32 0.5, %v8974_v17  ;;  %v8979_v42 = vld [vmem:[#allocation72_spill] sm:$0xff] }
 0x19b   : > { %8971 = vst [vmem:[#allocation44_spill] sm:$0xff] %v6572_v48  ;;  %8973 = vst [vmem:[#allocation37_spill] sm:$0xff] %v6575_v4  ;;  %v6578_v22 = vpop.f32.mrf.mxu0  ;;  %v2066_v50 = vadd.f32 1.0, %v4728_v27  ;;  %v2313_v24 = vadd.f32 1.0, %v4730_v13  ;;  %4755 = vtanh.f32 %v1465_v5  ;;  %v1475_v48 = vmul.f32 0.5, %v8976_v61  ;;  %v8983_v5 = vld [vmem:[#allocation74_spill] sm:$0xff] }
 0x19c   : > { %8975 = vst [vmem:[#allocation33_spill] sm:$0xff] %v6578_v22  ;;  %v6581_v16 = vpop.f32.mrf.mxu1  ;;  %v6584_v34 = vmul.f32 %v2613_v1, %v6036_v59  ;;  %v2075_v10 = vadd.f32 1.0, %v4732_v54  ;;  %4757 = vtanh.f32 %v1704_v51  ;;  %v1714_v43 = vmul.f32 0.5, %v8979_v42  ;;  %v8986_v54 = vld [vmem:[#allocation70_spill] sm:$0xff] }
 0x19d   : > { %8977 = vst [vmem:[#allocation9_spill] sm:$0xff] %v6581_v16  ;;  %v6587_v39 = vpop.f32.mrf.mxu0  ;;  %v4734_v33 = vpop.eup %4733  ;;  %v6590_v4 = vmul.f32 %v2614_v26, %v8908_v2  ;;  %v6593_v27 = vmul.f32 %v2623_v55, %v8911_v8  ;;  %4759 = vtanh.f32 %v1466_v47  ;;  %v1476_v13 = vmul.f32 0.5, %v8983_v5  ;;  %v8988_v8 = vld [vmem:[#allocation51_spill] sm:$0xff] }
 0x19e   : > { %8978 = vst [vmem:[#allocation35_spill] sm:$0xff] %v6584_v34  ;;  %8980 = vst [vmem:[#allocation72_spill] sm:$0xff] %v6587_v39  ;;  %v6596_v22 = vpop.f32.mrf.mxu1  ;;  %v4736_v59 = vpop.eup %4735  ;;  %v6599_v1 = vmul.f32 %v2385_v19, %v8915_v7  ;;  %v2624_v51 = vmul.f32 0.5, %v2304_v30  ;;  %4761 = vtanh.f32 %v1713_v21  ;;  %v1723_v39 = vmul.f32 0.5, %v8986_v54  ;;  %v8990_v7 = vld [vmem:[#allocation43_spill] sm:$0xff] }
 0x19f   : > { %8981 = vst [vmem:[#allocation99_spill] sm:$0xff] %v6590_v4  ;;  %8982 = vst [vmem:[#allocation100_spill] sm:$0xff] %v6593_v27  ;;  %v6602_v16 = vpop.f32.mrf.mxu0  ;;  %v4738_v2 = vpop.eup %4737  ;;  %v2386_v26 = vmul.f32 0.5, %v2066_v50  ;;  %v2633_v53 = vmul.f32 0.5, %v2313_v24  ;;  %4763 = vtanh.f32 %v1475_v48  ;;  %v1485_v55 = vmul.f32 0.5, %v8988_v8 }
 0x1a0   : > { %8984 = vst [vmem:[#allocation101_spill] sm:$0xff] %v6596_v22  ;;  %8985 = vst [vmem:[#allocation102_spill] sm:$0xff] %v6599_v1  ;;  %v6605_v47 = vpop.f32.mrf.mxu1  ;;  %v4740_v5 = vpop.eup %4739  ;;  %v2395_v34 = vmul.f32 0.5, %v2075_v10  ;;  %v2314_v4 = vadd.f32 1.0, %v4734_v33  ;;  %4765 = vtanh.f32 %v1714_v43  ;;  %v1724_v19 = vmul.f32 0.5, %v8990_v7  ;;  %v8995_v10 = vld [vmem:[#allocation36_spill] sm:$0xff] }
 0x1a1   : > { %8987 = vst [vmem:[#allocation70_spill] sm:$0xff] %v6602_v16  ;;  %8989 = vst [vmem:[#allocation103_spill] sm:$0xff] %v6605_v47  ;;  %v6608_v30 = vpop.f32.mrf.mxu0  ;;  %v4742_v21 = vpop.eup %4741  ;;  %v2076_v1 = vadd.f32 1.0, %v4736_v59  ;;  %4767 = vtanh.f32 %v1476_v13  ;;  %v8992_v16 = vld [vmem:[#allocation45_spill] sm:$0xff]  ;;  %v6614_v24 = vmul.f32 %v2624_v51, %v8921_v37  ;;  %v2323_v8 = vadd.f32 1.0, %v4738_v2 }
 0x1a2   : > { %8991 = vst [vmem:[#allocation43_spill] sm:$0xff] %v6608_v30  ;;  %v1486_v22 = vmul.f32 0.5, %v8992_v16  ;;  %v6611_v50 = vpop.f32.mrf.mxu1  ;;  %v4744_v48 = vpop.eup %4743  ;;  %4769 = vtanh.f32 %v1723_v39  ;;  %v1733_v33 = vmul.f32 0.5, %v8995_v10  ;;  %v8554_v43 = vmov 1.0   ;;  %v8998_v16 = vld [vmem:[#allocation39_spill] sm:$0xff] }
 0x1a3   : > { %8993 = vst [vmem:[#allocation104_spill] sm:$0xff] %v6611_v50  ;;  %8994 = vst [vmem:[#allocation105_spill] sm:$0xff] %v6614_v24  ;;  %3087 = vmatprep.mubr.f32.mxu1 %v8554_v43  ;;  %v6618_v47 = vpop.f32.mrf.mxu0  ;;  %3229 = vmatprep.mubr.f32.mxu0 %v8554_v43  ;;  %v4746_v13 = vpop.eup %4745  ;;  %v6622_v59 = vmul.f32 %v2386_v26, %v8923_v28  ;;  %v2085_v30 = vadd.f32 1.0, %v4740_v5  ;;  %4771 = vtanh.f32 %v1485_v55  ;;  %v1495_v37 = vmul.f32 0.5, %v8998_v16 }
 0x1a4   : > { %8996 = vst [vmem:[#allocation36_spill] sm:$0xff] %v6618_v47  ;;  %3088 = vmatmul.mubr.f32.vlgmr.msra.gmra.mxu1 %v8554_v43  ;;  %v6626_v39 = vpop.f32.mrf.mxu1  ;;  %v4748_v51 = vpop.eup %4747  ;;  %v6629_v2 = vmul.f32 %v2633_v53, %v8924_v62  ;;  %v2634_v50 = vmul.f32 0.5, %v2314_v4  ;;  %4773 = vtanh.f32 %v1724_v19  ;;  %v9000_v47 = vld [vmem:[#allocation20_spill] sm:$0xff]  ;;  %v6637_v26 = vmul.f32 %v2395_v34, %v8927_v58  ;;  %v9005_v19 = vld [vmem:[#allocation83_spill] sm:$0xff] }
 0x1a5   : > { %8997 = vst [vmem:[#allocation106_spill] sm:$0xff] %v6622_v59  ;;  %8999 = vst [vmem:[#allocation107_spill] sm:$0xff] %v6626_v39  ;;  %v1734_v27 = vmul.f32 0.5, %v9000_v47  ;;  %3095 = vmatpush1.msra.mxu1 %v6475_v57  ;;  %v6633_v28 = vpop.f32.mrf.mxu0  ;;  %3158 = vmatprep.mubr.f32.mxu1 %v8554_v43  ;;  %v4750_v5 = vpop.eup %4749  ;;  %v2396_v55 = vmul.f32 0.5, %v2076_v1  ;;  %4775 = vtanh.f32 %v1486_v22  ;;  %v9003_v59 = vld [vmem:[#allocation82_spill] sm:$0xff]  ;;  %v2643_v4 = vmul.f32 0.5, %v2323_v8 }
 0x1a6   : > { %9001 = vst [vmem:[#allocation20_spill] sm:$0xff] %v6633_v28  ;;  %9002 = vst [vmem:[#allocation108_spill] sm:$0xff] %v6637_v26  ;;  %v1496_v16 = vmul.f32 0.5, %v9003_v59  ;;  %3096 = vmatprep.subr.mxu1 %v6440_v36  ;;  %v6641_v62 = vpop.f32.mrf.mxu1  ;;  %v6643_v53 = vpop.eup %4751  ;;  %v2324_v57 = vadd.f32 1.0, %v4742_v21  ;;  %4777 = vtanh.f32 %v1733_v33  ;;  %v1505_v28 = vmul.f32 0.5, %v9005_v19  ;;  %v9006_v43 = vld [vmem:[#allocation89_spill] sm:$0xff] }
 0x1a7   : > { %9004 = vst [vmem:[#allocation109_spill] sm:$0xff] %v6641_v62  ;;  %3097 = vmatpush1.msra.mxu1 %v9006_v43  ;;  %v6647_v39 = vpop.f32.mrf.mxu0  ;;  %v6649_v58 = vpop.eup %4753  ;;  %v2405_v22 = vmul.f32 0.5, %v2085_v30  ;;  %v2086_v34 = vadd.f32 1.0, %v4744_v48  ;;  %4779 = vtanh.f32 %v1495_v37  ;;  %v9008_v1 = vld [vmem:[#allocation24_spill] sm:$0xff]  ;;  %v6658_v21 = vmul.f32 %v2634_v50, %v8935_v12  ;;  %v9012_v62 = vld [vmem:[#allocation87_spill] sm:$0xff] }
 0x1a8   : > { %9007 = vst [vmem:[#allocation89_spill] sm:$0xff] %v6647_v39  ;;  %v1506_v36 = vmul.f32 0.5, %v9008_v1  ;;  %v9009_v26 = vld [vmem:[#allocation88_spill] sm:$0xff]  ;;  %v6653_v59 = vpop.f32.mrf.mxu1  ;;  %v6655_v8 = vpop.eup %4755  ;;  %v2333_v33 = vadd.f32 1.0, %v4746_v13  ;;  %4781 = vtanh.f32 %v1734_v27  ;;  %v6667_v37 = vmul.f32 %v2396_v55, %v8938_v38  ;;  %v9016_v1 = vld [vmem:[#allocation86_spill] sm:$0xff] }
 0x1a9   : > { %3098 = vmatprep.subr.mxu1 %v9009_v26  ;;  %9010 = vst [vmem:[#allocation88_spill] sm:$0xff] %v6653_v59  ;;  %v9011_v43 = vld [vmem:[#allocation68_spill] sm:$0xff]  ;;  %v6662_v30 = vpop.f32.mrf.mxu0  ;;  %v6664_v48 = vpop.eup %4757  ;;  %v2095_v26 = vadd.f32 1.0, %v4748_v51  ;;  %4783 = vtanh.f32 %v1496_v16  ;;  %v9015_v59 = vld [vmem:[#allocation71_spill] sm:$0xff]  ;;  %v6674_v50 = vmul.f32 %v2643_v4, %v8940_v18  ;;  %v2644_v13 = vmul.f32 0.5, %v2324_v57 }
 0x1aa   : > { %v1515_v39 = vmul.f32 0.5, %v9011_v43  ;;  %3099 = vmatpush1.msra.mxu1 %v9012_v62  ;;  %9013 = vst [vmem:[#allocation87_spill] sm:$0xff] %v6662_v30  ;;  %9014 = vst [vmem:[#allocation110_spill] sm:$0xff] %v6667_v37  ;;  %v1516_v19 = vmul.f32 0.5, %v9015_v59  ;;  %v6671_v12 = vpop.f32.mrf.mxu1  ;;  %v4760_v27 = vpop.eup %4759  ;;  %4785 = vtanh.f32 %v1505_v28  ;;  %v1546_v62 = vmul.f32 0.5, %v6419_v60  ;;  %v9018_v30 = vld [vmem:[#allocation84_spill] sm:$0xff] }
 0x1ab   : > { %3100 = vmatprep.subr.mxu1 %v9016_v1  ;;  %9017 = vst [vmem:[#allocation86_spill] sm:$0xff] %v6671_v12  ;;  %v6678_v38 = vpop.f32.mrf.mxu0  ;;  %v4762_v51 = vpop.eup %4761  ;;  %v6681_v16 = vmul.f32 %v2405_v22, %v8943_v41  ;;  %v2406_v55 = vmul.f32 0.5, %v2086_v34  ;;  %4787 = vtanh.f32 %v1506_v36  ;;  %v9021_v1 = vld [vmem:[#allocation81_spill] sm:$0xff]  ;;  %v1556_v37 = vmul.f32 0.5, %v6436_v3 }
 0x1ac   : > { %3101 = vmatpush1.msra.mxu1 %v9018_v30  ;;  %9019 = vst [vmem:[#allocation84_spill] sm:$0xff] %v6678_v38  ;;  %v6685_v18 = vpop.f32.mrf.mxu1  ;;  %v4764_v4 = vpop.eup %4763  ;;  %v2653_v28 = vmul.f32 0.5, %v2333_v33  ;;  %v2334_v57 = vadd.f32 1.0, %v4750_v5  ;;  %4789 = vtanh.f32 %v1515_v39  ;;  %v9023_v12 = vld [vmem:[#allocation41_spill] sm:$0xff]  ;;  %v1566_v30 = vmul.f32 0.5, %v6462_v15 }
 0x1ad   : > { %9020 = vst [vmem:[#allocation111_spill] sm:$0xff] %v6681_v16  ;;  %3102 = vmatprep.subr.mxu1 %v9021_v1  ;;  %9022 = vst [vmem:[#allocation81_spill] sm:$0xff] %v6685_v18  ;;  %v6689_v38 = vpop.f32.mrf.mxu0  ;;  %v6691_v41 = vpop.eup %4765  ;;  %v2415_v22 = vmul.f32 0.5, %v2095_v26  ;;  %v9025_v34 = vld [vmem:[#allocation85_spill] sm:$0xff]  ;;  %4791 = vtanh.f32 %v1516_v19  ;;  %v1565_v18 = vmul.f32 0.5, %v6450_v11  ;;  %v6703_v5 = vmul.f32 %v2644_v13, %v8946_v6  ;;  %v9029_v26 = vld [vmem:[#allocation80_spill] sm:$0xff] }
 0x1ae   : > { %3103 = vmatpush1.msra.mxu1 %v9023_v12  ;;  %9024 = vst [vmem:[#allocation41_spill] sm:$0xff] %v6689_v38  ;;  %v6694_v36 = vmul.f32 0.5, %v9025_v34  ;;  %v9026_v1 = vld [vmem:[#allocation53_spill] sm:$0xff]  ;;  %v6698_v33 = vpop.f32.mrf.mxu1  ;;  %v6700_v39 = vpop.eup %4767  ;;  %v9028_v12 = vld [vmem:[#allocation7_spill] sm:$0xff]  ;;  %4793 = vtanh.f32 %v1546_v62  ;;  %v1575_v16 = vmul.f32 0.5, %v6469_v31  ;;  %v6713_v34 = vmul.f32 %v2406_v55, %v8951_v49 }
 0x1af   : > { %3104 = vmatprep.subr.mxu1 %v9026_v1  ;;  %9027 = vst [vmem:[#allocation53_spill] sm:$0xff] %v6698_v33  ;;  %v6706_v38 = vmul.f32 0.5, %v9028_v12  ;;  %v6710_v19 = vpop.f32.mrf.mxu0  ;;  %v4770_v1 = vpop.eup %4769  ;;  %v2096_v33 = vadd.f32 1.0, %v6643_v53  ;;  %v1555_v43 = vmul.f32 0.5, %v6428_v29  ;;  %4795 = vtanh.f32 %v1556_v37  ;;  %v9032_v6 = vld [vmem:[#allocation79_spill] sm:$0xff]  ;;  %v9033_v12 = vld [vmem:[#allocation40_spill] sm:$0xff] }
 0x1b0   : > { %3105 = vmatpush1.msra.mxu1 %v9029_v26  ;;  %9030 = vst [vmem:[#allocation80_spill] sm:$0xff] %v6710_v19  ;;  %9031 = vst [vmem:[#allocation112_spill] sm:$0xff] %v6713_v34  ;;  %v6718_v13 = vpop.eup %4771  ;;  %v6721_v62 = vmul.f32 %v2653_v28, %v8954_v46  ;;  %v2654_v26 = vmul.f32 0.5, %v2334_v57  ;;  %4797 = vtanh.f32 %v1566_v30  ;;  %v1576_v19 = vmul.f32 0.5, %v6478_v40  ;;  %v9036_v34 = vld [vmem:[#allocation32_spill] sm:$0xff]  ;;  %v6733_v46 = vpop.f32.mrf.mxu1 }
 0x1b1   : > { %3106 = vmatprep.subr.mxu1 %v9032_v6  ;;  %v6725_v49 = vpop.f32.mrf.mxu0  ;;  %v4774_v55 = vpop.eup %4773  ;;  %v6728_v53 = vmul.f32 %v2415_v22, %v8956_v32  ;;  %v2343_v37 = vadd.f32 1.0, %v6649_v58  ;;  %v1545_v6 = vmul.f32 0.5, %v6407_v44  ;;  %4799 = vtanh.f32 %v1565_v18  ;;  %9037 = vst [vmem:[#allocation32_spill] sm:$0xff] %v6733_v46  ;;  %v9038_v32 = vld [vmem:[#allocation42_spill] sm:$0xff]  ;;  %v9040_v46 = vld [vmem:[#allocation28_spill] sm:$0xff] }
 0x1b2   : > { %3107 = vmatpush1.msra.mxu1 %v9033_v12  ;;  %9034 = vst [vmem:[#allocation79_spill] sm:$0xff] %v6725_v49  ;;  %v6735_v28 = vpop.eup %4775  ;;  %v2105_v57 = vadd.f32 1.0, %v6655_v8  ;;  %v2344_v30 = vadd.f32 1.0, %v6664_v48  ;;  %v1536_v12 = vmul.f32 0.5, %v6397_v23  ;;  %4801 = vtanh.f32 %v1575_v16  ;;  %v9043_v16 = vld [vmem:[#allocation47_spill] sm:$0xff] }
 0x1b3   : > { %9035 = vst [vmem:[#allocation40_spill] sm:$0xff] %v6728_v53  ;;  %3108 = vmatprep.subr.mxu1 %v9036_v34  ;;  %v6741_v22 = vpop.f32.mrf.mxu0  ;;  %v4778_v58 = vpop.eup %4777  ;;  %v2106_v49 = vadd.f32 1.0, %v4760_v27  ;;  %v2353_v18 = vadd.f32 1.0, %v4762_v51  ;;  %v1535_v34 = vmul.f32 0.5, %v6388_v35  ;;  %4803 = vtanh.f32 %v1555_v43  ;;  %v9045_v43 = vld [vmem:[#allocation92_spill] sm:$0xff] }
 0x1b4   : > { %3109 = vmatpush1.msra.mxu1 %v9038_v32  ;;  %9039 = vst [vmem:[#allocation42_spill] sm:$0xff] %v6741_v22  ;;  %v6745_v53 = vpop.eup %4779  ;;  %v6747_v8 = vmul.f32 0.5, %v2096_v33  ;;  %v2115_v48 = vadd.f32 1.0, %v4764_v4  ;;  %v1526_v59 = vmul.f32 0.5, %v9042_v14  ;;  %4805 = vtanh.f32 %v1576_v19  ;;  %v6758_v33 = vpop.f32.mrf.mxu1 }
 0x1b5   : > { %3110 = vmatprep.subr.mxu1 %v9040_v46  ;;  %v6751_v32 = vpop.f32.mrf.mxu0  ;;  %v4782_v22 = vpop.eup %4781  ;;  %v6754_v27 = vmul.f32 %v2654_v26, %v8958_v9  ;;  %v2663_v51 = vmul.f32 0.5, %v2343_v37  ;;  %v1525_v24 = vmul.f32 0.5, %v9045_v43  ;;  %4807 = vtanh.f32 %v1545_v6  ;;  %v9046_v46 = vld [vmem:[#allocation26_spill] sm:$0xff]  ;;  %9047 = vst [vmem:[#allocation47_spill] sm:$0xff] %v6758_v33 }
 0x1b6   : > { %9041 = vst [vmem:[#allocation28_spill] sm:$0xff] %v6747_v8  ;;  %3111 = vmatpush1.msra.mxu1 %v9043_v16  ;;  %9044 = vst [vmem:[#allocation94_spill] sm:$0xff] %v6751_v32  ;;  %v6760_v4 = vpop.eup %4783  ;;  %v6762_v8 = vmul.f32 0.5, %v2105_v57  ;;  %v2664_v19 = vmul.f32 0.5, %v2344_v30  ;;  %v2354_v16 = vadd.f32 1.0, %v6691_v41  ;;  %4809 = vtanh.f32 %v1536_v12  ;;  %v9049_v32 = vld [vmem:[#allocation78_spill] sm:$0xff] }
 0x1b7   : > { %3112 = vmatprep.subr.mxu1 %v9046_v46  ;;  %v6766_v9 = vpop.f32.mrf.mxu0  ;;  %v6768_v26 = vpop.eup %4785  ;;  %v2426_v37 = vmul.f32 0.5, %v2106_v49  ;;  %v2673_v6 = vmul.f32 0.5, %v2353_v18  ;;  %v2363_v20 = vadd.f32 1.0, %v4770_v1  ;;  %4811 = vtanh.f32 %v1535_v34  ;;  %v9051_v46 = vld [vmem:[#allocation22_spill] sm:$0xff]  ;;  %v9052_v41 = vld [vmem:[#allocation17_spill] sm:$0xff] }
 0x1b8   : > { %9048 = vst [vmem:[#allocation92_spill] sm:$0xff] %v6762_v8  ;;  %3113 = vmatpush1.msra.mxu1 %v9049_v32  ;;  %9050 = vst [vmem:[#allocation26_spill] sm:$0xff] %v6766_v9  ;;  %v6771_v33 = vpop.eup %4787  ;;  %v2435_v57 = vmul.f32 0.5, %v2115_v48  ;;  %v2116_v30 = vadd.f32 1.0, %v6700_v39  ;;  %v2364_v8 = vadd.f32 1.0, %v4774_v55  ;;  %4813 = vtanh.f32 %v1526_v59  ;;  %v9054_v18 = vld [vmem:[#allocation90_spill] sm:$0xff] }
 0x1b9   : > { %3114 = vmatprep.subr.mxu1 %v9051_v46  ;;  %v6775_v12 = vpop.f32.mrf.mxu0  ;;  %v6777_v32 = vpop.eup %4789  ;;  %v2373_v9 = vadd.f32 1.0, %v4778_v58  ;;  %v2374_v49 = vadd.f32 1.0, %v4782_v22  ;;  %v1437_v1 = vmul.f32 0.5, %v9054_v18  ;;  %4815 = vtanh.f32 %v1525_v24  ;;  %v9055_v34 = vld [vmem:[#allocation54_spill] sm:$0xff]  ;;  %v9074_v18 = vld [vmem:[#allocation25_spill] sm:$0xff] }
 0x1ba   : > { %3115 = vmatpush1.msra.mxu1 %v9052_v41  ;;  %9053 = vst [vmem:[#allocation78_spill] sm:$0xff] %v6775_v12  ;;  %v6781_v46 = vpop.f32.mrf.mxu1  ;;  %v6783_v48 = vpop.eup %4791  ;;  %v6786_v39 = vmul.f32 %v2663_v51, %v8963_v52  ;;  %v2674_v59 = vmul.f32 0.5, %v2354_v16  ;;  %v2125_v55 = vadd.f32 1.0, %v6718_v13  ;;  %4817 = vtanh.f32 %v6694_v36  ;;  %v9057_v41 = vld [vmem:[#allocation15_spill] sm:$0xff]  ;;  %v9060_v52 = vld [vmem:[#allocation49_spill] sm:$0xff] }
 0x1bb   : > { %3116 = vmatprep.subr.mxu1 %v9055_v34  ;;  %9056 = vst [vmem:[#allocation22_spill] sm:$0xff] %v6781_v46  ;;  %v6791_v22 = vpop.f32.mrf.mxu0  ;;  %v4794_v58 = vpop.eup %4793  ;;  %v6794_v24 = vmul.f32 %v2664_v19, %v8970_v25  ;;  %v2683_v34 = vmul.f32 0.5, %v2363_v20  ;;  %4819 = vtanh.f32 %v6706_v38  ;;  %v9059_v46 = vld [vmem:[#allocation91_spill] sm:$0xff]  ;;  %v6800_v13 = vmul.f32 %v2426_v37, %v8972_v45  ;;  %v9062_v25 = vld [vmem:[#allocation16_spill] sm:$0xff] }
 0x1bc   : > { %3117 = vmatpush1.msra.mxu1 %v9057_v41  ;;  %9058 = vst [vmem:[#allocation17_spill] sm:$0xff] %v6791_v22  ;;  %v1438_v12 = vmul.f32 0.5, %v9059_v46  ;;  %v4796_v51 = vpop.eup %4795  ;;  %v6803_v36 = vmul.f32 %v2673_v6, %v8974_v17  ;;  %v6806_v16 = vmul.f32 %v2435_v57, %v8976_v61  ;;  %v2684_v41 = vmul.f32 0.5, %v2364_v8  ;;  %v9064_v46 = vld [vmem:[#allocation69_spill] sm:$0xff]  ;;  %v6814_v45 = vpop.f32.mrf.mxu1 }
 0x1bd   : > { %3118 = vmatprep.subr.mxu1 %v9060_v52  ;;  %9061 = vst [vmem:[#allocation54_spill] sm:$0xff] %v6800_v13  ;;  %v6809_v20 = vpop.f32.mrf.mxu0  ;;  %v4798_v38 = vpop.eup %4797  ;;  %v6811_v19 = vmul.f32 0.5, %v2116_v30  ;;  %v2693_v22 = vmul.f32 0.5, %v2373_v9  ;;  %v2694_v52 = vmul.f32 0.5, %v2374_v49  ;;  %4821 = vtanh.f32 %v1437_v1  ;;  %9065 = vst [vmem:[#allocation49_spill] sm:$0xff] %v6814_v45  ;;  %v9066_v6 = vld [vmem:[#allocation93_spill] sm:$0xff] }
 0x1be   : > { %3119 = vmatpush1.msra.mxu1 %v9062_v25  ;;  %9063 = vst [vmem:[#allocation15_spill] sm:$0xff] %v6809_v20  ;;  %v4800_v17 = vpop.eup %4799  ;;  %v6817_v37 = vmul.f32 %v2674_v59, %v8979_v42  ;;  %v6819_v61 = vmul.f32 0.5, %v2125_v55  ;;  %v6822_v8 = vadd.f32 1.0, %v6735_v28  ;;  %v1447_v57 = vmul.f32 0.5, %v9066_v6  ;;  %v9067_v30 = vld [vmem:[#allocation67_spill] sm:$0xff]  ;;  %v9069_v42 = vld [vmem:[#allocation8_spill] sm:$0xff] }
 0x1bf   : > { %3120 = vmatprep.subr.mxu1 %v9064_v46  ;;  %v6826_v9 = vpop.f32.mrf.mxu0  ;;  %v4802_v49 = vpop.eup %4801  ;;  %v3003_v1 = vmul.f32 %v2683_v34, %v8986_v54  ;;  %v6830_v46 = vadd.f32 1.0, %v6745_v53  ;;  %4823 = vtanh.f32 %v1438_v12  ;;  %v1448_v59 = vmul.f32 0.5, %v9069_v42  ;;  %v9070_v55 = vld [vmem:[#allocation64_spill] sm:$0xff] }
 0x1c0   : > { %3121 = vmatpush1.msra.mxu1 %v9067_v30  ;;  %9068 = vst [vmem:[#allocation16_spill] sm:$0xff] %v6826_v9  ;;  %v4804_v25 = vpop.eup %4803  ;;  %v3004_v28 = vmul.f32 %v2684_v41, %v8990_v7  ;;  %v6836_v45 = vadd.f32 1.0, %v6760_v4  ;;  %v2206_v30 = vadd.f32 1.0, %v4798_v38  ;;  %v2215_v20 = vadd.f32 1.0, %v4802_v49  ;;  %v9071_v9 = vld [vmem:[#allocation61_spill] sm:$0xff]  ;;  %v9073_v34 = vld [vmem:[#allocation76_spill] sm:$0xff]  ;;  %v6845_v7 = vpop.f32.mrf.mxu1 }
 0x1c1   : > { %3122 = vmatprep.subr.mxu1 %v9070_v55  ;;  %v6839_v6 = vpop.f32.mrf.mxu0  ;;  %v4806_v54 = vpop.eup %4805  ;;  %v3013_v53 = vmul.f32 %v2693_v22, %v8995_v10  ;;  %v3014_v12 = vmul.f32 %v2694_v52, %v9000_v47  ;;  %v1457_v42 = vmul.f32 0.5, %v9073_v34  ;;  %v2205_v55 = vadd.f32 1.0, %v4800_v17  ;;  %9075 = vst [vmem:[#allocation67_spill] sm:$0xff] %v6845_v7  ;;  %v9076_v49 = vld [vmem:[#allocation11_spill] sm:$0xff] }
 0x1c2   : > { %3123 = vmatpush1.msra.mxu1 %v9071_v9  ;;  %9072 = vst [vmem:[#allocation69_spill] sm:$0xff] %v6839_v6  ;;  %v4808_v4 = vpop.eup %4807  ;;  %v6848_v41 = vadd.f32 1.0, %v6768_v26  ;;  %4825 = vtanh.f32 %v1447_v57  ;;  %v2196_v38 = vadd.f32 1.0, %v4796_v51  ;;  %v2216_v9 = vadd.f32 1.0, %v4806_v54  ;;  %v9078_v7 = vld [vmem:[#allocation95_spill] sm:$0xff] }
 0x1c3   : > { %3124 = vmatprep.subr.mxu1 %v9074_v18  ;;  %v6851_v6 = vpop.f32.mrf.mxu0  ;;  %v4810_v10 = vpop.eup %4809  ;;  %v6854_v47 = vadd.f32 1.0, %v6771_v33  ;;  %4827 = vtanh.f32 %v1448_v59  ;;  %v2195_v22 = vadd.f32 1.0, %v4804_v25  ;;  %v2535_v18 = vmul.f32 0.5, %v2215_v20 }
 0x1c4   : > { %3125 = vmatpush1.msra.mxu1 %v9076_v49  ;;  %9077 = vst [vmem:[#allocation64_spill] sm:$0xff] %v6851_v6  ;;  %v4812_v52 = vpop.eup %4811  ;;  %v6857_v17 = vadd.f32 1.0, %v6777_v32  ;;  %v2186_v26 = vadd.f32 1.0, %v4794_v58  ;;  %v2526_v57 = vmul.f32 0.5, %v2206_v30  ;;  %v2536_v51 = vmul.f32 0.5, %v2216_v9  ;;  %v6862_v59 = vpop.f32.mrf.mxu1  ;;  %v9081_v9 = vld [vmem:[#allocation97_spill] sm:$0xff] }
 0x1c5   : > { %3126 = vmatprep.subr.mxu1 %v3014_v12  ;;  %v6859_v54 = vpop.f32.mrf.mxu0  ;;  %v4814_v49 = vpop.eup %4813  ;;  %4829 = vtanh.f32 %v1457_v42  ;;  %v1458_v6 = vmul.f32 0.5, %v9078_v7  ;;  %v2185_v33 = vadd.f32 1.0, %v4808_v4  ;;  %v2525_v34 = vmul.f32 0.5, %v2205_v55  ;;  %9079 = vst [vmem:[#allocation61_spill] sm:$0xff] %v6862_v59  ;;  %v9080_v12 = vld [vmem:[#allocation96_spill] sm:$0xff] }
 0x1c6   : > { %3127 = vmatpush2.msra.mxu1 %v3013_v53  ;;  %v4816_v20 = vpop.eup %4815  ;;  %v2176_v25 = vadd.f32 1.0, %v4810_v10  ;;  %v1467_v32 = vmul.f32 0.5, %v9080_v12  ;;  %v2516_v13 = vmul.f32 0.5, %v2196_v38  ;;  %v2856_v58 = vmul.f32 %v2536_v51, %v6478_v40 }
 0x1c7   : > { %3128 = vmatprep.subr.mxu1 %v3004_v28  ;;  %v6866_v30 = vpop.f32.mrf.mxu0  ;;  %v6868_v53 = vpop.eup %4817  ;;  %v2175_v42 = vadd.f32 1.0, %v4812_v52  ;;  %v1468_v7 = vmul.f32 0.5, %v9081_v9  ;;  %v2515_v4 = vmul.f32 0.5, %v2195_v22  ;;  %v2855_v28 = vmul.f32 %v2535_v18, %v6469_v31  ;;  %v9082_v22 = vld [vmem:[#allocation98_spill] sm:$0xff] }
 0x1c8   : > { %3129 = vmatpush2.msra.mxu1 %v3003_v1  ;;  %v6873_v55 = vpop.eup %4819  ;;  %v2156_v10 = vadd.f32 1.0, %v6783_v48  ;;  %v2166_v38 = vadd.f32 1.0, %v4814_v49  ;;  %v2506_v59 = vmul.f32 0.5, %v2186_v26  ;;  %v2846_v40 = vmul.f32 %v2526_v57, %v6462_v15  ;;  %3165 = vmatprep.subr.mxu0 %v2856_v58 }
 0x1c9   : > { %3130 = vmatprep.subr.mxu1 %v6817_v37  ;;  %v6878_v1 = vpop.f32.mrf.mxu0  ;;  %v2165_v52 = vadd.f32 1.0, %v4816_v20  ;;  %v2505_v51 = vmul.f32 0.5, %v2185_v33  ;;  %v1477_v12 = vmul.f32 0.5, %v9082_v22  ;;  %v2845_v31 = vmul.f32 %v2525_v34, %v6450_v11  ;;  %3166 = vmatpush1.msra.mxu0 %v2855_v28  ;;  %v6883_v37 = vpop.f32.mrf.mxu1 }
 0x1ca   : > { %3131 = vmatpush2.msra.mxu1 %v6803_v36  ;;  %9083 = vst [vmem:[#allocation25_spill] sm:$0xff] %v6883_v37  ;;  %v6885_v48 = vpop.eup %4821  ;;  %v2496_v18 = vmul.f32 0.5, %v2176_v25  ;;  %4831 = vtanh.f32 %v1458_v6  ;;  %v2836_v15 = vmul.f32 %v2516_v13, %v6436_v3  ;;  %v9084_v36 = vld [vmem:[#allocation65_spill] sm:$0xff]  ;;  %3167 = vmatprep.subr.mxu0 %v2846_v40  ;;  %v2495_v49 = vmul.f32 0.5, %v2175_v42 }
 0x1cb   : > { %3132 = vmatprep.subr.mxu1 %v6794_v24  ;;  %v1478_v26 = vmul.f32 0.5, %v9084_v36  ;;  %v6890_v57 = vpop.f32.mrf.mxu0  ;;  %4833 = vtanh.f32 %v1467_v32  ;;  %v2835_v11 = vmul.f32 %v2515_v4, %v6428_v29  ;;  %v9086_v24 = vld [vmem:[#allocation34_spill] sm:$0xff]  ;;  %3168 = vmatpush1.msra.mxu0 %v2845_v31  ;;  %v2486_v6 = vmul.f32 0.5, %v2166_v38  ;;  %v9087_v13 = vld [vmem:[#allocation57_spill] sm:$0xff]  ;;  %v6905_v58 = vpop.f32.mrf.mxu1 }
 0x1cc   : > { %3133 = vmatpush2.msra.mxu1 %v6786_v39  ;;  %9085 = vst [vmem:[#allocation11_spill] sm:$0xff] %v6890_v57  ;;  %v1487_v34 = vmul.f32 0.5, %v9086_v24  ;;  %v6895_v33 = vpop.eup %4823  ;;  %v2826_v3 = vmul.f32 %v2506_v59, %v6419_v60  ;;  %4835 = vtanh.f32 %v1468_v7  ;;  %v1488_v39 = vmul.f32 0.5, %v9087_v13  ;;  %3169 = vmatprep.subr.mxu0 %v2836_v15  ;;  %v9089_v32 = vld [vmem:[#allocation62_spill] sm:$0xff]  ;;  %9090 = vst [vmem:[#allocation98_spill] sm:$0xff] %v6905_v58  ;;  %v9094_v40 = vld [vmem:[#allocation105_spill] sm:$0xff] }
 0x1cd   : > { %3134 = vmatprep.subr.mxu1 %v6754_v27  ;;  %v6900_v20 = vpop.f32.mrf.mxu0  ;;  %v2485_v25 = vmul.f32 0.5, %v2165_v52  ;;  %v2825_v29 = vmul.f32 %v2505_v51, %v6407_v44  ;;  %4837 = vtanh.f32 %v1477_v12  ;;  %v1497_v27 = vmul.f32 0.5, %v9089_v32  ;;  %3170 = vmatpush1.msra.mxu0 %v2835_v11  ;;  %v9097_v31 = vld [vmem:[#allocation6_spill] sm:$0xff]  ;;  %v9101_v11 = vld [vmem:[#allocation101_spill] sm:$0xff] }
 0x1ce   : > { %3135 = vmatpush2.msra.mxu1 %v6721_v62  ;;  %9088 = vst [vmem:[#allocation97_spill] sm:$0xff] %v6900_v20  ;;  %v2476_v60 = vmul.f32 0.5, %v2156_v10  ;;  %v2816_v7 = vmul.f32 %v2496_v18, %v6397_v23  ;;  %4839 = vtanh.f32 %v1478_v26  ;;  %v1498_v62 = vmul.f32 0.5, %v6481_v56  ;;  %3171 = vmatprep.subr.mxu0 %v2826_v3  ;;  %v9100_v26 = vld [vmem:[#allocation68_spill] sm:$0xff]  ;;  %v9144_v20 = vld [vmem:[#allocation55_spill] sm:$0xff] }
 0x1cf   : > { %3136 = vmatprep.subr.mxu1 %v6703_v5  ;;  %v6910_v59 = vpop.f32.mrf.mxu0  ;;  %v6912_v44 = vpop.eup %4825  ;;  %v2475_v12 = vmul.f32 0.5, %v6857_v17  ;;  %v2815_v5 = vmul.f32 %v2495_v49, %v6388_v35  ;;  %4841 = vtanh.f32 %v1487_v34  ;;  %v1507_v42 = vmul.f32 0.5, %v6494_v63  ;;  %3172 = vmatpush1.msra.mxu0 %v2825_v29  ;;  %v9103_v3 = vld [vmem:[#allocation24_spill] sm:$0xff] }
 0x1d0   : > { %3137 = vmatpush2.msra.mxu1 %v6674_v50  ;;  %9091 = vst [vmem:[#allocation65_spill] sm:$0xff] %v6910_v59  ;;  %v6918_v23 = vpop.eup %4827  ;;  %v2466_v4 = vmul.f32 0.5, %v6854_v47  ;;  %v2806_v50 = vmul.f32 %v2486_v6, %v9042_v14  ;;  %4843 = vtanh.f32 %v1488_v39  ;;  %v1508_v28 = vmul.f32 0.5, %v6508_v0  ;;  %3173 = vmatprep.subr.mxu0 %v2816_v7  ;;  %v6930_v47 = vpop.f32.mrf.mxu1  ;;  %v9102_v6 = vld [vmem:[#allocation99_spill] sm:$0xff] }
 0x1d1   : > { %3138 = vmatprep.subr.mxu1 %v6658_v21  ;;  %v6924_v17 = vpop.f32.mrf.mxu0  ;;  %v2465_v35 = vmul.f32 0.5, %v6848_v41  ;;  %v2805_v10 = vmul.f32 %v2485_v25, %v9045_v43  ;;  %4845 = vtanh.f32 %v1497_v27  ;;  %v9093_v21 = vld [vmem:[#allocation46_spill] sm:$0xff]  ;;  %3174 = vmatpush1.msra.mxu0 %v2815_v5  ;;  %9095 = vst [vmem:[#allocation57_spill] sm:$0xff] %v6930_v47  ;;  %v2456_v52 = vmul.f32 0.5, %v6836_v45  ;;  %v9098_v41 = vld [vmem:[#allocation100_spill] sm:$0xff]  ;;  %v9104_v25 = vld [vmem:[#allocation107_spill] sm:$0xff] }
 0x1d2   : > { %3139 = vmatpush2.msra.mxu1 %v6629_v2  ;;  %9092 = vst [vmem:[#allocation34_spill] sm:$0xff] %v6924_v17  ;;  %v1517_v38 = vmul.f32 0.5, %v9093_v21  ;;  %v6932_v14 = vpop.eup %4829  ;;  %v9096_v2 = vld [vmem:[#allocation71_spill] sm:$0xff]  ;;  %4847 = vtanh.f32 %v1498_v62  ;;  %v1518_v18 = vmul.f32 0.5, %v9097_v31  ;;  %3175 = vmatprep.subr.mxu0 %v2806_v50  ;;  %v2455_v15 = vmul.f32 0.5, %v6830_v46  ;;  %v9142_v17 = vld [vmem:[#allocation85_spill] sm:$0xff] }
 0x1d3   : > { %3140 = vmatprep.subr.mxu1 %v9094_v40  ;;  %v2796_v51 = vmul.f32 %v2476_v60, %v9096_v2  ;;  %v6938_v43 = vpop.f32.mrf.mxu0  ;;  %v2795_v49 = vmul.f32 %v2475_v12, %v9100_v26  ;;  %4849 = vtanh.f32 %v1507_v42  ;;  %v1548_v34 = vmul.f32 0.5, %v9101_v11  ;;  %3176 = vmatpush1.msra.mxu0 %v2805_v10  ;;  %v9105_v27 = vld [vmem:[#allocation35_spill] sm:$0xff]  ;;  %v9108_v12 = vld [vmem:[#allocation109_spill] sm:$0xff]  ;;  %v9112_v10 = vld [vmem:[#allocation104_spill] sm:$0xff] }
 0x1d4   : > { %3141 = vmatpush2.msra.mxu1 %v9098_v41  ;;  %9099 = vst [vmem:[#allocation62_spill] sm:$0xff] %v6938_v43  ;;  %v2446_v45 = vmul.f32 0.5, %v6822_v8  ;;  %v2786_v39 = vmul.f32 %v2466_v4, %v9103_v3  ;;  %4851 = vtanh.f32 %v1508_v28  ;;  %v1567_v29 = vmul.f32 0.5, %v9104_v25  ;;  %v9107_v46 = vld [vmem:[#allocation83_spill] sm:$0xff]  ;;  %v6954_v8 = vpop.f32.mrf.mxu1  ;;  %v9111_v4 = vld [vmem:[#allocation82_spill] sm:$0xff]  ;;  %v9113_v2 = vld [vmem:[#allocation56_spill] sm:$0xff] }
 0x1d5   : > { %3142 = vmatprep.subr.mxu1 %v9102_v6  ;;  %3177 = vmatprep.subr.mxu0 %v2796_v51  ;;  %v6948_v60 = vpop.f32.mrf.mxu0  ;;  %v2785_v7 = vmul.f32 %v2465_v35, %v9107_v46  ;;  %v2067_v62 = vadd.f32 1.0, %v6868_v53  ;;  %4853 = vtanh.f32 %v1517_v38  ;;  %v1568_v5 = vmul.f32 0.5, %v9108_v12  ;;  %v9109_v42 = vld [vmem:[#allocation75_spill] sm:$0xff]  ;;  %9110 = vst [vmem:[#allocation105_spill] sm:$0xff] %v6954_v8  ;;  %v9115_v38 = vld [vmem:[#allocation74_spill] sm:$0xff]  ;;  %v9118_v6 = vld [vmem:[#allocation60_spill] sm:$0xff] }
 0x1d6   : > { %3143 = vmatpush2.msra.mxu1 %v9105_v27  ;;  %9106 = vst [vmem:[#allocation46_spill] sm:$0xff] %v6948_v60  ;;  %3178 = vmatpush1.msra.mxu0 %v2795_v49  ;;  %v2776_v50 = vmul.f32 %v2456_v52, %v9111_v4  ;;  %v2068_v28 = vadd.f32 1.0, %v6873_v55  ;;  %4855 = vtanh.f32 %v1518_v18  ;;  %v1558_v40 = vmul.f32 0.5, %v9112_v10  ;;  %v9116_v41 = vld [vmem:[#allocation39_spill] sm:$0xff]  ;;  %v9117_v49 = vld [vmem:[#allocation88_spill] sm:$0xff]  ;;  %v9119_v18 = vld [vmem:[#allocation45_spill] sm:$0xff] }
 0x1d7   : > { %3144 = vmatprep.subr.mxu1 %v9109_v42  ;;  %3179 = vmatprep.subr.mxu0 %v2786_v39  ;;  %v6960_v35 = vpop.f32.mrf.mxu0  ;;  %v6962_v53 = vpop.eup %4831  ;;  %v2756_v51 = vmul.f32 %v6811_v19, %v9115_v38  ;;  %v2775_v26 = vmul.f32 %v2455_v15, %v9116_v41  ;;  %4857 = vtanh.f32 %v1548_v34  ;;  %v1577_v52 = vmul.f32 0.5, %v9117_v49  ;;  %v9120_v27 = vld [vmem:[#allocation103_spill] sm:$0xff]  ;;  %v9121_v42 = vld [vmem:[#allocation12_spill] sm:$0xff] }
 0x1d8   : > { %3145 = vmatpush2.msra.mxu1 %v9113_v2  ;;  %9114 = vst [vmem:[#allocation71_spill] sm:$0xff] %v6960_v35  ;;  %3180 = vmatpush1.msra.mxu0 %v2785_v7  ;;  %v6969_v55 = vpop.eup %4833  ;;  %v2766_v3 = vmul.f32 %v2446_v45, %v9119_v18  ;;  %v2077_v39 = vadd.f32 1.0, %v6885_v48  ;;  %v1557_v46 = vmul.f32 0.5, %v9120_v27  ;;  %4859 = vtanh.f32 %v1567_v29  ;;  %v9123_v34 = vld [vmem:[#allocation51_spill] sm:$0xff]  ;;  %v9124_v2 = vld [vmem:[#allocation86_spill] sm:$0xff]  ;;  %v6984_v48 = vpop.f32.mrf.mxu1 }
 0x1d9   : > { %3146 = vmatprep.subr.mxu1 %v9118_v6  ;;  %3181 = vmatprep.subr.mxu0 %v2776_v50  ;;  %v6975_v19 = vpop.f32.mrf.mxu0  ;;  %v6977_v15 = vpop.eup %4835  ;;  %v2765_v4 = vmul.f32 %v6819_v61, %v9123_v34  ;;  %v2078_v7 = vadd.f32 1.0, %v6895_v33  ;;  %4861 = vtanh.f32 %v1568_v5  ;;  %v1578_v45 = vmul.f32 0.5, %v9124_v2  ;;  %v9125_v38 = vld [vmem:[#allocation23_spill] sm:$0xff]  ;;  %9126 = vst [vmem:[#allocation100_spill] sm:$0xff] %v6984_v48  ;;  %v9127_v6 = vld [vmem:[#allocation9_spill] sm:$0xff]  ;;  %v9131_v35 = vld [vmem:[#allocation50_spill] sm:$0xff] }
 0x1da   : > { %3147 = vmatpush2.msra.mxu1 %v9121_v42  ;;  %9122 = vst [vmem:[#allocation6_spill] sm:$0xff] %v6975_v19  ;;  %3182 = vmatpush1.msra.mxu0 %v2775_v26  ;;  %v6986_v29 = vpop.eup %4837  ;;  %v2387_v50 = vmul.f32 0.5, %v2067_v62  ;;  %v2388_v41 = vmul.f32 0.5, %v2068_v28  ;;  %v1547_v18 = vmul.f32 0.5, %v9127_v6  ;;  %4863 = vtanh.f32 %v1558_v40  ;;  %v9128_v42 = vld [vmem:[#allocation29_spill] sm:$0xff]  ;;  %v9135_v19 = vld [vmem:[#allocation30_spill] sm:$0xff] }
 0x1db   : > { %3148 = vmatprep.subr.mxu1 %v9125_v38  ;;  %3183 = vmatprep.subr.mxu0 %v2766_v3  ;;  %v6990_v61 = vpop.f32.mrf.mxu0  ;;  %v6992_v33 = vpop.eup %4839  ;;  %v2087_v5 = vadd.f32 1.0, %v6912_v44  ;;  %v2088_v26 = vadd.f32 1.0, %v6918_v23  ;;  %v9130_v34 = vld [vmem:[#allocation37_spill] sm:$0xff]  ;;  %4865 = vtanh.f32 %v1577_v52  ;;  %v2397_v28 = vmul.f32 0.5, %v2077_v39  ;;  %v9132_v3 = vld [vmem:[#allocation10_spill] sm:$0xff]  ;;  %v9136_v52 = vld [vmem:[#allocation92_spill] sm:$0xff] }
 0x1dc   : > { %3149 = vmatpush2.msra.mxu1 %v9128_v42  ;;  %9129 = vst [vmem:[#allocation68_spill] sm:$0xff] %v6990_v61  ;;  %v1538_v38 = vmul.f32 0.5, %v9130_v34  ;;  %3184 = vmatpush1.msra.mxu0 %v2765_v4  ;;  %v6998_v62 = vpop.eup %4841  ;;  %v2097_v40 = vadd.f32 1.0, %v6932_v14  ;;  %v1537_v42 = vmul.f32 0.5, %v9132_v3  ;;  %4867 = vtanh.f32 %v1557_v46  ;;  %v9133_v61 = vld [vmem:[#allocation14_spill] sm:$0xff]  ;;  %v9137_v4 = vld [vmem:[#allocation77_spill] sm:$0xff]  ;;  %v7012_v14 = vpop.f32.mrf.mxu1 }
 0x1dd   : > { %3150 = vmatprep.subr.mxu1 %v9131_v35  ;;  %3185 = vmatprep.subr.mxu0 %v2756_v51  ;;  %v7003_v44 = vpop.f32.mrf.mxu0  ;;  %v7005_v23 = vpop.eup %4843  ;;  %v2745_v60 = vmul.f32 %v9136_v52, %v9135_v19  ;;  %v2398_v35 = vmul.f32 0.5, %v2078_v7  ;;  %v1528_v43 = vmul.f32 0.5, %v9137_v4  ;;  %4869 = vtanh.f32 %v1578_v45  ;;  %v9138_v39 = vld [vmem:[#allocation48_spill] sm:$0xff]  ;;  %9139 = vst [vmem:[#allocation99_spill] sm:$0xff] %v7012_v14  ;;  %v9145_v7 = vld [vmem:[#allocation27_spill] sm:$0xff]  ;;  %v9146_v45 = vld [vmem:[#allocation54_spill] sm:$0xff] }
 0x1de   : > { %3151 = vmatpush2.msra.mxu1 %v9133_v61  ;;  %9134 = vst [vmem:[#allocation101_spill] sm:$0xff] %v7003_v44  ;;  %3186 = vmatpush1.msra.mxu0 %v6806_v16  ;;  %v7014_v46 = vpop.eup %4845  ;;  %v9140_v51 = vld [vmem:[#allocation52_spill] sm:$0xff]  ;;  %v7019_v59 = vmul.f32 %v2387_v50, %v9142_v17  ;;  %v1527_v19 = vmul.f32 0.5, %v9144_v20  ;;  %4871 = vtanh.f32 %v1547_v18  ;;  %v2407_v14 = vmul.f32 0.5, %v2087_v5  ;;  %v9151_v50 = vld [vmem:[#allocation90_spill] sm:$0xff] }
 0x1df   : > { %3152 = vmatprep.subr.mxu1 %v9138_v39  ;;  %v9141_v61 = vld [vmem:[#allocation28_spill] sm:$0xff]  ;;  %3187 = vmatprep.subr.mxu0 %v9146_v45  ;;  %v7024_v52 = vpop.f32.mrf.mxu0  ;;  %v7026_v16 = vpop.eup %4847  ;;  %v9148_v39 = vld [vmem:[#allocation7_spill] sm:$0xff]  ;;  %v2408_v48 = vmul.f32 0.5, %v2088_v26  ;;  %4873 = vtanh.f32 %v1538_v38  ;;  %v7035_v18 = vmul.f32 %v2397_v28, %v9151_v50  ;;  %v9159_v28 = vld [vmem:[#allocation21_spill] sm:$0xff]  ;;  %v2108_v50 = vadd.f32 1.0, %v6977_v15 }
 0x1e0   : > { %v2736_v44 = vmul.f32 %v9141_v61, %v9140_v51  ;;  %9143 = vst [vmem:[#allocation24_spill] sm:$0xff] %v7019_v59  ;;  %3153 = vmatpush2.msra.mxu1 %v9145_v7  ;;  %9147 = vst [vmem:[#allocation107_spill] sm:$0xff] %v7024_v52  ;;  %v7029_v57 = vmul.f32 %v2388_v41, %v9148_v39  ;;  %v9150_v51 = vld [vmem:[#allocation58_spill] sm:$0xff]  ;;  %3188 = vmatpush1.msra.mxu0 %v2745_v60  ;;  %v7032_v17 = vpop.eup %4849  ;;  %v2417_v61 = vmul.f32 0.5, %v2097_v40  ;;  %v9153_v7 = vld [vmem:[#allocation19_spill] sm:$0xff]  ;;  %v9171_v37 = vmov 1.0  }
 0x1e1   : > { %3154 = vmatprep.subr.mxu1 %v9150_v51  ;;  %9152 = vst [vmem:[#allocation83_spill] sm:$0xff] %v7035_v18  ;;  %v1585_v45 = vmul.f32 0.5, %v9153_v7  ;;  %4875 = vtanh.f32 %v1537_v42  ;;  %v9154_v52 = vld [vmem:[#allocation38_spill] sm:$0xff]  ;;  %v7039_v41 = vpop.f32.mrf.mxu0  ;;  %v7041_v5 = vpop.eup %4851  ;;  %v9156_v26 = vld [vmem:[#allocation91_spill] sm:$0xff]  ;;  %v2098_v60 = vadd.f32 1.0, %v6962_v53  ;;  %v9158_v39 = vld [vmem:[#allocation13_spill] sm:$0xff] }
 0x1e2   : > { %9149 = vst [vmem:[#allocation35_spill] sm:$0xff] %v7029_v57  ;;  %3155 = vmatpush2.msra.mxu1 %v9154_v52  ;;  %3189 = vmatprep.subr.mxu0 %v2736_v44  ;;  %9155 = vst [vmem:[#allocation109_spill] sm:$0xff] %v7039_v41  ;;  %v7044_v38 = vmul.f32 %v2398_v35, %v9156_v26  ;;  %v1586_v51 = vmul.f32 0.5, %v9158_v39  ;;  %4877 = vtanh.f32 %v1528_v43  ;;  %v9160_v40 = vld [vmem:[#allocation40_spill] sm:$0xff]  ;;  %v7050_v42 = vpop.f32.mrf.mxu1  ;;  %v7052_v52 = vpop.eup %4853  ;;  %v2107_v44 = vadd.f32 1.0, %v6969_v55  ;;  %v9162_v41 = vld [vmem:[#allocation31_spill] sm:$0xff] }
 0x1e3   : > { %3156 = vmatprep.subr.mxu1 %v9159_v28  ;;  %3190 = vmatpush1.msra.mxu0 %v9160_v40  ;;  %9161 = vst [vmem:[#allocation82_spill] sm:$0xff] %v7050_v42  ;;  %v1595_v35 = vmul.f32 0.5, %v9162_v41  ;;  %4879 = vtanh.f32 %v1527_v19  ;;  %v9163_v26 = vld [vmem:[#allocation66_spill] sm:$0xff]  ;;  %v9164_v53 = vld [vmem:[#allocation112_spill] sm:$0xff]  ;;  %v7059_v43 = vpop.f32.mrf.mxu0  ;;  %v7061_v28 = vpop.eup %4855  ;;  %v9166_v40 = vld [vmem:[#allocation93_spill] sm:$0xff]  ;;  %v2117_v55 = vadd.f32 1.0, %v6986_v29 }
 0x1e4   : > { %9157 = vst [vmem:[#allocation75_spill] sm:$0xff] %v7044_v38  ;;  %3157 = vmatpush2.msra.mxu1 %v9163_v26  ;;  %3191 = vmatprep.subr.mxu0 %v9164_v53  ;;  %9165 = vst [vmem:[#allocation104_spill] sm:$0xff] %v7059_v43  ;;  %v7064_v8 = vmul.f32 %v2407_v14, %v9166_v40  ;;  %v9168_v42 = vld [vmem:[#allocation8_spill] sm:$0xff]  ;;  %v9170_v15 = vld [vmem:[#allocation59_spill] sm:$0xff]  ;;  %v4858_v26 = vpop.eup %4857  ;;  %v2127_v43 = vadd.f32 1.0, %v6998_v62  ;;  %4881 = vtanh.f32 %v1585_v45  ;;  %v7087_v62 = vpop.f32.mrf.mxu1  ;;  %v7089_v38 = vmul.f32 0.5, %v2107_v44 }
 0x1e5   : > { %v7067_v47 = vmul.f32 %v2408_v48, %v9168_v42  ;;  %v1596_v58 = vmul.f32 0.5, %v9170_v15  ;;  %3159 = vmatmul.mubr.f32.vlgmr.msra.gmra.mxu1 %v9171_v37  ;;  %v9172_v19 = vld [vmem:[#allocation111_spill] sm:$0xff]  ;;  %v9173_v53 = vld [vmem:[#allocation76_spill] sm:$0xff]  ;;  %v9175_v14 = vld [vmem:[#allocation18_spill] sm:$0xff]  ;;  %v7079_v48 = vpop.f32.mrf.mxu0  ;;  %v4860_v29 = vpop.eup %4859  ;;  %v7082_v42 = vmul.f32 0.5, %v2098_v60  ;;  %4883 = vtanh.f32 %v1586_v51  ;;  %9181 = vst [vmem:[#allocation45_spill] sm:$0xff] %v7087_v62 }
 0x1e6   : > { %9167 = vst [vmem:[#allocation56_spill] sm:$0xff] %v7064_v8  ;;  %3192 = vmatpush1.msra.mxu0 %v9172_v19  ;;  %v7074_v59 = vmul.f32 %v2417_v61, %v9173_v53  ;;  %v1605_v40 = vmul.f32 0.5, %v9175_v14  ;;  %v9176_v57 = vld [vmem:[#allocation110_spill] sm:$0xff]  ;;  %9177 = vst [vmem:[#allocation88_spill] sm:$0xff] %v7079_v48  ;;  %3300 = vmatprep.mubr.f32.mxu1 %v9171_v37  ;;  %v2128_v19 = vadd.f32 1.0, %v7005_v23  ;;  %v9179_v18 = vld [vmem:[#allocation63_spill] sm:$0xff]  ;;  %v4862_v45 = vpop.eup %4861  ;;  %4885 = vtanh.f32 %v1595_v35 }
 0x1e7   : > { %9169 = vst [vmem:[#allocation74_spill] sm:$0xff] %v7067_v47  ;;  %3193 = vmatprep.subr.mxu0 %v9176_v57  ;;  %9178 = vst [vmem:[#allocation60_spill] sm:$0xff] %v7082_v42  ;;  %v1606_v61 = vmul.f32 0.5, %v9179_v18  ;;  %v9180_v53 = vld [vmem:[#allocation108_spill] sm:$0xff]  ;;  %v7091_v57 = vmul.f32 0.5, %v2108_v50  ;;  %v9183_v48 = vld [vmem:[#allocation73_spill] sm:$0xff]  ;;  %v7095_v60 = vpop.f32.mrf.mxu0  ;;  %v4864_v23 = vpop.eup %4863  ;;  %4887 = vtanh.f32 %v1596_v58 }
 0x1e8   : > { %9174 = vst [vmem:[#allocation39_spill] sm:$0xff] %v7074_v59  ;;  %3194 = vmatpush1.msra.mxu0 %v9180_v53  ;;  %9182 = vst [vmem:[#allocation103_spill] sm:$0xff] %v7089_v38  ;;  %v1615_v37 = vmul.f32 0.5, %v9183_v48  ;;  %v9184_v8 = vld [vmem:[#allocation106_spill] sm:$0xff]  ;;  %v7097_v51 = vmul.f32 0.5, %v2117_v55  ;;  %v7100_v47 = vadd.f32 1.0, %v6992_v33  ;;  %v4866_v44 = vpop.eup %4865  ;;  %4889 = vtanh.f32 %v1605_v40  ;;  %v7113_v33 = vpop.f32.mrf.mxu1 }
 0x1e9   : > { %3195 = vmatprep.subr.mxu0 %v9184_v8  ;;  %9185 = vst [vmem:[#allocation12_spill] sm:$0xff] %v7095_v60  ;;  %v2208_v53 = vadd.f32 1.0, %v4862_v45  ;;  %v9187_v62 = vld [vmem:[#allocation102_spill] sm:$0xff]  ;;  %v7103_v50 = vmul.f32 0.5, %v2127_v43  ;;  %v9188_v35 = vld [vmem:[#allocation44_spill] sm:$0xff]  ;;  %v2207_v18 = vadd.f32 1.0, %v4860_v29  ;;  %v7106_v8 = vpop.f32.mrf.mxu0  ;;  %v4868_v60 = vpop.eup %4867  ;;  %4891 = vtanh.f32 %v1606_v61 }
 0x1ea   : > { %9186 = vst [vmem:[#allocation51_spill] sm:$0xff] %v7097_v51  ;;  %3196 = vmatpush1.msra.mxu0 %v9187_v62  ;;  %v1616_v48 = vmul.f32 0.5, %v9188_v35  ;;  %9189 = vst [vmem:[#allocation86_spill] sm:$0xff] %v7106_v8  ;;  %v7108_v59 = vmul.f32 0.5, %v2128_v19  ;;  %v7111_v55 = vadd.f32 1.0, %v7014_v46  ;;  %v2217_v58 = vadd.f32 1.0, %v4866_v44  ;;  %v4870_v62 = vpop.eup %4869 }
 0x1eb   : > { %9190 = vst [vmem:[#allocation23_spill] sm:$0xff] %v7113_v33  ;;  %v7116_v43 = vadd.f32 1.0, %v7026_v16  ;;  %v7119_v40 = vadd.f32 1.0, %v7032_v17  ;;  %v7122_v29 = vadd.f32 1.0, %v7041_v5  ;;  %4893 = vtanh.f32 %v1615_v37  ;;  %v7124_v19 = vpop.f32.mrf.mxu0  ;;  %v4872_v45 = vpop.eup %4871  ;;  %v9193_v37 = vld [vmem:[#allocation33_spill] sm:$0xff] }
 0x1ec   : > { %9191 = vst [vmem:[#allocation9_spill] sm:$0xff] %v7124_v19  ;;  %v2198_v46 = vadd.f32 1.0, %v4864_v23  ;;  %v2528_v8 = vmul.f32 0.5, %v2208_v53  ;;  %v2537_v61 = vmul.f32 0.5, %v2217_v58  ;;  %v2218_v44 = vadd.f32 1.0, %v4870_v62  ;;  %v4874_v35 = vpop.eup %4873  ;;  %v7133_v23 = vpop.f32.mrf.mxu1  ;;  %v9195_v62 = vld [vmem:[#allocation72_spill] sm:$0xff] }
 0x1ed   : > { %v7127_v33 = vadd.f32 1.0, %v7052_v52  ;;  %4895 = vtanh.f32 %v1616_v48  ;;  %v2197_v16 = vadd.f32 1.0, %v4868_v60  ;;  %v2527_v14 = vmul.f32 0.5, %v2207_v18  ;;  %v7129_v17 = vpop.f32.mrf.mxu0  ;;  %9194 = vst [vmem:[#allocation37_spill] sm:$0xff] %v7133_v23  ;;  %v9196_v52 = vld [vmem:[#allocation70_spill] sm:$0xff]  ;;  %v9198_v23 = vld [vmem:[#allocation43_spill] sm:$0xff] }
 0x1ee   : > { %9192 = vst [vmem:[#allocation29_spill] sm:$0xff] %v7129_v17  ;;  %v4876_v15 = vpop.eup %4875  ;;  %v2158_v5 = vadd.f32 1.0, %v7061_v28  ;;  %v1625_v41 = vmul.f32 0.5, %v9193_v37  ;;  %v2188_v19 = vadd.f32 1.0, %v4858_v26  ;;  %v2538_v39 = vmul.f32 0.5, %v2218_v44 }
 0x1ef   : > { %v4878_v53 = vpop.eup %4877  ;;  %v2187_v58 = vadd.f32 1.0, %v4872_v45  ;;  %v1626_v7 = vmul.f32 0.5, %v9195_v62  ;;  %v1635_v42 = vmul.f32 0.5, %v9196_v52  ;;  %v2857_v48 = vmul.f32 %v2537_v61, %v9117_v49  ;;  %v7138_v18 = vpop.f32.mrf.mxu0 }
 0x1f0   : > { %9197 = vst [vmem:[#allocation50_spill] sm:$0xff] %v7138_v18  ;;  %v4880_v60 = vpop.eup %4879  ;;  %v2178_v17 = vadd.f32 1.0, %v4874_v35  ;;  %v2518_v38 = vmul.f32 0.5, %v2198_v46  ;;  %v2848_v28 = vmul.f32 %v2528_v8, %v9108_v12  ;;  %v2858_v26 = vmul.f32 %v2538_v39, %v9124_v2  ;;  %v9200_v18 = vld [vmem:[#allocation36_spill] sm:$0xff]  ;;  %v7149_v46 = vpop.f32.mrf.mxu1 }
 0x1f1   : > { %v2177_v44 = vadd.f32 1.0, %v4876_v15  ;;  %v2517_v37 = vmul.f32 0.5, %v2197_v16  ;;  %v1636_v51 = vmul.f32 0.5, %v9198_v23  ;;  %v2847_v45 = vmul.f32 %v2527_v14, %v9104_v25  ;;  %v7144_v62 = vpop.f32.mrf.mxu0  ;;  %v7146_v52 = vpop.eup %4881  ;;  %v9201_v15 = vld [vmem:[#allocation20_spill] sm:$0xff] }
 0x1f2   : > { %9199 = vst [vmem:[#allocation10_spill] sm:$0xff] %v7144_v62  ;;  %v2168_v49 = vadd.f32 1.0, %v4878_v53  ;;  %4897 = vtanh.f32 %v1625_v41  ;;  %v2508_v61 = vmul.f32 0.5, %v2188_v19  ;;  %v1645_v35 = vmul.f32 0.5, %v9200_v18  ;;  %3236 = vmatprep.subr.mxu1 %v2858_v26  ;;  %v7151_v12 = vpop.eup %4883  ;;  %v9203_v19 = vld [vmem:[#allocation89_spill] sm:$0xff] }
 0x1f3   : > { %v2167_v2 = vadd.f32 1.0, %v4880_v60  ;;  %v2507_v39 = vmul.f32 0.5, %v2187_v58  ;;  %4899 = vtanh.f32 %v1626_v7  ;;  %v1646_v8 = vmul.f32 0.5, %v9201_v15  ;;  %3237 = vmatpush1.msra.mxu1 %v2857_v48  ;;  %v7154_v25 = vpop.f32.mrf.mxu0  ;;  %v7156_v14 = vpop.eup %4885  ;;  %v9204_v7 = vld [vmem:[#allocation87_spill] sm:$0xff] }
 0x1f4   : > { %9202 = vst [vmem:[#allocation14_spill] sm:$0xff] %v7154_v25  ;;  %v2498_v16 = vmul.f32 0.5, %v2178_v17  ;;  %4901 = vtanh.f32 %v1635_v42  ;;  %v2838_v41 = vmul.f32 %v2518_v38, %v9112_v10  ;;  %v1655_v53 = vmul.f32 0.5, %v9203_v19  ;;  %3238 = vmatprep.subr.mxu1 %v2848_v28  ;;  %v7160_v26 = vpop.eup %4887  ;;  %v9206_v10 = vld [vmem:[#allocation84_spill] sm:$0xff]  ;;  %v7170_v28 = vpop.f32.mrf.mxu1 }
 0x1f5   : > { %v2497_v62 = vmul.f32 0.5, %v2177_v44  ;;  %v2837_v58 = vmul.f32 %v2517_v37, %v9120_v27  ;;  %4903 = vtanh.f32 %v1636_v51  ;;  %v1656_v60 = vmul.f32 0.5, %v9204_v7  ;;  %3239 = vmatpush1.msra.mxu1 %v2847_v45  ;;  %v7164_v48 = vpop.f32.mrf.mxu0  ;;  %v7166_v25 = vpop.eup %4889  ;;  %v9207_v37 = vld [vmem:[#allocation41_spill] sm:$0xff] }
 0x1f6   : > { %9205 = vst [vmem:[#allocation30_spill] sm:$0xff] %v7164_v48  ;;  %v2488_v17 = vmul.f32 0.5, %v2168_v49  ;;  %v2828_v42 = vmul.f32 %v2508_v61, %v9101_v11  ;;  %4905 = vtanh.f32 %v1645_v35  ;;  %v1665_v38 = vmul.f32 0.5, %v9206_v10  ;;  %3240 = vmatprep.subr.mxu1 %v2838_v41  ;;  %v7172_v44 = vpop.eup %4891  ;;  %v9209_v35 = vld [vmem:[#allocation80_spill] sm:$0xff] }
 0x1f7   : > { %v2487_v27 = vmul.f32 0.5, %v2167_v2  ;;  %v2827_v51 = vmul.f32 %v2507_v39, %v9127_v6  ;;  %4907 = vtanh.f32 %v1646_v8  ;;  %v1666_v45 = vmul.f32 0.5, %v9207_v37  ;;  %3241 = vmatpush1.msra.mxu1 %v2837_v58  ;;  %v7176_v48 = vpop.f32.mrf.mxu0  ;;  %v9210_v6 = vld [vmem:[#allocation79_spill] sm:$0xff] }
 0x1f8   : > { %9208 = vst [vmem:[#allocation92_spill] sm:$0xff] %v7176_v48  ;;  %v7178_v49 = vpop.eup %4893  ;;  %v2478_v11 = vmul.f32 0.5, %v2158_v5  ;;  %v2818_v61 = vmul.f32 %v2498_v16, %v9130_v34  ;;  %4909 = vtanh.f32 %v1655_v53  ;;  %v1675_v41 = vmul.f32 0.5, %v9209_v35  ;;  %3242 = vmatprep.subr.mxu1 %v2828_v42  ;;  %v9212_v16 = vld [vmem:[#allocation42_spill] sm:$0xff]  ;;  %v7192_v42 = vpop.f32.mrf.mxu1 }
 0x1f9   : > { %v2477_v23 = vmul.f32 0.5, %v7127_v33  ;;  %v2817_v2 = vmul.f32 %v2497_v62, %v9132_v3  ;;  %4911 = vtanh.f32 %v1656_v60  ;;  %v1676_v39 = vmul.f32 0.5, %v9210_v6  ;;  %3243 = vmatpush1.msra.mxu1 %v2827_v51  ;;  %v7185_v8 = vpop.f32.mrf.mxu0  ;;  %9213 = vst [vmem:[#allocation48_spill] sm:$0xff] %v7192_v42  ;;  %v9214_v62 = vld [vmem:[#allocation15_spill] sm:$0xff] }
 0x1fa   : > { %9211 = vst [vmem:[#allocation77_spill] sm:$0xff] %v7185_v8  ;;  %v7187_v58 = vpop.eup %4895  ;;  %v2468_v5 = vmul.f32 0.5, %v7122_v29  ;;  %v2808_v34 = vmul.f32 %v2488_v17, %v9137_v4  ;;  %4913 = vtanh.f32 %v1665_v38  ;;  %v1685_v53 = vmul.f32 0.5, %v9212_v16  ;;  %3244 = vmatprep.subr.mxu1 %v2818_v61  ;;  %v9216_v17 = vld [vmem:[#allocation69_spill] sm:$0xff] }
 0x1fb   : > { %v2467_v3 = vmul.f32 0.5, %v7119_v40  ;;  %v2807_v33 = vmul.f32 %v2487_v27, %v9144_v20  ;;  %4915 = vtanh.f32 %v1666_v45  ;;  %v1706_v60 = vmul.f32 0.5, %v9214_v62  ;;  %3245 = vmatpush1.msra.mxu1 %v2817_v2  ;;  %v7197_v51 = vpop.f32.mrf.mxu0 }
 0x1fc   : > { %9215 = vst [vmem:[#allocation52_spill] sm:$0xff] %v7197_v51  ;;  %v2458_v29 = vmul.f32 0.5, %v7116_v43  ;;  %v2798_v4 = vmul.f32 %v2478_v11, %v9097_v31  ;;  %4917 = vtanh.f32 %v1675_v41  ;;  %v1716_v38 = vmul.f32 0.5, %v9216_v17  ;;  %3246 = vmatprep.subr.mxu1 %v2808_v34  ;;  %v9218_v31 = vld [vmem:[#allocation64_spill] sm:$0xff]  ;;  %v7210_v41 = vpop.f32.mrf.mxu1 }
 0x1fd   : > { %v2457_v61 = vmul.f32 0.5, %v7111_v55  ;;  %v2797_v40 = vmul.f32 %v2477_v23, %v9093_v21  ;;  %4919 = vtanh.f32 %v1676_v39  ;;  %v1726_v20 = vmul.f32 0.5, %v6859_v54  ;;  %3247 = vmatpush1.msra.mxu1 %v2807_v33  ;;  %v7205_v27 = vpop.f32.mrf.mxu0  ;;  %9219 = vst [vmem:[#allocation85_spill] sm:$0xff] %v7210_v41  ;;  %v9221_v34 = vld [vmem:[#allocation16_spill] sm:$0xff] }
 0x1fe   : > { %9217 = vst [vmem:[#allocation28_spill] sm:$0xff] %v7205_v27  ;;  %v2438_v45 = vmul.f32 0.5, %v7100_v47  ;;  %v2788_v43 = vmul.f32 %v2468_v5, %v6508_v0  ;;  %4921 = vtanh.f32 %v1685_v53  ;;  %v1725_v11 = vmul.f32 0.5, %v9218_v31  ;;  %3248 = vmatprep.subr.mxu1 %v2798_v4  ;;  %v7236_v4 = vpop.f32.mrf.mxu1  ;;  %v9252_v27 = vld [vmem:[#allocation63_spill] sm:$0xff] }
 0x1ff   : > { %v7212_v2 = vpop.eup %4897  ;;  %v2767_v21 = vmul.f32 %v7103_v50, %v9086_v24  ;;  %v2787_v55 = vmul.f32 %v2467_v3, %v6494_v63  ;;  %4923 = vtanh.f32 %v1706_v60  ;;  %v1735_v23 = vmul.f32 0.5, %v6866_v30  ;;  %3249 = vmatpush1.msra.mxu1 %v2797_v40  ;;  %v7218_v47 = vpop.f32.mrf.mxu0 }
 0x200   : > { %9220 = vst [vmem:[#allocation55_spill] sm:$0xff] %v7218_v47  ;;  %v4900_v0 = vpop.eup %4899  ;;  %v2768_v39 = vmul.f32 %v7108_v59, %v9087_v13  ;;  %v2778_v5 = vmul.f32 %v2458_v29, %v6481_v56  ;;  %v1715_v53 = vmul.f32 0.5, %v9221_v34  ;;  %4925 = vtanh.f32 %v1716_v38  ;;  %3250 = vmatprep.subr.mxu1 %v2788_v43  ;;  %v9223_v59 = vld [vmem:[#allocation17_spill] sm:$0xff] }
 0x201   : > { %v7224_v33 = vpop.eup %4901  ;;  %v2777_v63 = vmul.f32 %v2457_v61, %v9089_v32  ;;  %v2225_v24 = vadd.f32 1.0, %v7146_v52  ;;  %4927 = vtanh.f32 %v1726_v20  ;;  %v1736_v50 = vmul.f32 0.5, %v6878_v1  ;;  %3251 = vmatpush1.msra.mxu1 %v2787_v55  ;;  %v7229_v3 = vpop.f32.mrf.mxu0  ;;  %v9224_v61 = vld [vmem:[#allocation78_spill] sm:$0xff] }
 0x202   : > { %9222 = vst [vmem:[#allocation27_spill] sm:$0xff] %v7229_v3  ;;  %v7231_v60 = vpop.eup %4903  ;;  %v2226_v56 = vadd.f32 1.0, %v7151_v12  ;;  %v2235_v13 = vadd.f32 1.0, %v7156_v14  ;;  %v1705_v29 = vmul.f32 0.5, %v9223_v59  ;;  %4929 = vtanh.f32 %v1725_v11  ;;  %3252 = vmatprep.subr.mxu1 %v2778_v5  ;;  %v9226_v11 = vld [vmem:[#allocation26_spill] sm:$0xff] }
 0x203   : > { %v4906_v32 = vpop.eup %4905  ;;  %v2236_v52 = vadd.f32 1.0, %v7160_v26  ;;  %v2245_v38 = vadd.f32 1.0, %v7166_v25  ;;  %v1696_v40 = vmul.f32 0.5, %v9224_v61  ;;  %4931 = vtanh.f32 %v1735_v23  ;;  %3253 = vmatpush1.msra.mxu1 %v2777_v63  ;;  %v7241_v20 = vpop.f32.mrf.mxu0  ;;  %v9227_v26 = vld [vmem:[#allocation51_spill] sm:$0xff]  ;;  %v9228_v63 = vld [vmem:[#allocation94_spill] sm:$0xff] }
 0x204   : > { %9225 = vst [vmem:[#allocation54_spill] sm:$0xff] %v7241_v20  ;;  %v7243_v12 = vpop.eup %4907  ;;  %v2758_v14 = vmul.f32 %v2438_v45, %v9084_v36  ;;  %v2246_v43 = vadd.f32 1.0, %v7172_v44  ;;  %v1695_v55 = vmul.f32 0.5, %v9226_v11  ;;  %4933 = vtanh.f32 %v1715_v53  ;;  %3254 = vmatprep.subr.mxu1 %v2768_v39  ;;  %v7259_v39 = vpop.f32.mrf.mxu1  ;;  %v9247_v3 = vld [vmem:[#allocation18_spill] sm:$0xff] }
 0x205   : > { %v7248_v5 = vpop.eup %4909  ;;  %v2748_v25 = vmul.f32 %v7091_v57, %v9081_v9  ;;  %v2757_v23 = vmul.f32 %v9227_v26, %v9082_v22  ;;  %v1686_v48 = vmul.f32 0.5, %v9228_v63  ;;  %4935 = vtanh.f32 %v1736_v50  ;;  %3255 = vmatpush1.msra.mxu1 %v2767_v21  ;;  %v7255_v8 = vpop.f32.mrf.mxu0  ;;  %v9230_v9 = vld [vmem:[#allocation96_spill] sm:$0xff]  ;;  %v9231_v57 = vld [vmem:[#allocation103_spill] sm:$0xff] }
 0x206   : > { %9229 = vst [vmem:[#allocation7_spill] sm:$0xff] %v7255_v8  ;;  %v7257_v36 = vpop.eup %4911  ;;  %v2545_v44 = vmul.f32 0.5, %v2225_v24  ;;  %v2546_v45 = vmul.f32 0.5, %v2226_v56  ;;  %v2555_v53 = vmul.f32 0.5, %v2235_v13  ;;  %4937 = vtanh.f32 %v1705_v29  ;;  %3256 = vmatprep.subr.mxu1 %v2758_v14  ;;  %v9233_v24 = vld [vmem:[#allocation95_spill] sm:$0xff]  ;;  %v9234_v56 = vld [vmem:[#allocation60_spill] sm:$0xff] }
 0x207   : > { %v7261_v51 = vpop.eup %4913  ;;  %v2747_v22 = vmul.f32 %v9231_v57, %v9230_v9  ;;  %v2556_v26 = vmul.f32 0.5, %v2236_v52  ;;  %v2565_v20 = vmul.f32 0.5, %v2245_v38  ;;  %4939 = vtanh.f32 %v1696_v40  ;;  %3257 = vmatpush1.msra.mxu1 %v2757_v23  ;;  %v7265_v21 = vpop.f32.mrf.mxu0  ;;  %v9235_v38 = vld [vmem:[#allocation81_spill] sm:$0xff] }
 0x208   : > { %9232 = vst [vmem:[#allocation58_spill] sm:$0xff] %v7265_v21  ;;  %v7267_v50 = vpop.eup %4915  ;;  %v2738_v13 = vmul.f32 %v9234_v56, %v9233_v24  ;;  %v2566_v29 = vmul.f32 0.5, %v2246_v43  ;;  %v2255_v14 = vadd.f32 1.0, %v7178_v49  ;;  %4941 = vtanh.f32 %v1695_v55  ;;  %3258 = vmatprep.subr.mxu1 %v2748_v25  ;;  %v9237_v21 = vld [vmem:[#allocation19_spill] sm:$0xff]  ;;  %v9239_v43 = vld [vmem:[#allocation13_spill] sm:$0xff] }
 0x209   : > { %v7272_v8 = vpop.eup %4917  ;;  %v2265_v9 = vadd.f32 1.0, %v7212_v2  ;;  %v2266_v52 = vadd.f32 1.0, %v4900_v0  ;;  %v1587_v40 = vmul.f32 0.5, %v9235_v38  ;;  %4943 = vtanh.f32 %v1686_v48  ;;  %3259 = vmatpush1.msra.mxu1 %v2747_v22  ;;  %v7276_v23 = vpop.f32.mrf.mxu0  ;;  %v9241_v55 = vld [vmem:[#allocation31_spill] sm:$0xff]  ;;  %v9243_v56 = vld [vmem:[#allocation53_spill] sm:$0xff] }
 0x20a   : > { %9236 = vst [vmem:[#allocation90_spill] sm:$0xff] %v7276_v23  ;;  %v7278_v57 = vpop.eup %4919  ;;  %v7281_v24 = vmul.f32 %v2545_v44, %v9237_v21  ;;  %v7284_v49 = vmul.f32 %v2546_v45, %v9239_v43  ;;  %v7287_v25 = vmul.f32 %v2555_v53, %v9241_v55  ;;  %v1588_v2 = vmul.f32 0.5, %v9243_v56  ;;  %3260 = vmatprep.subr.mxu1 %v2738_v13  ;;  %v7290_v0 = vpop.f32.mrf.mxu1  ;;  %v9245_v22 = vld [vmem:[#allocation59_spill] sm:$0xff]  ;;  %v9249_v21 = vld [vmem:[#allocation32_spill] sm:$0xff] }
 0x20b   : > { %9244 = vst [vmem:[#allocation40_spill] sm:$0xff] %v7290_v0  ;;  %v7292_v48 = vpop.eup %4921  ;;  %v7295_v23 = vmul.f32 %v2556_v26, %v9245_v22  ;;  %v7298_v47 = vmul.f32 %v2565_v20, %v9247_v3  ;;  %v2285_v44 = vadd.f32 1.0, %v4906_v32  ;;  %v1597_v45 = vmul.f32 0.5, %v9249_v21  ;;  %v9250_v43 = vld [vmem:[#allocation39_spill] sm:$0xff]  ;;  %v7302_v53 = vpop.f32.mrf.mxu0  ;;  %v9257_v3 = vld [vmem:[#allocation74_spill] sm:$0xff] }
 0x20c   : > { %9238 = vst [vmem:[#allocation38_spill] sm:$0xff] %v7281_v24  ;;  %9240 = vst [vmem:[#allocation91_spill] sm:$0xff] %v7284_v49  ;;  %3261 = vmatpush1.msra.mxu1 %v9250_v43  ;;  %v4924_v55 = vpop.eup %4923  ;;  %v7305_v13 = vmul.f32 %v2566_v29, %v9252_v27  ;;  %v7307_v24 = vmul.f32 0.5, %v2255_v14  ;;  %v7310_v49 = vadd.f32 1.0, %v7187_v58  ;;  %v9256_v26 = vld [vmem:[#allocation47_spill] sm:$0xff]  ;;  %v7314_v20 = vmul.f32 0.5, %v2265_v9 }
 0x20d   : > { %9242 = vst [vmem:[#allocation21_spill] sm:$0xff] %v7287_v25  ;;  %9246 = vst [vmem:[#allocation66_spill] sm:$0xff] %v7295_v23  ;;  %v1598_v22 = vmul.f32 0.5, %v9256_v26  ;;  %3262 = vmatprep.subr.mxu1 %v9257_v3  ;;  %v4926_v32 = vpop.eup %4925  ;;  %v7316_v25 = vmul.f32 0.5, %v2266_v52  ;;  %4945 = vtanh.f32 %v1587_v40  ;;  %v9260_v43 = vld [vmem:[#allocation22_spill] sm:$0xff]  ;;  %v9261_v23 = vld [vmem:[#allocation56_spill] sm:$0xff]  ;;  %v7320_v27 = vpop.f32.mrf.mxu0 }
 0x20e   : > { %9248 = vst [vmem:[#allocation112_spill] sm:$0xff] %v7298_v47  ;;  %9251 = vst [vmem:[#allocation93_spill] sm:$0xff] %v7302_v53  ;;  %v1607_v53 = vmul.f32 0.5, %v9260_v43  ;;  %3263 = vmatpush1.msra.mxu1 %v9261_v23  ;;  %v4928_v29 = vpop.eup %4927  ;;  %v7323_v58 = vadd.f32 1.0, %v7224_v33  ;;  %v7326_v14 = vadd.f32 1.0, %v7231_v60  ;;  %4947 = vtanh.f32 %v1588_v2  ;;  %v9263_v3 = vld [vmem:[#allocation49_spill] sm:$0xff]  ;;  %v7330_v52 = vpop.f32.mrf.mxu1 }
 0x20f   : > { %9253 = vst [vmem:[#allocation8_spill] sm:$0xff] %v7305_v13  ;;  %9254 = vst [vmem:[#allocation111_spill] sm:$0xff] %v7307_v24  ;;  %v1608_v9 = vmul.f32 0.5, %v9263_v3  ;;  %v9264_v26 = vld [vmem:[#allocation75_spill] sm:$0xff]  ;;  %v4930_v40 = vpop.eup %4929  ;;  %v7332_v43 = vmul.f32 0.5, %v2285_v44  ;;  %v7335_v23 = vadd.f32 1.0, %v7243_v12  ;;  %4949 = vtanh.f32 %v1597_v45  ;;  %v7339_v60 = vpop.f32.mrf.mxu0 }
 0x210   : > { %9255 = vst [vmem:[#allocation76_spill] sm:$0xff] %v7310_v49  ;;  %9258 = vst [vmem:[#allocation110_spill] sm:$0xff] %v7314_v20  ;;  %3264 = vmatprep.subr.mxu1 %v9264_v26  ;;  %v9266_v47 = vld [vmem:[#allocation83_spill] sm:$0xff]  ;;  %v4932_v2 = vpop.eup %4931  ;;  %v7342_v3 = vadd.f32 1.0, %v7248_v5  ;;  %v7345_v26 = vadd.f32 1.0, %v7257_v36  ;;  %4951 = vtanh.f32 %v1598_v22  ;;  %v9268_v44 = vld [vmem:[#allocation61_spill] sm:$0xff] }
 0x211   : > { %9259 = vst [vmem:[#allocation108_spill] sm:$0xff] %v7316_v25  ;;  %9262 = vst [vmem:[#allocation106_spill] sm:$0xff] %v7320_v27  ;;  %v9265_v27 = vld [vmem:[#allocation67_spill] sm:$0xff]  ;;  %3265 = vmatpush1.msra.mxu1 %v9266_v47  ;;  %v1618_v13 = vmul.f32 0.5, %v9268_v44  ;;  %v4934_v12 = vpop.eup %4933  ;;  %v7350_v45 = vadd.f32 1.0, %v7261_v51  ;;  %4953 = vtanh.f32 %v1607_v53  ;;  %v2366_v47 = vadd.f32 1.0, %v4928_v29  ;;  %v7353_v56 = vpop.f32.mrf.mxu0 }
 0x212   : > { %v1617_v33 = vmul.f32 0.5, %v9265_v27  ;;  %9267 = vst [vmem:[#allocation102_spill] sm:$0xff] %v7339_v60  ;;  %v9269_v21 = vld [vmem:[#allocation35_spill] sm:$0xff]  ;;  %v2375_v27 = vadd.f32 1.0, %v4932_v2  ;;  %v9270_v60 = vld [vmem:[#allocation24_spill] sm:$0xff]  ;;  %9271 = vst [vmem:[#allocation36_spill] sm:$0xff] %v7353_v56  ;;  %v4936_v5 = vpop.eup %4935  ;;  %4955 = vtanh.f32 %v1608_v9 }
 0x213   : > { %3266 = vmatprep.subr.mxu1 %v9269_v21  ;;  %v7356_v36 = vadd.f32 1.0, %v7267_v50  ;;  %v9272_v22 = vld [vmem:[#allocation25_spill] sm:$0xff]  ;;  %v2365_v38 = vadd.f32 1.0, %v4930_v40  ;;  %v7359_v21 = vpop.f32.mrf.mxu1  ;;  %v4938_v20 = vpop.eup %4937  ;;  %v7362_v51 = vadd.f32 1.0, %v7272_v8  ;;  %v2356_v53 = vadd.f32 1.0, %v4926_v32 }
 0x214   : > { %3267 = vmatpush1.msra.mxu1 %v9270_v60  ;;  %v1627_v44 = vmul.f32 0.5, %v9272_v22  ;;  %9273 = vst [vmem:[#allocation89_spill] sm:$0xff] %v7359_v21  ;;  %4957 = vtanh.f32 %v1617_v33  ;;  %v2376_v29 = vadd.f32 1.0, %v4936_v5  ;;  %v7364_v60 = vpop.f32.mrf.mxu0  ;;  %v4940_v2 = vpop.eup %4939  ;;  %v7367_v56 = vadd.f32 1.0, %v7278_v57  ;;  %v9276_v5 = vld [vmem:[#allocation98_spill] sm:$0xff] }
 0x215   : > { %9274 = vst [vmem:[#allocation87_spill] sm:$0xff] %v7364_v60  ;;  %4959 = vtanh.f32 %v1618_v13  ;;  %v2355_v50 = vadd.f32 1.0, %v4934_v12  ;;  %v2695_v9 = vmul.f32 0.5, %v2375_v27  ;;  %v4942_v22 = vpop.eup %4941  ;;  %v2325_v40 = vadd.f32 1.0, %v7292_v48  ;;  %v7373_v24 = vpop.f32.mrf.mxu1  ;;  %v9277_v13 = vld [vmem:[#allocation57_spill] sm:$0xff] }
 0x216   : > { %v2346_v41 = vadd.f32 1.0, %v4924_v55  ;;  %v2686_v42 = vmul.f32 0.5, %v2366_v47  ;;  %v2696_v25 = vmul.f32 0.5, %v2376_v29  ;;  %v7370_v8 = vpop.f32.mrf.mxu0  ;;  %v4944_v33 = vpop.eup %4943  ;;  %v2345_v32 = vadd.f32 1.0, %v4938_v20  ;;  %v9279_v29 = vld [vmem:[#allocation105_spill] sm:$0xff] }
 0x217   : > { %9275 = vst [vmem:[#allocation84_spill] sm:$0xff] %v7370_v8  ;;  %4961 = vtanh.f32 %v1627_v44  ;;  %v1628_v60 = vmul.f32 0.5, %v9276_v5  ;;  %v2685_v49 = vmul.f32 0.5, %v2365_v38  ;;  %v2336_v57 = vadd.f32 1.0, %v4940_v2  ;;  %v9280_v5 = vld [vmem:[#allocation100_spill] sm:$0xff] }
 0x218   : > { %v1637_v12 = vmul.f32 0.5, %v9277_v13  ;;  %v2676_v27 = vmul.f32 0.5, %v2356_v53  ;;  %v3016_v0 = vmul.f32 %v2696_v25, %v6878_v1  ;;  %v7377_v48 = vpop.f32.mrf.mxu0  ;;  %v2335_v55 = vadd.f32 1.0, %v4942_v22  ;;  %v9282_v22 = vld [vmem:[#allocation99_spill] sm:$0xff] }
 0x219   : > { %9278 = vst [vmem:[#allocation41_spill] sm:$0xff] %v7377_v48  ;;  %v2675_v47 = vmul.f32 0.5, %v2355_v50  ;;  %v1638_v8 = vmul.f32 0.5, %v9279_v29  ;;  %v3015_v20 = vmul.f32 %v2695_v9, %v6866_v30  ;;  %v2326_v44 = vadd.f32 1.0, %v4944_v33  ;;  %v7389_v48 = vpop.f32.mrf.mxu1 }
 0x21a   : > { %v2666_v15 = vmul.f32 0.5, %v2346_v41  ;;  %v1647_v38 = vmul.f32 0.5, %v9280_v5  ;;  %v3006_v21 = vmul.f32 %v2686_v42, %v6859_v54  ;;  %3197 = vmatprep.subr.mxu0 %v3016_v0  ;;  %v7383_v2 = vpop.f32.mrf.mxu0  ;;  %v7385_v53 = vpop.eup %4945  ;;  %v2665_v1 = vmul.f32 0.5, %v2345_v32  ;;  %v9283_v42 = vld [vmem:[#allocation82_spill] sm:$0xff] }
 0x21b   : > { %9281 = vst [vmem:[#allocation80_spill] sm:$0xff] %v7383_v2  ;;  %4963 = vtanh.f32 %v1628_v60  ;;  %v3005_v25 = vmul.f32 %v2685_v49, %v9218_v31  ;;  %v1648_v50 = vmul.f32 0.5, %v9282_v22  ;;  %3198 = vmatpush2.msra.mxu0 %v3015_v20  ;;  %v7391_v30 = vpop.eup %4947  ;;  %v2656_v41 = vmul.f32 0.5, %v2336_v57  ;;  %v9285_v49 = vld [vmem:[#allocation45_spill] sm:$0xff] }
 0x21c   : > { %4965 = vtanh.f32 %v1637_v12  ;;  %v2996_v54 = vmul.f32 %v2676_v27, %v9216_v17  ;;  %v1657_v0 = vmul.f32 0.5, %v9283_v42  ;;  %3199 = vmatprep.subr.mxu0 %v3006_v21  ;;  %v7395_v9 = vpop.f32.mrf.mxu0  ;;  %v7397_v33 = vpop.eup %4949  ;;  %v2655_v60 = vmul.f32 0.5, %v2335_v55  ;;  %v9286_v17 = vld [vmem:[#allocation23_spill] sm:$0xff] }
 0x21d   : > { %9284 = vst [vmem:[#allocation79_spill] sm:$0xff] %v7395_v9  ;;  %v2995_v31 = vmul.f32 %v2675_v47, %v9221_v34  ;;  %4967 = vtanh.f32 %v1638_v8  ;;  %v1658_v32 = vmul.f32 0.5, %v9285_v49  ;;  %3200 = vmatpush2.msra.mxu0 %v3005_v25  ;;  %v7401_v20 = vpop.eup %4951  ;;  %v2646_v57 = vmul.f32 0.5, %v2326_v44  ;;  %v9288_v8 = vld [vmem:[#allocation37_spill] sm:$0xff]  ;;  %v7411_v25 = vpop.f32.mrf.mxu1 }
 0x21e   : > { %v2986_v12 = vmul.f32 %v2666_v15, %v9214_v62  ;;  %4969 = vtanh.f32 %v1647_v38  ;;  %v1667_v27 = vmul.f32 0.5, %v9286_v17  ;;  %3201 = vmatprep.subr.mxu0 %v2996_v54  ;;  %v7405_v21 = vpop.f32.mrf.mxu0  ;;  %v7407_v2 = vpop.eup %4953  ;;  %v2645_v55 = vmul.f32 0.5, %v2325_v40 }
 0x21f   : > { %9287 = vst [vmem:[#allocation42_spill] sm:$0xff] %v7405_v21  ;;  %v2985_v34 = vmul.f32 %v2665_v1, %v9223_v59  ;;  %4971 = vtanh.f32 %v1648_v50  ;;  %v1668_v47 = vmul.f32 0.5, %v9288_v8  ;;  %3202 = vmatpush2.msra.mxu0 %v2995_v31  ;;  %v7413_v44 = vpop.eup %4955  ;;  %v2636_v15 = vmul.f32 0.5, %v7367_v56 }
 0x220   : > { %v2976_v62 = vmul.f32 %v2656_v41, %v9224_v61  ;;  %4973 = vtanh.f32 %v1657_v0  ;;  %v1677_v38 = vmul.f32 0.5, %v7149_v46  ;;  %3203 = vmatprep.subr.mxu0 %v2986_v12  ;;  %v7418_v54 = vpop.f32.mrf.mxu0  ;;  %v2635_v59 = vmul.f32 0.5, %v7362_v51 }
 0x221   : > { %9289 = vst [vmem:[#allocation15_spill] sm:$0xff] %v7418_v54  ;;  %v7420_v40 = vpop.eup %4957  ;;  %v2975_v1 = vmul.f32 %v2655_v60, %v9226_v11  ;;  %4975 = vtanh.f32 %v1658_v32  ;;  %v1678_v50 = vmul.f32 0.5, %v7170_v28  ;;  %3204 = vmatpush2.msra.mxu0 %v2985_v34  ;;  %v2626_v61 = vmul.f32 0.5, %v7356_v36  ;;  %v7435_v32 = vpop.f32.mrf.mxu1 }
 0x222   : > { %v7425_v31 = vpop.eup %4959  ;;  %v2966_v56 = vmul.f32 %v2646_v57, %v9228_v63  ;;  %4977 = vtanh.f32 %v1667_v27  ;;  %v1697_v41 = vmul.f32 0.5, %v7236_v4  ;;  %3205 = vmatprep.subr.mxu0 %v2976_v62  ;;  %v7430_v0 = vpop.f32.mrf.mxu0  ;;  %v2625_v51 = vmul.f32 0.5, %v7350_v45 }
 0x223   : > { %9290 = vst [vmem:[#allocation69_spill] sm:$0xff] %v7430_v0  ;;  %v2965_v11 = vmul.f32 %v2645_v55, %v9212_v16  ;;  %4979 = vtanh.f32 %v1668_v47  ;;  %v1698_v60 = vmul.f32 0.5, %v7259_v39  ;;  %3206 = vmatpush2.msra.mxu0 %v2975_v1  ;;  %v2616_v63 = vmul.f32 0.5, %v7345_v26  ;;  %v7455_v62 = vpop.f32.mrf.mxu1 }
 0x224   : > { %v7437_v12 = vpop.eup %4961  ;;  %v2956_v36 = vmul.f32 %v2636_v15, %v9210_v6  ;;  %4981 = vtanh.f32 %v1677_v38  ;;  %v1708_v57 = vmul.f32 0.5, %v7330_v52  ;;  %3207 = vmatprep.subr.mxu0 %v2966_v56  ;;  %v7442_v27 = vpop.f32.mrf.mxu0  ;;  %v2615_v16 = vmul.f32 0.5, %v7342_v3 }
 0x225   : > { %9291 = vst [vmem:[#allocation64_spill] sm:$0xff] %v7442_v27  ;;  %v2955_v45 = vmul.f32 %v2635_v59, %v9209_v35  ;;  %4983 = vtanh.f32 %v1678_v50  ;;  %v1727_v55 = vmul.f32 0.5, %v7389_v48  ;;  %3208 = vmatpush2.msra.mxu0 %v2965_v11  ;;  %v2606_v34 = vmul.f32 0.5, %v7335_v23 }
 0x226   : > { %v2946_v26 = vmul.f32 %v2626_v61, %v9207_v37  ;;  %4985 = vtanh.f32 %v1697_v41  ;;  %v1728_v6 = vmul.f32 0.5, %v7411_v25  ;;  %3209 = vmatprep.subr.mxu0 %v2956_v36  ;;  %v7450_v47 = vpop.f32.mrf.mxu0  ;;  %v2595_v15 = vmul.f32 0.5, %v7323_v58  ;;  %v9294_v61 = vld [vmem:[#allocation89_spill] sm:$0xff]  ;;  %v9295_v41 = vld [vmem:[#allocation20_spill] sm:$0xff] }
 0x227   : > { %9292 = vst [vmem:[#allocation16_spill] sm:$0xff] %v7450_v47  ;;  %v2945_v3 = vmul.f32 %v2625_v51, %v9206_v10  ;;  %4987 = vtanh.f32 %v1698_v60  ;;  %v1718_v35 = vmul.f32 0.5, %v7373_v24  ;;  %3210 = vmatpush2.msra.mxu0 %v2955_v45  ;;  %v2596_v37 = vmul.f32 0.5, %v7326_v14 }
 0x228   : > { %v7457_v38 = vpop.eup %4963  ;;  %v2936_v23 = vmul.f32 %v2616_v63, %v9204_v7  ;;  %4989 = vtanh.f32 %v1708_v57  ;;  %v1737_v59 = vmul.f32 0.5, %v7435_v32  ;;  %3211 = vmatprep.subr.mxu0 %v2946_v26  ;;  %v7462_v1 = vpop.f32.mrf.mxu0  ;;  %v2925_v10 = vmul.f32 %v7332_v43, %v9200_v18  ;;  %v9297_v43 = vld [vmem:[#allocation40_spill] sm:$0xff]  ;;  %v9301_v26 = vld [vmem:[#allocation43_spill] sm:$0xff] }
 0x229   : > { %9293 = vst [vmem:[#allocation17_spill] sm:$0xff] %v7462_v1  ;;  %v7464_v58 = vpop.eup %4965  ;;  %v2935_v50 = vmul.f32 %v2615_v16, %v9203_v19  ;;  %v1717_v56 = vmul.f32 0.5, %v9294_v61  ;;  %4991 = vtanh.f32 %v1727_v55  ;;  %3212 = vmatpush2.msra.mxu0 %v2945_v3  ;;  %v2926_v7 = vmul.f32 %v2606_v34, %v9295_v41  ;;  %v9298_v16 = vld [vmem:[#allocation73_spill] sm:$0xff]  ;;  %v9300_v55 = vld [vmem:[#allocation76_spill] sm:$0xff]  ;;  %v9304_v41 = vld [vmem:[#allocation70_spill] sm:$0xff] }
 0x22a   : > { %v4968_v14 = vpop.eup %4967  ;;  %v2227_v51 = vadd.f32 1.0, %v7385_v53  ;;  %4993 = vtanh.f32 %v1728_v6  ;;  %v1738_v11 = vmul.f32 0.5, %v7455_v62  ;;  %3213 = vmatprep.subr.mxu0 %v2936_v23  ;;  %v7473_v60 = vpop.f32.mrf.mxu0  ;;  %v2228_v18 = vadd.f32 1.0, %v7391_v30  ;;  %v9299_v53 = vld [vmem:[#allocation111_spill] sm:$0xff]  ;;  %v9302_v30 = vld [vmem:[#allocation72_spill] sm:$0xff]  ;;  %v9328_v1 = vld [vmem:[#allocation25_spill] sm:$0xff] }
 0x22b   : > { %9296 = vst [vmem:[#allocation78_spill] sm:$0xff] %v7473_v60  ;;  %v7475_v63 = vpop.eup %4969  ;;  %v2237_v19 = vadd.f32 1.0, %v7397_v33  ;;  %v1707_v36 = vmul.f32 0.5, %v9297_v43  ;;  %4995 = vtanh.f32 %v1718_v35  ;;  %3214 = vmatpush2.msra.mxu0 %v2935_v50  ;;  %v2895_v45 = vmul.f32 %v9299_v53, %v9298_v16  ;;  %v9303_v23 = vld [vmem:[#allocation108_spill] sm:$0xff]  ;;  %v9331_v60 = vld [vmem:[#allocation66_spill] sm:$0xff] }
 0x22c   : > { %v7480_v57 = vpop.eup %4971  ;;  %v2576_v34 = vmul.f32 0.5, %v9300_v55  ;;  %v2916_v6 = vmul.f32 %v2596_v37, %v9301_v26  ;;  %4997 = vtanh.f32 %v1737_v59  ;;  %3215 = vmatprep.subr.mxu0 %v2926_v7  ;;  %v2906_v33 = vmul.f32 %v9303_v23, %v9302_v30  ;;  %v9305_v35 = vld [vmem:[#allocation48_spill] sm:$0xff]  ;;  %v9306_v55 = vld [vmem:[#allocation85_spill] sm:$0xff]  ;;  %v7496_v59 = vpop.f32.mrf.mxu0  ;;  %v9309_v30 = vld [vmem:[#allocation110_spill] sm:$0xff] }
 0x22d   : > { %v7486_v3 = vpop.eup %4973  ;;  %v2915_v9 = vmul.f32 %v2595_v15, %v9304_v41  ;;  %v1687_v50 = vmul.f32 0.5, %v9305_v35  ;;  %4999 = vtanh.f32 %v1717_v56  ;;  %3216 = vmatpush2.msra.mxu0 %v2925_v10  ;;  %v2547_v16 = vmul.f32 0.5, %v2227_v51  ;;  %9307 = vst [vmem:[#allocation26_spill] sm:$0xff] %v7496_v59  ;;  %v9308_v26 = vld [vmem:[#allocation33_spill] sm:$0xff]  ;;  %v9310_v56 = vld [vmem:[#allocation44_spill] sm:$0xff] }
 0x22e   : > { %v7492_v21 = vpop.eup %4975  ;;  %v2267_v53 = vadd.f32 1.0, %v7437_v12  ;;  %v1688_v37 = vmul.f32 0.5, %v9306_v55  ;;  %5001 = vtanh.f32 %v1738_v11  ;;  %3217 = vmatprep.subr.mxu0 %v2916_v6  ;;  %v2905_v15 = vmul.f32 %v9309_v30, %v9308_v26  ;;  %v9312_v26 = vld [vmem:[#allocation81_spill] sm:$0xff] }
 0x22f   : > { %v7498_v7 = vpop.eup %4977  ;;  %v2548_v23 = vmul.f32 0.5, %v2228_v18  ;;  %v2557_v41 = vmul.f32 0.5, %v2237_v19  ;;  %5003 = vtanh.f32 %v1707_v36  ;;  %3218 = vmatpush2.msra.mxu0 %v2915_v9  ;;  %v2896_v51 = vmul.f32 %v2576_v34, %v9310_v56  ;;  %v9311_v19 = vld [vmem:[#allocation11_spill] sm:$0xff]  ;;  %v9314_v30 = vld [vmem:[#allocation97_spill] sm:$0xff] }
 0x230   : > { %v7502_v10 = vpop.eup %4979  ;;  %v2238_v12 = vadd.f32 1.0, %v7401_v20  ;;  %v2247_v11 = vadd.f32 1.0, %v7407_v2  ;;  %v2248_v6 = vadd.f32 1.0, %v7413_v44  ;;  %3219 = vmatprep.subr.mxu0 %v2906_v33  ;;  %v2257_v0 = vadd.f32 1.0, %v7420_v40  ;;  %v7517_v44 = vpop.f32.mrf.mxu0  ;;  %v9316_v40 = vld [vmem:[#allocation53_spill] sm:$0xff] }
 0x231   : > { %v7508_v54 = vpop.eup %4981  ;;  %v2258_v18 = vadd.f32 1.0, %v7425_v31  ;;  %v1429_v36 = vmul.f32 0.5, %v9311_v19  ;;  %5005 = vtanh.f32 %v1687_v50  ;;  %3220 = vmatpush2.msra.mxu0 %v2905_v15  ;;  %v7514_v34 = vmul.f32 %v2547_v16, %v9312_v26  ;;  %9315 = vst [vmem:[#allocation94_spill] sm:$0xff] %v7517_v44  ;;  %v9318_v31 = vld [vmem:[#allocation32_spill] sm:$0xff]  ;;  %v9320_v15 = vld [vmem:[#allocation65_spill] sm:$0xff]  ;;  %v9324_v26 = vld [vmem:[#allocation34_spill] sm:$0xff] }
 0x232   : > { %v4984_v9 = vpop.eup %4983  ;;  %v2587_v20 = vmul.f32 0.5, %v2267_v53  ;;  %v1430_v2 = vmul.f32 0.5, %v9314_v30  ;;  %5007 = vtanh.f32 %v1688_v37  ;;  %3221 = vmatprep.subr.mxu0 %v2896_v51  ;;  %v7522_v56 = vmul.f32 %v2548_v23, %v9316_v40  ;;  %v9325_v30 = vld [vmem:[#allocation8_spill] sm:$0xff] }
 0x233   : > { %9313 = vst [vmem:[#allocation51_spill] sm:$0xff] %v7514_v34  ;;  %v7519_v33 = vpop.eup %4985  ;;  %v7525_v27 = vmul.f32 %v2557_v41, %v9318_v31  ;;  %v2278_v50 = vadd.f32 1.0, %v4968_v14  ;;  %v1439_v19 = vmul.f32 0.5, %v9320_v15  ;;  %3222 = vmatpush2.msra.mxu0 %v2895_v45  ;;  %v7530_v53 = vmul.f32 0.5, %v2238_v12  ;;  %v9326_v14 = vld [vmem:[#allocation62_spill] sm:$0xff]  ;;  %v9327_v31 = vld [vmem:[#allocation112_spill] sm:$0xff] }
 0x234   : > { %9317 = vst [vmem:[#allocation96_spill] sm:$0xff] %v7522_v56  ;;  %v7528_v16 = vpop.eup %4987  ;;  %v7532_v37 = vmul.f32 0.5, %v2247_v11  ;;  %v7534_v51 = vmul.f32 0.5, %v2248_v6  ;;  %v1440_v47 = vmul.f32 0.5, %v9324_v26  ;;  %3223 = vmatprep.subr.mxu0 %v9325_v30  ;;  %v7538_v40 = vmul.f32 0.5, %v2257_v0  ;;  %v9330_v15 = vld [vmem:[#allocation46_spill] sm:$0xff]  ;;  %v7552_v0 = vpop.f32.mrf.mxu0 }
 0x235   : > { %9319 = vst [vmem:[#allocation103_spill] sm:$0xff] %v7525_v27  ;;  %9321 = vst [vmem:[#allocation95_spill] sm:$0xff] %v7530_v53  ;;  %v4990_v23 = vpop.eup %4989  ;;  %v7540_v41 = vmul.f32 0.5, %v2258_v18  ;;  %5009 = vtanh.f32 %v1429_v36  ;;  %v1449_v45 = vmul.f32 0.5, %v9326_v14  ;;  %3224 = vmatpush2.msra.mxu0 %v9327_v31  ;;  %v7545_v11 = vmul.f32 %v2587_v20, %v9328_v1  ;;  %v9333_v31 = vld [vmem:[#allocation6_spill] sm:$0xff]  ;;  %v9334_v20 = vld [vmem:[#allocation21_spill] sm:$0xff] }
 0x236   : > { %9322 = vst [vmem:[#allocation60_spill] sm:$0xff] %v7532_v37  ;;  %9323 = vst [vmem:[#allocation19_spill] sm:$0xff] %v7534_v51  ;;  %v4992_v12 = vpop.eup %4991  ;;  %v7548_v6 = vadd.f32 1.0, %v7457_v38  ;;  %5011 = vtanh.f32 %v1430_v2  ;;  %v1450_v30 = vmul.f32 0.5, %v9330_v15  ;;  %3225 = vmatprep.subr.mxu0 %v9331_v60  ;;  %v7555_v36 = vadd.f32 1.0, %v7464_v58  ;;  %v9335_v14 = vld [vmem:[#allocation91_spill] sm:$0xff] }
 0x237   : > { %9329 = vst [vmem:[#allocation13_spill] sm:$0xff] %v7545_v11  ;;  %9332 = vst [vmem:[#allocation31_spill] sm:$0xff] %v7552_v0  ;;  %v4994_v18 = vpop.eup %4993  ;;  %v7557_v26 = vmul.f32 0.5, %v2278_v50  ;;  %5013 = vtanh.f32 %v1439_v19  ;;  %v1460_v1 = vmul.f32 0.5, %v9333_v31  ;;  %3226 = vmatpush2.msra.mxu0 %v9334_v20  ;;  %v7562_v2 = vadd.f32 1.0, %v7475_v63  ;;  %v9336_v19 = vld [vmem:[#allocation68_spill] sm:$0xff] }
 0x238   : > { %v4996_v38 = vpop.eup %4995  ;;  %v7565_v59 = vadd.f32 1.0, %v7480_v57  ;;  %5015 = vtanh.f32 %v1440_v47  ;;  %v2368_v60 = vadd.f32 1.0, %v4994_v18  ;;  %3227 = vmatprep.subr.mxu0 %v9335_v14  ;;  %v7569_v50 = vadd.f32 1.0, %v7486_v3  ;;  %v9337_v20 = vld [vmem:[#allocation38_spill] sm:$0xff]  ;;  %v7580_v18 = vpop.f32.mrf.mxu0  ;;  %v9340_v34 = vld [vmem:[#allocation28_spill] sm:$0xff] }
 0x239   : > { %v4998_v58 = vpop.eup %4997  ;;  %5017 = vtanh.f32 %v1449_v45  ;;  %v1469_v44 = vmul.f32 0.5, %v9336_v19  ;;  %v2367_v15 = vadd.f32 1.0, %v4992_v12  ;;  %3228 = vmatpush2.msra.mxu0 %v9337_v20  ;;  %v7574_v63 = vadd.f32 1.0, %v7492_v21  ;;  %9339 = vst [vmem:[#allocation59_spill] sm:$0xff] %v7580_v18 }
 0x23a   : > { %v5000_v0 = vpop.eup %4999  ;;  %v7577_v57 = vadd.f32 1.0, %v7498_v7  ;;  %5019 = vtanh.f32 %v1450_v30  ;;  %v2377_v47 = vadd.f32 1.0, %v4998_v58  ;;  %v9338_v14 = vmov 1.0  }
 0x23b   : > { %3230 = vmatmul.mubr.f32.vlgmr.msra.gmra.mxu0 %v9338_v14  ;;  %v5002_v3 = vpop.eup %5001  ;;  %v7583_v45 = vadd.f32 1.0, %v7502_v10  ;;  %v7586_v12 = vadd.f32 1.0, %v7508_v54  ;;  %v7588_v20 = vadd.f32 1.0, %v4984_v9  ;;  %5021 = vtanh.f32 %v1460_v1  ;;  %v9341_v9 = vld [vmem:[#allocation55_spill] sm:$0xff]  ;;  %v7594_v1 = vpop.f32.mrf.mxu0 }
 0x23c   : > { %3371 = vmatprep.mubr.f32.mxu0 %v9338_v14  ;;  %v5004_v21 = vpop.eup %5003  ;;  %v2358_v7 = vadd.f32 1.0, %v4996_v38  ;;  %v2688_v30 = vmul.f32 0.5, %v2368_v60  ;;  %v2697_v58 = vmul.f32 0.5, %v2377_v47  ;;  %v2378_v31 = vadd.f32 1.0, %v5002_v3  ;;  %9342 = vst [vmem:[#allocation18_spill] sm:$0xff] %v7594_v1 }
 0x23d   : > { %5023 = vtanh.f32 %v1469_v44  ;;  %v2357_v19 = vadd.f32 1.0, %v5000_v0  ;;  %v2687_v18 = vmul.f32 0.5, %v2367_v15  ;;  %v1550_v56 = vmul.f32 0.5, %v9340_v34  ;;  %v9343_v44 = vld [vmem:[#allocation27_spill] sm:$0xff] }
 0x23e   : > { %v5006_v10 = vpop.eup %5005  ;;  %v2337_v27 = vadd.f32 1.0, %v7519_v33  ;;  %v2348_v54 = vadd.f32 1.0, %v4990_v23  ;;  %v2698_v53 = vmul.f32 0.5, %v2378_v31  ;;  %v1559_v37 = vmul.f32 0.5, %v9341_v9  ;;  %v9344_v33 = vld [vmem:[#allocation54_spill] sm:$0xff] }
 0x23f   : > { %v5008_v14 = vpop.eup %5007  ;;  %v2338_v38 = vadd.f32 1.0, %v7528_v16  ;;  %v2347_v60 = vadd.f32 1.0, %v5004_v21  ;;  %v3017_v47 = vmul.f32 %v2697_v58, %v7435_v32  ;;  %v1560_v0 = vmul.f32 0.5, %v9343_v44  ;;  %v7605_v32 = vpop.f32.mrf.mxu0  ;;  %v9349_v58 = vld [vmem:[#allocation77_spill] sm:$0xff] }
 0x240   : > { %v2678_v15 = vmul.f32 0.5, %v2358_v7  ;;  %v3008_v3 = vmul.f32 %v2688_v30, %v7411_v25  ;;  %v3018_v34 = vmul.f32 %v2698_v53, %v7455_v62  ;;  %v1569_v23 = vmul.f32 0.5, %v9344_v33  ;;  %9345 = vst [vmem:[#allocation39_spill] sm:$0xff] %v7605_v32  ;;  %v9346_v53 = vld [vmem:[#allocation7_spill] sm:$0xff] }
 0x241   : > { %v2327_v31 = vadd.f32 1.0, %v5006_v10  ;;  %v2677_v51 = vmul.f32 0.5, %v2357_v19  ;;  %v3007_v9 = vmul.f32 %v2687_v18, %v7389_v48  ;;  %5025 = vtanh.f32 %v1550_v56  ;;  %v9347_v56 = vld [vmem:[#allocation52_spill] sm:$0xff] }
 0x242   : > { %v7603_v1 = vpop.eup %5009  ;;  %v2328_v16 = vadd.f32 1.0, %v5008_v14  ;;  %v2657_v21 = vmul.f32 0.5, %v2337_v27  ;;  %v2668_v11 = vmul.f32 0.5, %v2348_v54  ;;  %5027 = vtanh.f32 %v1559_v37  ;;  %3268 = vmatprep.subr.mxu1 %v3018_v34  ;;  %v9348_v27 = vld [vmem:[#allocation58_spill] sm:$0xff] }
 0x243   : > { %v7607_v7 = vpop.eup %5011  ;;  %v2658_v25 = vmul.f32 0.5, %v2338_v38  ;;  %v2667_v62 = vmul.f32 0.5, %v2347_v60  ;;  %5029 = vtanh.f32 %v1560_v0  ;;  %3269 = vmatpush2.msra.mxu1 %v3017_v47  ;;  %v1570_v19 = vmul.f32 0.5, %v9346_v53  ;;  %v9350_v54 = vld [vmem:[#allocation90_spill] sm:$0xff]  ;;  %v9351_v0 = vld [vmem:[#allocation92_spill] sm:$0xff] }
 0x244   : > { %v7610_v30 = vpop.eup %5013  ;;  %v2998_v48 = vmul.f32 %v2678_v15, %v7373_v24  ;;  %v1549_v14 = vmul.f32 0.5, %v9347_v56  ;;  %3270 = vmatprep.subr.mxu1 %v3008_v3  ;;  %5031 = vtanh.f32 %v1569_v23  ;;  %v1579_v34 = vmul.f32 0.5, %v9348_v27  ;;  %v7624_v3 = vpop.f32.mrf.mxu0 }
 0x245   : > { %v7615_v37 = vpop.eup %5015  ;;  %v2997_v18 = vmul.f32 %v2677_v51, %v9294_v61  ;;  %v1540_v10 = vmul.f32 0.5, %v9349_v58  ;;  %3271 = vmatpush2.msra.mxu1 %v3007_v9  ;;  %5033 = vtanh.f32 %v1570_v19  ;;  %v1580_v38 = vmul.f32 0.5, %v9350_v54  ;;  %9352 = vst [vmem:[#allocation63_spill] sm:$0xff] %v7624_v3  ;;  %v9353_v9 = vld [vmem:[#allocation30_spill] sm:$0xff] }
 0x246   : > { %v7620_v60 = vpop.eup %5017  ;;  %v2648_v47 = vmul.f32 0.5, %v2328_v16  ;;  %v2988_v24 = vmul.f32 %v2668_v11, %v7330_v52  ;;  %v1539_v15 = vmul.f32 0.5, %v9351_v0  ;;  %3272 = vmatprep.subr.mxu1 %v2998_v48  ;;  %5035 = vtanh.f32 %v1579_v34  ;;  %v9354_v11 = vld [vmem:[#allocation14_spill] sm:$0xff] }
 0x247   : > { %v7626_v23 = vpop.eup %5019  ;;  %v2647_v61 = vmul.f32 0.5, %v2327_v31  ;;  %v2987_v51 = vmul.f32 %v2667_v62, %v9297_v43  ;;  %v1530_v19 = vmul.f32 0.5, %v9353_v9  ;;  %3273 = vmatpush2.msra.mxu1 %v2997_v18  ;;  %5037 = vtanh.f32 %v1580_v38  ;;  %v9355_v3 = vld [vmem:[#allocation10_spill] sm:$0xff] }
 0x248   : > { %v7630_v32 = vpop.eup %5021  ;;  %v2638_v16 = vmul.f32 0.5, %v7588_v20  ;;  %v2978_v52 = vmul.f32 %v2658_v25, %v7259_v39  ;;  %v1529_v48 = vmul.f32 0.5, %v9354_v11  ;;  %5039 = vtanh.f32 %v1549_v14  ;;  %3274 = vmatprep.subr.mxu1 %v2988_v24  ;;  %v9356_v38 = vld [vmem:[#allocation50_spill] sm:$0xff]  ;;  %v7643_v25 = vpop.f32.mrf.mxu0  ;;  %v9358_v24 = vld [vmem:[#allocation9_spill] sm:$0xff] }
 0x249   : > { %v2637_v34 = vmul.f32 0.5, %v7586_v12  ;;  %v2977_v31 = vmul.f32 %v2657_v21, %v7236_v4  ;;  %v1520_v43 = vmul.f32 0.5, %v9355_v3  ;;  %5041 = vtanh.f32 %v1540_v10  ;;  %3275 = vmatpush2.msra.mxu1 %v2987_v51  ;;  %v9357_v21 = vld [vmem:[#allocation29_spill] sm:$0xff]  ;;  %v9359_v51 = vld [vmem:[#allocation86_spill] sm:$0xff] }
 0x24a   : > { %v7638_v62 = vpop.eup %5023  ;;  %v2628_v18 = vmul.f32 0.5, %v7583_v45  ;;  %v2968_v20 = vmul.f32 %v2648_v47, %v9306_v55  ;;  %v1519_v39 = vmul.f32 0.5, %v9356_v38  ;;  %5043 = vtanh.f32 %v1539_v15  ;;  %3276 = vmatprep.subr.mxu1 %v2978_v52 }
 0x24b   : > { %v2627_v12 = vmul.f32 0.5, %v7577_v57  ;;  %v2967_v4 = vmul.f32 %v2647_v61, %v9305_v35  ;;  %v1510_v14 = vmul.f32 0.5, %v9357_v21  ;;  %5045 = vtanh.f32 %v1530_v19  ;;  %3277 = vmatpush2.msra.mxu1 %v2977_v31 }
 0x24c   : > { %v2618_v10 = vmul.f32 0.5, %v7574_v63  ;;  %v2958_v45 = vmul.f32 %v2638_v16, %v7170_v28  ;;  %v1509_v55 = vmul.f32 0.5, %v9358_v24  ;;  %5047 = vtanh.f32 %v1529_v48  ;;  %3278 = vmatprep.subr.mxu1 %v2968_v20  ;;  %v9360_v63 = vld [vmem:[#allocation12_spill] sm:$0xff]  ;;  %v7657_v28 = vpop.f32.mrf.mxu0 }
 0x24d   : > { %v2617_v47 = vmul.f32 0.5, %v7569_v50  ;;  %v2957_v15 = vmul.f32 %v2637_v34, %v7149_v46  ;;  %v1500_v57 = vmul.f32 0.5, %v9359_v51  ;;  %5049 = vtanh.f32 %v1520_v43  ;;  %3279 = vmatpush2.msra.mxu1 %v2967_v4  ;;  %v9361_v48 = vld [vmem:[#allocation88_spill] sm:$0xff]  ;;  %v9363_v4 = vld [vmem:[#allocation109_spill] sm:$0xff] }
 0x24e   : > { %v5026_v35 = vpop.eup %5025  ;;  %v2608_v61 = vmul.f32 0.5, %v7565_v59  ;;  %v2948_v19 = vmul.f32 %v2628_v18, %v9288_v8  ;;  %v1499_v52 = vmul.f32 0.5, %v9360_v63  ;;  %5051 = vtanh.f32 %v1519_v39  ;;  %3280 = vmatprep.subr.mxu1 %v2958_v45  ;;  %v9362_v43 = vld [vmem:[#allocation104_spill] sm:$0xff]  ;;  %v7672_v45 = vpop.f32.mrf.mxu0 }
 0x24f   : > { %v5028_v16 = vpop.eup %5027  ;;  %v2607_v50 = vmul.f32 0.5, %v7562_v2  ;;  %v2947_v46 = vmul.f32 %v2627_v12, %v9286_v17  ;;  %v1490_v34 = vmul.f32 0.5, %v9361_v48  ;;  %5053 = vtanh.f32 %v1510_v14  ;;  %3281 = vmatpush2.msra.mxu1 %v2957_v15 }
 0x250   : > { %v5030_v31 = vpop.eup %5029  ;;  %v2588_v59 = vmul.f32 0.5, %v7548_v6  ;;  %v2938_v8 = vmul.f32 %v2618_v10, %v9285_v49  ;;  %v1489_v18 = vmul.f32 0.5, %v9362_v43  ;;  %5055 = vtanh.f32 %v1509_v55  ;;  %3282 = vmatprep.subr.mxu1 %v2948_v19  ;;  %v9364_v49 = vld [vmem:[#allocation107_spill] sm:$0xff] }
 0x251   : > { %v5032_v20 = vpop.eup %5031  ;;  %v2597_v39 = vmul.f32 0.5, %v7555_v36  ;;  %v2937_v2 = vmul.f32 %v2617_v47, %v9283_v42  ;;  %v1480_v17 = vmul.f32 0.5, %v9363_v4  ;;  %5057 = vtanh.f32 %v1500_v57  ;;  %3283 = vmatpush2.msra.mxu1 %v2947_v46  ;;  %v9365_v42 = vld [vmem:[#allocation101_spill] sm:$0xff]  ;;  %v9366_v19 = vld [vmem:[#allocation71_spill] sm:$0xff] }
 0x252   : > { %v5034_v12 = vpop.eup %5033  ;;  %v2918_v14 = vmul.f32 %v7557_v26, %v9279_v29  ;;  %v2928_v6 = vmul.f32 %v2608_v61, %v9282_v22  ;;  %v1479_v10 = vmul.f32 0.5, %v9364_v49  ;;  %5059 = vtanh.f32 %v1499_v52  ;;  %3284 = vmatprep.subr.mxu1 %v2938_v8 }
 0x253   : > { %v5036_v55 = vpop.eup %5035  ;;  %v2927_v36 = vmul.f32 %v2607_v50, %v9280_v5  ;;  %v1470_v47 = vmul.f32 0.5, %v9365_v42  ;;  %5061 = vtanh.f32 %v1490_v34  ;;  %v2210_v15 = vadd.f32 1.0, %v5034_v12  ;;  %3285 = vmatpush2.msra.mxu1 %v2937_v2  ;;  %v9367_v50 = vld [vmem:[#allocation98_spill] sm:$0xff]  ;;  %v7679_v12 = vpop.f32.mrf.mxu0 }
 0x254   : > { %v5038_v57 = vpop.eup %5037  ;;  %v1459_v46 = vmul.f32 0.5, %v9366_v19  ;;  %5063 = vtanh.f32 %v1489_v18  ;;  %v2209_v29 = vadd.f32 1.0, %v5032_v20  ;;  %v2219_v22 = vadd.f32 1.0, %v5036_v55  ;;  %3286 = vmatprep.subr.mxu1 %v2928_v6 }
 0x255   : > { %v5040_v26 = vpop.eup %5039  ;;  %v2917_v61 = vmul.f32 %v2597_v39, %v9277_v13  ;;  %5065 = vtanh.f32 %v1480_v17  ;;  %v2200_v52 = vadd.f32 1.0, %v5030_v31  ;;  %v2220_v8 = vadd.f32 1.0, %v5038_v57  ;;  %3287 = vmatpush2.msra.mxu1 %v2927_v36  ;;  %v9368_v39 = vld [vmem:[#allocation61_spill] sm:$0xff] }
 0x256   : > { %v5042_v5 = vpop.eup %5041  ;;  %v2908_v42 = vmul.f32 %v2588_v59, %v9367_v50  ;;  %5067 = vtanh.f32 %v1479_v10  ;;  %v2199_v34 = vadd.f32 1.0, %v5028_v16  ;;  %v2539_v2 = vmul.f32 0.5, %v2219_v22  ;;  %3288 = vmatprep.subr.mxu1 %v2918_v14  ;;  %v9369_v16 = vld [vmem:[#allocation67_spill] sm:$0xff]  ;;  %v9371_v22 = vld [vmem:[#allocation49_spill] sm:$0xff] }
 0x257   : > { %v5044_v18 = vpop.eup %5043  ;;  %5069 = vtanh.f32 %v1470_v47  ;;  %v2190_v20 = vadd.f32 1.0, %v5026_v35  ;;  %v2530_v6 = vmul.f32 0.5, %v2210_v15  ;;  %v2540_v55 = vmul.f32 0.5, %v2220_v8  ;;  %3289 = vmatpush2.msra.mxu1 %v2917_v61  ;;  %v9370_v35 = vld [vmem:[#allocation13_spill] sm:$0xff]  ;;  %v9372_v61 = vld [vmem:[#allocation19_spill] sm:$0xff] }
 0x258   : > { %v5046_v13 = vpop.eup %5045  ;;  %v2898_v31 = vmul.f32 %v7540_v41, %v9368_v39  ;;  %5071 = vtanh.f32 %v1459_v46  ;;  %v2189_v17 = vadd.f32 1.0, %v5040_v26  ;;  %v2529_v36 = vmul.f32 0.5, %v2209_v29  ;;  %3290 = vmatprep.subr.mxu1 %v2908_v42  ;;  %v7690_v42 = vpop.f32.mrf.mxu0  ;;  %v9373_v26 = vld [vmem:[#allocation22_spill] sm:$0xff] }
 0x259   : > { %v5048_v59 = vpop.eup %5047  ;;  %v2897_v14 = vmul.f32 %v7538_v40, %v9369_v16  ;;  %v2180_v10 = vadd.f32 1.0, %v5042_v5  ;;  %v2520_v57 = vmul.f32 0.5, %v2200_v52  ;;  %v2860_v47 = vmul.f32 %v2540_v55, %v9350_v54  ;;  %3291 = vmatpush2.msra.mxu1 %v9370_v35  ;;  %v9374_v40 = vld [vmem:[#allocation60_spill] sm:$0xff]  ;;  %v9375_v16 = vld [vmem:[#allocation47_spill] sm:$0xff] }
 0x25a   : > { %v5050_v15 = vpop.eup %5049  ;;  %v2888_v8 = vmul.f32 %v9372_v61, %v9371_v22  ;;  %v2179_v50 = vadd.f32 1.0, %v5044_v18  ;;  %v2519_v41 = vmul.f32 0.5, %v2199_v34  ;;  %v2859_v46 = vmul.f32 %v2539_v2, %v9348_v27  ;;  %3292 = vmatprep.subr.mxu1 %v2898_v31  ;;  %v9376_v35 = vld [vmem:[#allocation95_spill] sm:$0xff] }
 0x25b   : > { %v5052_v29 = vpop.eup %5051  ;;  %v2887_v5 = vmul.f32 %v9374_v40, %v9373_v26  ;;  %v2170_v52 = vadd.f32 1.0, %v5046_v13  ;;  %v2510_v39 = vmul.f32 0.5, %v2190_v20  ;;  %v2850_v54 = vmul.f32 %v2530_v6, %v9346_v53  ;;  %3293 = vmatpush2.msra.mxu1 %v2897_v14  ;;  %3307 = vmatprep.subr.mxu0 %v2860_v47  ;;  %v9377_v47 = vld [vmem:[#allocation55_spill] sm:$0xff]  ;;  %v9380_v26 = vld [vmem:[#allocation96_spill] sm:$0xff] }
 0x25c   : > { %v5054_v55 = vpop.eup %5053  ;;  %v2878_v18 = vmul.f32 %v9376_v35, %v9375_v16  ;;  %v2169_v34 = vadd.f32 1.0, %v5048_v59  ;;  %v2509_v22 = vmul.f32 0.5, %v2189_v17  ;;  %v2849_v27 = vmul.f32 %v2529_v36, %v9344_v33  ;;  %3294 = vmatprep.subr.mxu1 %v2888_v8  ;;  %3308 = vmatpush1.msra.mxu0 %v2859_v46  ;;  %v7706_v36 = vpop.f32.mrf.mxu0  ;;  %v9379_v8 = vld [vmem:[#allocation103_spill] sm:$0xff] }
 0x25d   : > { %v5056_v2 = vpop.eup %5055  ;;  %v7699_v31 = vadd.f32 1.0, %v7603_v1  ;;  %v2160_v13 = vadd.f32 1.0, %v5050_v15  ;;  %v2500_v20 = vmul.f32 0.5, %v2180_v10  ;;  %v2840_v53 = vmul.f32 %v2520_v57, %v9343_v44  ;;  %3295 = vmatpush2.msra.mxu1 %v2887_v5  ;;  %3309 = vmatprep.subr.mxu0 %v2850_v54  ;;  %v9378_v57 = vld [vmem:[#allocation28_spill] sm:$0xff]  ;;  %v9381_v54 = vld [vmem:[#allocation51_spill] sm:$0xff] }
 0x25e   : > { %v5058_v6 = vpop.eup %5057  ;;  %v7703_v14 = vadd.f32 1.0, %v7607_v7  ;;  %v2159_v59 = vadd.f32 1.0, %v5052_v29  ;;  %v2499_v17 = vmul.f32 0.5, %v2179_v50  ;;  %v2839_v33 = vmul.f32 %v2519_v41, %v9377_v47  ;;  %3296 = vmatprep.subr.mxu1 %v2878_v18  ;;  %3310 = vmatpush1.msra.mxu0 %v2849_v27 }
 0x25f   : > { %v5060_v1 = vpop.eup %5059  ;;  %v7709_v15 = vadd.f32 1.0, %v7610_v30  ;;  %v2150_v10 = vadd.f32 1.0, %v5054_v55  ;;  %v2490_v44 = vmul.f32 0.5, %v2170_v52  ;;  %v2830_v61 = vmul.f32 %v2510_v39, %v9378_v57  ;;  %3297 = vmatpush2.msra.mxu1 %v9379_v8  ;;  %3311 = vmatprep.subr.mxu0 %v2840_v53  ;;  %v3498_v30 = vld [vmem:[%s8412_s2 + $0xf8] sm:$0xff] }
 0x260   : > { %v5062_v7 = vpop.eup %5061  ;;  %v7714_v50 = vadd.f32 1.0, %v7615_v37  ;;  %v2149_v41 = vadd.f32 1.0, %v5056_v2  ;;  %v2489_v46 = vmul.f32 0.5, %v2169_v34  ;;  %v2829_v29 = vmul.f32 %v2509_v22, %v9347_v56  ;;  %3298 = vmatprep.subr.mxu1 %v9380_v26  ;;  %3312 = vmatpush1.msra.mxu0 %v2839_v33  ;;  %v3482_v56 = vld [vmem:[%s8412_s2 + $0x78] sm:$0xff]  ;;  %v7734_v22 = vpop.f32.mrf.mxu0 }
 0x261   : > { %v5064_v40 = vpop.eup %5063  ;;  %v7722_v5 = vadd.f32 1.0, %v7620_v60  ;;  %v2140_v52 = vadd.f32 1.0, %v5058_v6  ;;  %v2480_v39 = vmul.f32 0.5, %v2160_v13  ;;  %v2820_v37 = vmul.f32 %v2500_v20, %v9349_v58  ;;  %3299 = vmatpush2.msra.mxu1 %v9381_v54  ;;  %3313 = vmatprep.subr.mxu0 %v2830_v61  ;;  %v3497_v58 = vld [vmem:[%s8412_s2 + $0xf0] sm:$0xff] }
 0x262   : > { %v5066_v55 = vpop.eup %5065  ;;  %v7730_v16 = vadd.f32 1.0, %v7626_v23  ;;  %v2139_v35 = vadd.f32 1.0, %v5060_v1  ;;  %v2479_v18 = vmul.f32 0.5, %v2159_v59  ;;  %v2819_v60 = vmul.f32 %v2499_v17, %v9351_v0  ;;  %3314 = vmatpush1.msra.mxu0 %v2829_v29  ;;  %4235 = vmatprep.subr.mxu1 %v3498_v30  ;;  %v3481_v0 = vld [vmem:[%s8412_s2 + $0x70] sm:$0xff] }
 0x263   : > { %v9382_v34 = vmov 1.0   ;;  %v5068_v27 = vpop.eup %5067  ;;  %v2100_v2 = vadd.f32 1.0, %v7630_v32  ;;  %v2130_v13 = vadd.f32 1.0, %v5062_v7  ;;  %v2470_v20 = vmul.f32 0.5, %v2150_v10  ;;  %3315 = vmatprep.subr.mxu0 %v2820_v37  ;;  %v3496_v32 = vld [vmem:[%s8412_s2 + $0xe8] sm:$0xff]  ;;  %v7756_v7 = vpop.f32.mrf.mxu0 }
 0x264   : > { %3301 = vmatmul.mubr.f32.vlgmr.msra.gmra.mxu1 %v9382_v34  ;;  %v2810_v23 = vmul.f32 %v2490_v44, %v9353_v9  ;;  %v5070_v53 = vpop.eup %5069  ;;  %v2109_v6 = vadd.f32 1.0, %v7638_v62  ;;  %v2129_v59 = vadd.f32 1.0, %v5064_v40  ;;  %v2469_v17 = vmul.f32 0.5, %v2149_v41  ;;  %3316 = vmatpush1.msra.mxu0 %v2819_v60  ;;  %v3480_v62 = vld [vmem:[%s8412_s2 + $0x68] sm:$0xff] }
 0x265   : > { %v2809_v47 = vmul.f32 %v2489_v46, %v9354_v11  ;;  %4236 = vmatpush3.msra.mxu1 %v3482_v56  ;;  %v5072_v9 = vpop.eup %5071  ;;  %v2120_v33 = vadd.f32 1.0, %v5066_v55  ;;  %v2460_v1 = vmul.f32 0.5, %v2140_v52  ;;  %v2800_v10 = vmul.f32 %v2480_v39, %v9355_v3  ;;  %v3495_v3 = vld [vmem:[%s8412_s2 + $0xe0] sm:$0xff] }
 0x266   : > { %3317 = vmatprep.subr.mxu0 %v2810_v23  ;;  %v1710_v44 = vmul.f32 0.5, %v7672_v45  ;;  %4237 = vmatprep.subr.mxu1 %v3497_v58  ;;  %v2119_v11 = vadd.f32 1.0, %v5068_v27  ;;  %v2459_v57 = vmul.f32 0.5, %v2139_v35  ;;  %v2799_v61 = vmul.f32 %v2479_v18, %v9356_v38  ;;  %v7767_v35 = vpop.f32.mrf.mxu0  ;;  %v9383_v23 = vld [vmem:[#allocation63_spill] sm:$0xff] }
 0x267   : > { %3318 = vmatpush1.msra.mxu0 %v2809_v47  ;;  %v1719_v8 = vmul.f32 0.5, %v7679_v12  ;;  %4238 = vmatpush3.msra.mxu1 %v3481_v0  ;;  %v2110_v41 = vadd.f32 1.0, %v5070_v53  ;;  %v2450_v46 = vmul.f32 0.5, %v2130_v13  ;;  %v2790_v29 = vmul.f32 %v2470_v20, %v9357_v21  ;;  %v9384_v53 = vld [vmem:[#allocation101_spill] sm:$0xff]  ;;  %v9386_v47 = vld [vmem:[#allocation68_spill] sm:$0xff] }
 0x268   : > { %3319 = vmatprep.subr.mxu0 %v2800_v10  ;;  %v1720_v26 = vmul.f32 0.5, %v7690_v42  ;;  %4239 = vmatprep.subr.mxu1 %v3496_v32  ;;  %v2099_v30 = vadd.f32 1.0, %v5072_v9  ;;  %v2449_v38 = vmul.f32 0.5, %v2129_v59  ;;  %v2789_v40 = vmul.f32 %v2469_v17, %v9358_v24  ;;  %v9385_v59 = vld [vmem:[#allocation39_spill] sm:$0xff]  ;;  %v9387_v9 = vld [vmem:[#allocation18_spill] sm:$0xff] }
 0x269   : > { %3320 = vmatpush1.msra.mxu0 %v2799_v61  ;;  %v1729_v52 = vmul.f32 0.5, %v7706_v36  ;;  %4240 = vmatpush3.msra.mxu1 %v3480_v62  ;;  %v2420_v39 = vmul.f32 0.5, %v2100_v2  ;;  %v2440_v37 = vmul.f32 0.5, %v2120_v33  ;;  %v2780_v54 = vmul.f32 %v2460_v1, %v9359_v51  ;;  %v9388_v1 = vld [vmem:[#allocation6_spill] sm:$0xff] }
 0x26a   : > { %3321 = vmatprep.subr.mxu0 %v2790_v29  ;;  %5073 = vtanh.f32 %v1710_v44  ;;  %4241 = vmatprep.subr.mxu1 %v3495_v3  ;;  %v2429_v21 = vmul.f32 0.5, %v2109_v6  ;;  %v2439_v56 = vmul.f32 0.5, %v2119_v11  ;;  %v2779_v55 = vmul.f32 %v2459_v57, %v9360_v63  ;;  %v9389_v44 = vld [vmem:[#allocation59_spill] sm:$0xff]  ;;  %v9393_v29 = vld [vmem:[#allocation62_spill] sm:$0xff] }
 0x26b   : > { %3322 = vmatpush1.msra.mxu0 %v2789_v40  ;;  %5075 = vtanh.f32 %v1719_v8  ;;  %v2430_v24 = vmul.f32 0.5, %v2110_v41  ;;  %v2770_v18 = vmul.f32 %v2450_v46, %v9361_v48  ;;  %v1730_v60 = vmul.f32 0.5, %v7734_v22  ;;  %v9390_v57 = vld [vmem:[#allocation31_spill] sm:$0xff]  ;;  %v9391_v8 = vld [vmem:[#allocation46_spill] sm:$0xff] }
 0x26c   : > { %3323 = vmatprep.subr.mxu0 %v2780_v54  ;;  %5077 = vtanh.f32 %v1720_v26  ;;  %v2769_v51 = vmul.f32 %v2449_v38, %v9362_v43  ;;  %v1709_v58 = vmul.f32 0.5, %v7657_v28  ;;  %v1739_v27 = vmul.f32 0.5, %v7756_v7  ;;  %v9392_v41 = vld [vmem:[#allocation94_spill] sm:$0xff]  ;;  %v9398_v54 = vld [vmem:[#allocation17_spill] sm:$0xff] }
 0x26d   : > { %3324 = vmatpush1.msra.mxu0 %v2779_v55  ;;  %5079 = vtanh.f32 %v1729_v52  ;;  %v2760_v63 = vmul.f32 %v2440_v37, %v9363_v4  ;;  %v1700_v2 = vmul.f32 0.5, %v7643_v25  ;;  %v1740_v48 = vmul.f32 0.5, %v7767_v35  ;;  %v9396_v40 = vld [vmem:[#allocation78_spill] sm:$0xff] }
 0x26e   : > { %3325 = vmatprep.subr.mxu0 %v2770_v18  ;;  %5081 = vtanh.f32 %v1730_v60  ;;  %v2419_v13 = vmul.f32 0.5, %v2099_v30  ;;  %v2759_v20 = vmul.f32 %v2439_v56, %v9364_v49  ;;  %v1699_v43 = vmul.f32 0.5, %v9383_v23  ;;  %v9394_v30 = vld [vmem:[#allocation26_spill] sm:$0xff]  ;;  %v9399_v56 = vld [vmem:[#allocation97_spill] sm:$0xff] }
 0x26f   : > { %3326 = vmatpush1.msra.mxu0 %v2769_v51  ;;  %5083 = vtanh.f32 %v1739_v27  ;;  %v2410_v0 = vmul.f32 0.5, %v7730_v16  ;;  %v2750_v6 = vmul.f32 %v2430_v24, %v9384_v53  ;;  %v1690_v4 = vmul.f32 0.5, %v9385_v59  ;;  %v9400_v24 = vld [vmem:[#allocation16_spill] sm:$0xff]  ;;  %v9401_v51 = vld [vmem:[#allocation11_spill] sm:$0xff] }
 0x270   : > { %3327 = vmatprep.subr.mxu0 %v2760_v63  ;;  %5085 = vtanh.f32 %v1740_v48  ;;  %v2409_v17 = vmul.f32 0.5, %v7722_v5  ;;  %v2749_v32 = vmul.f32 %v2429_v21, %v9386_v47  ;;  %v1689_v33 = vmul.f32 0.5, %v9387_v9  ;;  %v9402_v27 = vld [vmem:[#allocation64_spill] sm:$0xff]  ;;  %v9403_v48 = vld [vmem:[#allocation93_spill] sm:$0xff] }
 0x271   : > { %3328 = vmatpush1.msra.mxu0 %v2759_v20  ;;  %5087 = vtanh.f32 %v1709_v58  ;;  %v2400_v49 = vmul.f32 0.5, %v7714_v50  ;;  %v2740_v10 = vmul.f32 %v2420_v39, %v9388_v1  ;;  %v1680_v16 = vmul.f32 0.5, %v9389_v44  ;;  %v9397_v39 = vld [vmem:[#allocation65_spill] sm:$0xff]  ;;  %v9404_v20 = vld [vmem:[#allocation106_spill] sm:$0xff]  ;;  %v9407_v47 = vld [vmem:[#allocation36_spill] sm:$0xff] }
 0x272   : > { %3329 = vmatprep.subr.mxu0 %v2750_v6  ;;  %5089 = vtanh.f32 %v1700_v2  ;;  %v2399_v62 = vmul.f32 0.5, %v7709_v15  ;;  %v2739_v11 = vmul.f32 %v2419_v13, %v9366_v19  ;;  %v1679_v5 = vmul.f32 0.5, %v9390_v57  ;;  %v9395_v19 = vld [vmem:[#allocation34_spill] sm:$0xff] }
 0x273   : > { %5091 = vtanh.f32 %v1699_v43  ;;  %3330 = vmatpush1.msra.mxu0 %v2749_v32  ;;  %v2390_v61 = vmul.f32 0.5, %v7703_v14  ;;  %v2730_v3 = vmul.f32 %v2410_v0, %v9391_v8  ;;  %v1670_v50 = vmul.f32 0.5, %v9392_v41  ;;  %v9405_v0 = vld [vmem:[#allocation69_spill] sm:$0xff]  ;;  %v9411_v8 = vld [vmem:[#allocation79_spill] sm:$0xff] }
 0x274   : > { %5093 = vtanh.f32 %v1690_v4  ;;  %3331 = vmatprep.subr.mxu0 %v2740_v10  ;;  %v2389_v46 = vmul.f32 0.5, %v7699_v31  ;;  %v2729_v26 = vmul.f32 %v2409_v17, %v9393_v29  ;;  %v1669_v15 = vmul.f32 0.5, %v9394_v30  ;;  %v9406_v4 = vld [vmem:[#allocation102_spill] sm:$0xff]  ;;  %v9409_v10 = vld [vmem:[#allocation84_spill] sm:$0xff] }
 0x275   : > { %5095 = vtanh.f32 %v1689_v33  ;;  %3332 = vmatpush1.msra.mxu0 %v2739_v11  ;;  %v2720_v38 = vmul.f32 %v2400_v49, %v9395_v19  ;;  %v1660_v52 = vmul.f32 0.5, %v9396_v40  ;;  %v2719_v37 = vmul.f32 %v2399_v62, %v9397_v39  ;;  %v9408_v33 = vld [vmem:[#allocation15_spill] sm:$0xff]  ;;  %v9410_v62 = vld [vmem:[#allocation42_spill] sm:$0xff]  ;;  %v9413_v39 = vld [vmem:[#allocation41_spill] sm:$0xff] }
 0x276   : > { %5097 = vtanh.f32 %v1680_v16  ;;  %3333 = vmatprep.subr.mxu0 %v2730_v3  ;;  %v1659_v21 = vmul.f32 0.5, %v9398_v54  ;;  %v2710_v55 = vmul.f32 %v2390_v61, %v9399_v56  ;;  %v1650_v18 = vmul.f32 0.5, %v9400_v24 }
 0x277   : > { %v5074_v14 = vpop.eup %5073  ;;  %5099 = vtanh.f32 %v1679_v5  ;;  %3334 = vmatpush1.msra.mxu0 %v2729_v26  ;;  %v2709_v58 = vmul.f32 %v2389_v46, %v9401_v51  ;;  %v1649_v63 = vmul.f32 0.5, %v9402_v27  ;;  %v7806_v13 = vmul.f32 0.5, %v9403_v48  ;;  %v9412_v26 = vld [vmem:[#allocation80_spill] sm:$0xff] }
 0x278   : > { %v5076_v31 = vpop.eup %5075  ;;  %5101 = vtanh.f32 %v1670_v50  ;;  %3335 = vmatprep.subr.mxu0 %v2720_v38  ;;  %v7809_v43 = vmul.f32 0.5, %v9404_v20  ;;  %v1640_v53 = vmul.f32 0.5, %v9405_v0  ;;  %v7813_v17 = vmul.f32 0.5, %v9406_v4 }
 0x279   : > { %v5078_v60 = vpop.eup %5077  ;;  %5103 = vtanh.f32 %v1669_v15  ;;  %3336 = vmatpush1.msra.mxu0 %v2719_v37  ;;  %v1600_v32 = vmul.f32 0.5, %v9407_v47  ;;  %v1639_v49 = vmul.f32 0.5, %v9408_v33  ;;  %v1610_v16 = vmul.f32 0.5, %v9409_v10 }
 0x27a   : > { %v5080_v2 = vpop.eup %5079  ;;  %5105 = vtanh.f32 %v1660_v52  ;;  %3337 = vmatprep.subr.mxu0 %v2710_v55  ;;  %v1630_v11 = vmul.f32 0.5, %v9410_v62  ;;  %v1629_v3 = vmul.f32 0.5, %v9411_v8  ;;  %v1620_v15 = vmul.f32 0.5, %v9412_v26 }
 0x27b   : > { %v5082_v6 = vpop.eup %5081  ;;  %5107 = vtanh.f32 %v1659_v21  ;;  %3338 = vmatpush1.msra.mxu0 %v2709_v58  ;;  %v2369_v50 = vadd.f32 1.0, %v5080_v2  ;;  %v2360_v19 = vadd.f32 1.0, %v5078_v60  ;;  %v1619_v37 = vmul.f32 0.5, %v9413_v39  ;;  %v9414_v2 = vld [vmem:[#allocation87_spill] sm:$0xff] }
 0x27c   : > { %v5084_v1 = vpop.eup %5083  ;;  %5109 = vtanh.f32 %v1650_v18  ;;  %v2370_v5 = vadd.f32 1.0, %v5082_v6  ;;  %v2359_v21 = vadd.f32 1.0, %v5076_v31  ;;  %v2350_v18 = vadd.f32 1.0, %v5074_v14 }
 0x27d   : > { %v5086_v61 = vpop.eup %5085  ;;  %5111 = vtanh.f32 %v1649_v63  ;;  %v2379_v46 = vadd.f32 1.0, %v5084_v1  ;;  %v1609_v6 = vmul.f32 0.5, %v9414_v2  ;;  %v2689_v34 = vmul.f32 0.5, %v2369_v50 }
 0x27e   : > { %v5088_v29 = vpop.eup %5087  ;;  %5113 = vtanh.f32 %v1640_v53  ;;  %v2380_v38 = vadd.f32 1.0, %v5086_v61  ;;  %v2690_v51 = vmul.f32 0.5, %v2370_v5  ;;  %v2680_v61 = vmul.f32 0.5, %v2360_v19 }
 0x27f   : > { %v5090_v52 = vpop.eup %5089  ;;  %5115 = vtanh.f32 %v1639_v49  ;;  %v2699_v56 = vmul.f32 0.5, %v2379_v46  ;;  %v2349_v1 = vadd.f32 1.0, %v5088_v29  ;;  %v2679_v46 = vmul.f32 0.5, %v2359_v21 }
 0x280   : > { %v5092_v55 = vpop.eup %5091  ;;  %5117 = vtanh.f32 %v1630_v11  ;;  %v2700_v58 = vmul.f32 0.5, %v2380_v38  ;;  %v2340_v60 = vadd.f32 1.0, %v5090_v52  ;;  %v2670_v38 = vmul.f32 0.5, %v2350_v18 }
 0x281   : > { %v5094_v63 = vpop.eup %5093  ;;  %5119 = vtanh.f32 %v1629_v3  ;;  %v2339_v31 = vadd.f32 1.0, %v5092_v55  ;;  %v3019_v14 = vmul.f32 %v2699_v56, %v7756_v7  ;;  %v3010_v3 = vmul.f32 %v2690_v51, %v7734_v22 }
 0x282   : > { %v5096_v53 = vpop.eup %5095  ;;  %5121 = vtanh.f32 %v1620_v15  ;;  %v3020_v48 = vmul.f32 %v2700_v58, %v7767_v35  ;;  %v2330_v5 = vadd.f32 1.0, %v5094_v63  ;;  %v2669_v15 = vmul.f32 0.5, %v2349_v1 }
 0x283   : > { %v5098_v49 = vpop.eup %5097  ;;  %5123 = vtanh.f32 %v1619_v37  ;;  %v2329_v29 = vadd.f32 1.0, %v5096_v53  ;;  %v3009_v19 = vmul.f32 %v2689_v34, %v7706_v36  ;;  %v2660_v37 = vmul.f32 0.5, %v2340_v60 }
 0x284   : > { %v5100_v11 = vpop.eup %5099  ;;  %5125 = vtanh.f32 %v1610_v16  ;;  %3339 = vmatprep.subr.mxu0 %v3020_v48  ;;  %v2320_v52 = vadd.f32 1.0, %v5098_v49  ;;  %v3000_v7 = vmul.f32 %v2680_v61, %v7690_v42  ;;  %v2659_v22 = vmul.f32 0.5, %v2339_v31 }
 0x285   : > { %v5102_v50 = vpop.eup %5101  ;;  %5127 = vtanh.f32 %v1609_v6  ;;  %3340 = vmatpush2.msra.mxu0 %v3019_v14  ;;  %v2319_v21 = vadd.f32 1.0, %v5100_v11  ;;  %v2999_v48 = vmul.f32 %v2679_v46, %v7679_v12  ;;  %v2650_v34 = vmul.f32 0.5, %v2330_v5 }
 0x286   : > { %v5104_v35 = vpop.eup %5103  ;;  %5129 = vtanh.f32 %v1600_v32  ;;  %3341 = vmatprep.subr.mxu0 %v3010_v3  ;;  %v2310_v36 = vadd.f32 1.0, %v5102_v50  ;;  %v2990_v32 = vmul.f32 %v2670_v38, %v7672_v45  ;;  %v2649_v18 = vmul.f32 0.5, %v2329_v29 }
 0x287   : > { %v5106_v16 = vpop.eup %5105  ;;  %5131 = vtanh.f32 %v7813_v17  ;;  %3342 = vmatpush2.msra.mxu0 %v3009_v19  ;;  %v2309_v42 = vadd.f32 1.0, %v5104_v35  ;;  %v2989_v17 = vmul.f32 %v2669_v15, %v7657_v28  ;;  %v2640_v12 = vmul.f32 0.5, %v2320_v52 }
 0x288   : > { %v5108_v56 = vpop.eup %5107  ;;  %5133 = vtanh.f32 %v7809_v43  ;;  %3343 = vmatprep.subr.mxu0 %v3000_v7  ;;  %v2300_v58 = vadd.f32 1.0, %v5106_v16  ;;  %v2980_v63 = vmul.f32 %v2660_v37, %v7643_v25  ;;  %v2639_v1 = vmul.f32 0.5, %v2319_v21 }
 0x289   : > { %v5110_v55 = vpop.eup %5109  ;;  %5135 = vtanh.f32 %v7806_v13  ;;  %3344 = vmatpush2.msra.mxu0 %v2999_v48  ;;  %v2299_v6 = vadd.f32 1.0, %v5108_v56  ;;  %v2979_v45 = vmul.f32 %v2659_v22, %v9383_v23  ;;  %v2630_v13 = vmul.f32 0.5, %v2310_v36 }
 0x28a   : > { %v5112_v51 = vpop.eup %5111  ;;  %3345 = vmatprep.subr.mxu0 %v2990_v32  ;;  %v2290_v60 = vadd.f32 1.0, %v5110_v55  ;;  %v2970_v61 = vmul.f32 %v2650_v34, %v9385_v59  ;;  %v2629_v31 = vmul.f32 0.5, %v2309_v42  ;;  %v2969_v46 = vmul.f32 %v2649_v18, %v9387_v9 }
 0x28b   : > { %v5114_v43 = vpop.eup %5113  ;;  %3346 = vmatpush2.msra.mxu0 %v2989_v17  ;;  %v2289_v49 = vadd.f32 1.0, %v5112_v51  ;;  %v2620_v11 = vmul.f32 0.5, %v2300_v58  ;;  %v2960_v5 = vmul.f32 %v2640_v12, %v9389_v44  ;;  %v2619_v3 = vmul.f32 0.5, %v2299_v6 }
 0x28c   : > { %v5116_v53 = vpop.eup %5115  ;;  %3347 = vmatprep.subr.mxu0 %v2980_v63  ;;  %v2280_v14 = vadd.f32 1.0, %v5114_v43  ;;  %v2959_v50 = vmul.f32 %v2639_v1, %v9390_v57  ;;  %v2610_v15 = vmul.f32 0.5, %v2290_v60  ;;  %v2950_v19 = vmul.f32 %v2630_v13, %v9392_v41 }
 0x28d   : > { %v5118_v28 = vpop.eup %5117  ;;  %3348 = vmatpush2.msra.mxu0 %v2979_v45  ;;  %v2279_v38 = vadd.f32 1.0, %v5116_v53  ;;  %v2609_v52 = vmul.f32 0.5, %v2289_v49  ;;  %v2949_v37 = vmul.f32 %v2629_v31, %v9394_v30  ;;  %v2940_v21 = vmul.f32 %v2620_v11, %v9396_v40  ;;  %v3476_v11 = vld [vmem:[%s8412_s2 + $0x48] sm:$0xff] }
 0x28e   : > { %v5120_v25 = vpop.eup %5119  ;;  %3349 = vmatprep.subr.mxu0 %v2970_v61  ;;  %v2270_v29 = vadd.f32 1.0, %v5118_v28  ;;  %v2600_v16 = vmul.f32 0.5, %v2280_v14  ;;  %v2939_v56 = vmul.f32 %v2619_v3, %v9398_v54  ;;  %v2930_v32 = vmul.f32 %v2610_v15, %v9400_v24  ;;  %v3474_v15 = vld [vmem:[%s8412_s2 + $0x38] sm:$0xff] }
 0x28f   : > { %v5122_v23 = vpop.eup %5121  ;;  %3350 = vmatpush2.msra.mxu0 %v2969_v46  ;;  %v2269_v35 = vadd.f32 1.0, %v5120_v25  ;;  %v2599_v48 = vmul.f32 0.5, %v2279_v38  ;;  %v2929_v18 = vmul.f32 %v2609_v52, %v9402_v27  ;;  %v9415_v25 = vld [vmem:[#allocation93_spill] sm:$0xff]  ;;  %v9416_v3 = vmov 1.0   ;;  %v3473_v52 = vld [vmem:[%s8412_s2 + $0x30] sm:$0xff] }
 0x290   : > { %v5124_v59 = vpop.eup %5123  ;;  %3351 = vmatprep.subr.mxu0 %v2960_v5  ;;  %v2260_v7 = vadd.f32 1.0, %v5122_v23  ;;  %v2590_v34 = vmul.f32 0.5, %v2270_v29  ;;  %v2920_v58 = vmul.f32 %v2600_v16, %v9405_v0  ;;  %v3491_v5 = vld [vmem:[%s8412_s2 + $0xc0] sm:$0xff]  ;;  %v3561_v23 = vld [vmem:[%s8412_s2 + $0x2f0] sm:$0xff]  ;;  %v3560_v29 = vld [vmem:[%s8412_s2 + $0x2e8] sm:$0xff] }
 0x291   : > { %v5126_v9 = vpop.eup %5125  ;;  %3352 = vmatpush2.msra.mxu0 %v2959_v50  ;;  %v2259_v22 = vadd.f32 1.0, %v5124_v59  ;;  %v2589_v42 = vmul.f32 0.5, %v2269_v35  ;;  %v2919_v63 = vmul.f32 %v2599_v48, %v9408_v33  ;;  %v3479_v33 = vld [vmem:[%s8412_s2 + $0x60] sm:$0xff]  ;;  %v3545_v50 = vld [vmem:[%s8412_s2 + $0x270] sm:$0xff]  ;;  %v3490_v59 = vld [vmem:[%s8412_s2 + $0xb8] sm:$0xff] }
 0x292   : > { %v5128_v44 = vpop.eup %5127  ;;  %3353 = vmatprep.subr.mxu0 %v2950_v19  ;;  %v2250_v36 = vadd.f32 1.0, %v5126_v9  ;;  %v2580_v51 = vmul.f32 0.5, %v2260_v7  ;;  %v2910_v6 = vmul.f32 %v2590_v34, %v9410_v62  ;;  %4242 = vmatpush3.msra.mxu1 %v3479_v33  ;;  %v3475_v38 = vld [vmem:[%s8412_s2 + $0x40] sm:$0xff]  ;;  %v3544_v19 = vld [vmem:[%s8412_s2 + $0x268] sm:$0xff]  ;;  %v3489_v9 = vld [vmem:[%s8412_s2 + $0xb0] sm:$0xff] }
 0x293   : > { %v5130_v57 = vpop.eup %5129  ;;  %3354 = vmatpush2.msra.mxu0 %v2949_v37  ;;  %v2249_v55 = vadd.f32 1.0, %v5128_v44  ;;  %v2579_v12 = vmul.f32 0.5, %v2259_v22  ;;  %v2909_v27 = vmul.f32 %v2589_v42, %v9411_v8  ;;  %v3494_v8 = vld [vmem:[%s8412_s2 + $0xd8] sm:$0xff]  ;;  %v3559_v35 = vld [vmem:[%s8412_s2 + $0x2e0] sm:$0xff]  ;;  %v3488_v44 = vld [vmem:[%s8412_s2 + $0xa8] sm:$0xff] }
 0x294   : > { %v5132_v41 = vpop.eup %5131  ;;  %3355 = vmatprep.subr.mxu0 %v2940_v21  ;;  %v2240_v17 = vadd.f32 1.0, %v5130_v57  ;;  %v2570_v24 = vmul.f32 0.5, %v2250_v36  ;;  %v2900_v60 = vmul.f32 %v2580_v51, %v9412_v26  ;;  %4243 = vmatprep.subr.mxu1 %v3494_v8  ;;  %v3543_v37 = vld [vmem:[%s8412_s2 + $0x260] sm:$0xff]  ;;  %v3558_v7 = vld [vmem:[%s8412_s2 + $0x2d8] sm:$0xff]  ;;  %v3472_v16 = vld [vmem:[%s8412_s2 + $0x28] sm:$0xff] }
 0x295   : > { %v5134_v30 = vpop.eup %5133  ;;  %3356 = vmatpush2.msra.mxu0 %v2939_v56  ;;  %v2239_v54 = vadd.f32 1.0, %v5132_v41  ;;  %v2569_v45 = vmul.f32 0.5, %v2249_v55  ;;  %v2899_v13 = vmul.f32 %v2579_v12, %v9413_v39  ;;  %v3478_v39 = vld [vmem:[%s8412_s2 + $0x58] sm:$0xff]  ;;  %v3487_v57 = vld [vmem:[%s8412_s2 + $0xa0] sm:$0xff]  ;;  %v3557_v22 = vld [vmem:[%s8412_s2 + $0x2d0] sm:$0xff] }
 0x296   : > { %v5136_v40 = vpop.eup %5135  ;;  %3357 = vmatprep.subr.mxu0 %v2930_v32  ;;  %v2230_v43 = vadd.f32 1.0, %v5134_v30  ;;  %v2560_v53 = vmul.f32 0.5, %v2240_v17  ;;  %v2890_v62 = vmul.f32 %v2570_v24, %v9409_v10  ;;  %4244 = vmatpush3.msra.mxu1 %v3478_v39  ;;  %v3493_v10 = vld [vmem:[%s8412_s2 + $0xd0] sm:$0xff]  ;;  %v3542_v21 = vld [vmem:[%s8412_s2 + $0x258] sm:$0xff]  ;;  %v3471_v48 = vld [vmem:[%s8412_s2 + $0x20] sm:$0xff] }
 0x297   : > { %3358 = vmatpush2.msra.mxu0 %v2929_v18  ;;  %v2229_v1 = vadd.f32 1.0, %v5136_v40  ;;  %v2559_v0 = vmul.f32 0.5, %v2239_v54  ;;  %v2889_v26 = vmul.f32 %v2569_v45, %v9414_v2  ;;  %4245 = vmatprep.subr.mxu1 %v3493_v10  ;;  %v3477_v2 = vld [vmem:[%s8412_s2 + $0x50] sm:$0xff]  ;;  %v3486_v41 = vld [vmem:[%s8412_s2 + $0x98] sm:$0xff]  ;;  %v3556_v36 = vld [vmem:[%s8412_s2 + $0x2c8] sm:$0xff]  ;;  %v3089_v10 = vpop.f32.mrf.mxu1 }
 0x298   : > { %3359 = vmatprep.subr.mxu0 %v2920_v58  ;;  %v2550_v61 = vmul.f32 0.5, %v2230_v43  ;;  %v2880_v49 = vmul.f32 %v2560_v53, %v9407_v47  ;;  %4246 = vmatpush3.msra.mxu1 %v3477_v2  ;;  %v3492_v47 = vld [vmem:[%s8412_s2 + $0xc8] sm:$0xff]  ;;  %v3541_v56 = vld [vmem:[%s8412_s2 + $0x250] sm:$0xff]  ;;  %v3470_v34 = vld [vmem:[%s8412_s2 + $0x18] sm:$0xff]  ;;  %v5227_v2 = vmov 1966171168  }
 0x299   : > { %3360 = vmatpush2.msra.mxu0 %v2919_v63  ;;  %v2549_v28 = vmul.f32 0.5, %v2229_v1  ;;  %v2879_v31 = vmul.f32 %v2559_v0, %v9406_v4  ;;  %v3562_v4 = vld [vmem:[%s8412_s2 + $0x2f8] sm:$0xff]  ;;  %4247 = vmatprep.subr.mxu1 %v3492_v47  ;;  %v3540_v32 = vld [vmem:[%s8412_s2 + $0x248] sm:$0xff]  ;;  %v3485_v30 = vld [vmem:[%s8412_s2 + $0x90] sm:$0xff] }
 0x29a   : > { %3361 = vmatprep.subr.mxu0 %v2910_v6  ;;  %v2870_v46 = vmul.f32 %v2550_v61, %v9404_v20  ;;  %v3546_v20 = vld [vmem:[%s8412_s2 + $0x278] sm:$0xff]  ;;  %4248 = vmatpush3.msra.mxu1 %v3476_v11  ;;  %v3555_v55 = vld [vmem:[%s8412_s2 + $0x2c0] sm:$0xff]  ;;  %v3469_v42 = vld [vmem:[%s8412_s2 + $0x10] sm:$0xff] }
 0x29b   : > { %3362 = vmatpush2.msra.mxu0 %v2909_v27  ;;  %v2869_v14 = vmul.f32 %v2549_v28, %v9415_v25  ;;  %4249 = vmatprep.subr.mxu1 %v3491_v5  ;;  %v3539_v18 = vld [vmem:[%s8412_s2 + $0x240] sm:$0xff]  ;;  %v3484_v40 = vld [vmem:[%s8412_s2 + $0x88] sm:$0xff]  ;;  %v3554_v17 = vld [vmem:[%s8412_s2 + $0x2b8] sm:$0xff] }
 0x29c   : > { %3363 = vmatprep.subr.mxu0 %v2900_v60  ;;  %4250 = vmatpush3.msra.mxu1 %v3475_v38  ;;  %v3468_v51 = vld [vmem:[%s8412_s2 + $0x8] sm:$0xff]  ;;  %v3538_v58 = vld [vmem:[%s8412_s2 + $0x238] sm:$0xff]  ;;  %v3483_v54 = vld [vmem:[%s8412_s2 + $0x80] sm:$0xff] }
 0x29d   : > { %3364 = vmatpush2.msra.mxu0 %v2899_v13  ;;  %4251 = vmatprep.subr.mxu1 %v3490_v59  ;;  %v3467_v12 = vld [vmem:[%s8412_s2] sm:$0xff]  ;;  %v3553_v63 = vld [vmem:[%s8412_s2 + $0x2b0] sm:$0xff]  ;;  %v3530_v24 = vld [vmem:[%s8412_s2 + $0x1f8] sm:$0xff] }
 0x29e   : > { %3365 = vmatprep.subr.mxu0 %v2890_v62  ;;  %4252 = vmatpush3.msra.mxu1 %v3474_v15  ;;  %v3537_v43 = vld [vmem:[%s8412_s2 + $0x230] sm:$0xff]  ;;  %v3552_v6 = vld [vmem:[%s8412_s2 + $0x2a8] sm:$0xff]  ;;  %v3551_v45 = vld [vmem:[%s8412_s2 + $0x2a0] sm:$0xff] }
 0x29f   : > { %3366 = vmatpush2.msra.mxu0 %v2889_v26  ;;  %4253 = vmatprep.subr.mxu1 %v3489_v9  ;;  %v3536_v1 = vld [vmem:[%s8412_s2 + $0x228] sm:$0xff]  ;;  %v3535_v27 = vld [vmem:[%s8412_s2 + $0x220] sm:$0xff]  ;;  %v3550_v53 = vld [vmem:[%s8412_s2 + $0x298] sm:$0xff]  ;;  %v229_v26 = vlaneseq }
 0x2a0   : > { %3367 = vmatprep.subr.mxu0 %v2880_v49  ;;  %4254 = vmatpush3.msra.mxu1 %v3473_v52  ;;  %v3534_v60 = vld [vmem:[%s8412_s2 + $0x218] sm:$0xff]  ;;  %v3549_v0 = vld [vmem:[%s8412_s2 + $0x290] sm:$0xff]  ;;  %v3548_v33 = vld [vmem:[%s8412_s2 + $0x288] sm:$0xff]  ;;  %v5226_v49 = vmov 0.0  }
 0x2a1   : > { %3368 = vmatpush2.msra.mxu0 %v2879_v31  ;;  %4255 = vmatprep.subr.mxu1 %v3488_v44  ;;  %v3533_v13 = vld [vmem:[%s8412_s2 + $0x210] sm:$0xff]  ;;  %v3532_v61 = vld [vmem:[%s8412_s2 + $0x208] sm:$0xff]  ;;  %v3547_v62 = vld [vmem:[%s8412_s2 + $0x280] sm:$0xff]  ;;  %vm8036_vm2 = vcmp.lt.s32.totalorder %v229_v26, 256  ;;  %v3091_v31 = vpop.f32.mrf.mxu1 }
 0x2a2   : > { %3369 = vmatprep.subr.mxu0 %v2870_v46  ;;  %4256 = vmatpush3.msra.mxu1 %v3472_v16  ;;  %v3531_v8 = vld [vmem:[%s8412_s2 + $0x200] sm:$0xff]  ;;  %v3626_v28 = vld [vmem:[%s8412_s2 + $0x4f8] sm:$0xff]  ;;  %233 = vst.msk [vmem:[#allocation2 + $0x8] sm:$0x3] %vm8036_vm2, %v5226_v49  ;;  %v3393_v46 = vunpack.c.l.s4 %v5227_v2  ;;  %v3388_v5 = vcombine.low %v3089_v10, %v3091_v31  ;;  %v3620_v49 = vld [vmem:[%s8412_s2 + $0x4c8] sm:$0xff] }
 0x2a3   : > { %3370 = vmatpush2.msra.mxu0 %v2869_v14  ;;  %4257 = vmatprep.subr.mxu1 %v3487_v57  ;;  %v3523_v10 = vld [vmem:[%s8412_s2 + $0x1c0] sm:$0xff]  ;;  %v3604_v31 = vld [vmem:[%s8412_s2 + $0x448] sm:$0xff] }
 0x2a4   : > { %3372 = vmatmul.mubr.f32.vlgmr.msra.gmra.mxu0 %v9416_v3  ;;  %4305 = vmatprep.subr.mxu0 %v3562_v4  ;;  %v3394_v14 = vunpack.c.0.s8 %v3393_v46  ;;  %v8042_v4 = vshrl.u32 %v229_v26, 7  ;;  %v3508_v26 = vld [vmem:[%s8412_s2 + $0x148] sm:$0xff]  ;;  %v3507_v2 = vld [vmem:[%s8412_s2 + $0x140] sm:$0xff] }
 0x2a5   : > { %4306 = vmatpush3.msra.mxu0 %v3546_v20  ;;  %4258 = vmatpush3.msra.mxu1 %v3471_v48  ;;  %v3160_v47 = vpop.f32.mrf.mxu1  ;;  %v3619_v46 = vld [vmem:[%s8412_s2 + $0x4c0] sm:$0xff] }
 0x2a6   : > { %4307 = vmatprep.subr.mxu0 %v3561_v23  ;;  %4259 = vmatprep.subr.mxu1 %v3486_v41  ;;  %v8045_v23 = vsub.s32 %v3394_v14, %v8042_v4  ;;  %v3636_v16 = vsub.s32 1, %v8042_v4  ;;  %v3652_v57 = vsub.s32 5, %v8042_v4  ;;  %v3648_v48 = vsub.s32 4, %v8042_v4  ;;  %v3506_v14 = vld [vmem:[%s8412_s2 + $0x138] sm:$0xff] }
 0x2a7   : > { %4308 = vmatpush3.msra.mxu0 %v3545_v50  ;;  %4260 = vmatpush3.msra.mxu1 %v3470_v34  ;;  %v3162_v11 = vpop.f32.mrf.mxu1  ;;  %v3644_v41 = vsub.s32 3, %v8042_v4 }
 0x2a8   : > { %4309 = vmatprep.subr.mxu0 %v3560_v29  ;;  %4261 = vmatprep.subr.mxu1 %v3485_v30  ;;  %v3389_v38 = vcombine.low %v3160_v47, %v3162_v11  ;;  %v3398_v59 = vrot.slane %v3388_v5, %v8045_v23  ;;  %v3522_v47 = vld [vmem:[%s8412_s2 + $0x1b8] sm:$0xff] }
 0x2a9   : > { %4310 = vmatpush3.msra.mxu0 %v3544_v19  ;;  %4262 = vmatpush3.msra.mxu1 %v3469_v42  ;;  %v3618_v11 = vld [vmem:[%s8412_s2 + $0x4b8] sm:$0xff] }
 0x2aa   : > { %4311 = vmatprep.subr.mxu0 %v3559_v35  ;;  %4263 = vmatprep.subr.mxu1 %v3484_v40  ;;  %v3405_v29 = vrot.slane %v3389_v38, %v8045_v23  ;;  %v3602_v5 = vld [vmem:[%s8412_s2 + $0x438] sm:$0xff]  ;;  %v3505_v38 = vld [vmem:[%s8412_s2 + $0x130] sm:$0xff] }
 0x2ab   : > { %4312 = vmatpush3.msra.mxu0 %v3543_v37  ;;  %4264 = vmatpush3.msra.mxu1 %v3468_v51  ;;  %v3513_v51 = vld [vmem:[%s8412_s2 + $0x170] sm:$0xff] }
 0x2ac   : > { %4313 = vmatprep.subr.mxu0 %v3558_v7  ;;  %4265 = vmatprep.subr.mxu1 %v3483_v54  ;;  %v3420_v35 = vcombine.low %v3398_v59, %v3405_v29  ;;  %v3528_v54 = vld [vmem:[%s8412_s2 + $0x1e8] sm:$0xff]  ;;  %v3601_v59 = vld [vmem:[%s8412_s2 + $0x430] sm:$0xff] }
 0x2ad   : > { %4314 = vmatpush3.msra.mxu0 %v3542_v21  ;;  %4266 = vmatpush3.msra.mxu1 %v3467_v12  ;;  %v3609_v12 = vld [vmem:[%s8412_s2 + $0x470] sm:$0xff]  ;;  %v3504_v29 = vld [vmem:[%s8412_s2 + $0x128] sm:$0xff] }
 0x2ae   : > { %4315 = vmatprep.subr.mxu0 %v3557_v22  ;;  %4270 = vmatprep.subr.mxu1 %v3530_v24  ;;  %v3428_v44 = vrot.slane %v3420_v35, %v8045_v23  ;;  %v3632_v22 = vsub.s32 0, %v8042_v4  ;;  %v3527_v24 = vld [vmem:[%s8412_s2 + $0x1e0] sm:$0xff] }
 0x2af   : > { %4316 = vmatpush3.msra.mxu0 %v3541_v56  ;;  %v3656_v56 = vsub.s32 6, %v8042_v4  ;;  %v3503_v35 = vld [vmem:[%s8412_s2 + $0x120] sm:$0xff] }
 0x2b0   : > { %4317 = vmatprep.subr.mxu0 %v3556_v36 }
 0x2b1   : > { %4318 = vmatpush3.msra.mxu0 %v3540_v32 }
 0x2b2   : > { %4319 = vmatprep.subr.mxu0 %v3555_v55  ;;  %v3514_v55 = vld [vmem:[%s8412_s2 + $0x178] sm:$0xff] }
 0x2b3   : > { %4320 = vmatpush3.msra.mxu0 %v3539_v18  ;;  %v3529_v18 = vld [vmem:[%s8412_s2 + $0x1f0] sm:$0xff] }
 0x2b4   : > { %4321 = vmatprep.subr.mxu0 %v3554_v17  ;;  %v3610_v17 = vld [vmem:[%s8412_s2 + $0x478] sm:$0xff] }
 0x2b5   : > { %4322 = vmatpush3.msra.mxu0 %v3538_v58  ;;  %v3625_v58 = vld [vmem:[%s8412_s2 + $0x4f0] sm:$0xff] }
 0x2b6   : > { %4323 = vmatprep.subr.mxu0 %v3553_v63  ;;  %v3512_v63 = vld [vmem:[%s8412_s2 + $0x168] sm:$0xff] }
 0x2b7   : > { %4324 = vmatpush3.msra.mxu0 %v3537_v43  ;;  %v3624_v43 = vld [vmem:[%s8412_s2 + $0x4e8] sm:$0xff] }
 0x2b8   : > { %4325 = vmatprep.subr.mxu0 %v3552_v6  ;;  %v3608_v6 = vld [vmem:[%s8412_s2 + $0x468] sm:$0xff] }
 0x2b9   : > { %4326 = vmatpush3.msra.mxu0 %v3536_v1  ;;  %v3511_v1 = vld [vmem:[%s8412_s2 + $0x160] sm:$0xff] }
 0x2ba   : > { %4327 = vmatprep.subr.mxu0 %v3551_v45  ;;  %v3623_v45 = vld [vmem:[%s8412_s2 + $0x4e0] sm:$0xff] }
 0x2bb   : > { %4328 = vmatpush3.msra.mxu0 %v3535_v27  ;;  %v3526_v27 = vld [vmem:[%s8412_s2 + $0x1d8] sm:$0xff] }
 0x2bc   : > { %4329 = vmatprep.subr.mxu0 %v3550_v53  ;;  %v3607_v53 = vld [vmem:[%s8412_s2 + $0x460] sm:$0xff] }
 0x2bd   : > { %4330 = vmatpush3.msra.mxu0 %v3534_v60  ;;  %v3510_v60 = vld [vmem:[%s8412_s2 + $0x158] sm:$0xff] }
 0x2be   : > { %4331 = vmatprep.subr.mxu0 %v3549_v0  ;;  %v3622_v0 = vld [vmem:[%s8412_s2 + $0x4d8] sm:$0xff] }
 0x2bf   : > { %4332 = vmatpush3.msra.mxu0 %v3533_v13  ;;  %v3525_v13 = vld [vmem:[%s8412_s2 + $0x1d0] sm:$0xff] }
 0x2c0   : > { %4333 = vmatprep.subr.mxu0 %v3548_v33  ;;  %v3606_v33 = vld [vmem:[%s8412_s2 + $0x458] sm:$0xff] }
 0x2c1   : > { %4334 = vmatpush3.msra.mxu0 %v3532_v61  ;;  %v3509_v61 = vld [vmem:[%s8412_s2 + $0x150] sm:$0xff] }
 0x2c2   : > { %4335 = vmatprep.subr.mxu0 %v3547_v62  ;;  %v3621_v62 = vld [vmem:[%s8412_s2 + $0x4d0] sm:$0xff] }
 0x2c3   : > { %4336 = vmatpush3.msra.mxu0 %v3531_v8  ;;  %v3524_v8 = vld [vmem:[%s8412_s2 + $0x1c8] sm:$0xff] }
 0x2c4   : > { %4375 = vmatprep.subr.mxu0 %v3626_v28  ;;  %v3605_v28 = vld [vmem:[%s8412_s2 + $0x450] sm:$0xff] }
 0x2fb   : > { %v3231_v25 = vpop.f32.mrf.mxu0 }
 0x2fd   : > { %v3233_v20 = vpop.f32.mrf.mxu0 }
 0x2fe   : > { %v3390_v3 = vcombine.low %v3231_v25, %v3233_v20  ;;  %v3603_v25 = vld [vmem:[%s8412_s2 + $0x440] sm:$0xff]  ;;  %v3521_v20 = vld [vmem:[%s8412_s2 + $0x1b0] sm:$0xff] }
 0x300   : > { %v3412_v19 = vrot.slane %v3390_v3, %v8045_v23  ;;  %v3617_v3 = vld [vmem:[%s8412_s2 + $0x4b0] sm:$0xff] }
 0x324   : > { %v3302_v50 = vpop.f32.mrf.mxu1 }
 0x326   : > { %v3304_v15 = vpop.f32.mrf.mxu1 }
 0x327   : > { %v3391_v9 = vcombine.low %v3302_v50, %v3304_v15  ;;  %v3520_v50 = vld [vmem:[%s8412_s2 + $0x1a8] sm:$0xff] }
 0x328   : > { %v3616_v15 = vld [vmem:[%s8412_s2 + $0x4a8] sm:$0xff] }
 0x329   : > { %v3419_v52 = vrot.slane %v3391_v9, %v8045_v23  ;;  %v3600_v9 = vld [vmem:[%s8412_s2 + $0x428] sm:$0xff] }
 0x32b   : > { %v3421_v37 = vcombine.low %v3412_v19, %v3419_v52  ;;  %v3519_v19 = vld [vmem:[%s8412_s2 + $0x1a0] sm:$0xff] }
 0x32c   : > { %v3615_v52 = vld [vmem:[%s8412_s2 + $0x4a0] sm:$0xff] }
 0x32d   : > { %v3435_v7 = vrot.slane %v3421_v37, %v8045_v23  ;;  %v3518_v37 = vld [vmem:[%s8412_s2 + $0x198] sm:$0xff] }
 0x32f   : > { %v8054_v21 = vcombine.low %v3428_v44, %v3435_v7  ;;  %v3599_v44 = vld [vmem:[%s8412_s2 + $0x420] sm:$0xff]  ;;  %v3502_v7 = vld [vmem:[%s8412_s2 + $0x118] sm:$0xff] }
 0x331   : > { %v3637_v36 = vrot.slane %v8054_v21, %v3636_v16  ;;  %v3653_v34 = vrot.slane %v8054_v21, %v3652_v57  ;;  %v3633_v32 = vrot.slane %v8054_v21, %v3632_v22  ;;  %v3649_v30 = vrot.slane %v8054_v21, %v3648_v48  ;;  %v3614_v57 = vld [vmem:[%s8412_s2 + $0x498] sm:$0xff]  ;;  %v3517_v48 = vld [vmem:[%s8412_s2 + $0x190] sm:$0xff] }
 0x332   : > { %v8073_v42 = vrot.slane %v8054_v21, %v3656_v56  ;;  %v3645_v40 = vrot.slane %v8054_v21, %v3644_v41  ;;  %v3598_v56 = vld [vmem:[%s8412_s2 + $0x418] sm:$0xff]  ;;  %v3501_v41 = vld [vmem:[%s8412_s2 + $0x110] sm:$0xff] }
 0x333   : > { %3744 = vmatprep.mubr.f32.mxu1 %v3637_v36  ;;  %3884 = vmatprep.mubr.f32.mxu0 %v3653_v34  ;;  %v3613_v36 = vld [vmem:[%s8412_s2 + $0x490] sm:$0xff]  ;;  %v3516_v34 = vld [vmem:[%s8412_s2 + $0x188] sm:$0xff] }
 0x334   : > { %3745 = vmatmul.mubr.f32.vlgmr.msra.gmra.mxu1 %v3633_v32  ;;  %3885 = vmatmul.mubr.f32.vlgmr.msra.gmra.mxu0 %v3649_v30  ;;  %v3597_v32 = vld [vmem:[%s8412_s2 + $0x410] sm:$0xff]  ;;  %v3500_v30 = vld [vmem:[%s8412_s2 + $0x108] sm:$0xff] }
 0x335   : > { %4271 = vmatpush3.msra.mxu1 %v3514_v55  ;;  %3814 = vmatprep.mubr.f32.mxu1 %v3645_v40  ;;  %v3640_v55 = vsub.s32 2, %v8042_v4  ;;  %v3515_v40 = vld [vmem:[%s8412_s2 + $0x180] sm:$0xff] }
 0x336   : > { %4272 = vmatprep.subr.mxu1 %v3529_v18  ;;  %4376 = vmatpush3.msra.mxu0 %v3610_v17  ;;  %v3612_v18 = vld [vmem:[%s8412_s2 + $0x488] sm:$0xff]  ;;  %v3660_v17 = vsub.s32 7, %v8042_v4 }
 0x337   : > { %4273 = vmatpush3.msra.mxu1 %v3513_v51  ;;  %4377 = vmatprep.subr.mxu0 %v3625_v58  ;;  %v3596_v51 = vld [vmem:[%s8412_s2 + $0x408] sm:$0xff]  ;;  %v3499_v58 = vld [vmem:[%s8412_s2 + $0x100] sm:$0xff] }
 0x338   : > { %4274 = vmatprep.subr.mxu1 %v3528_v54  ;;  %4378 = vmatpush3.msra.mxu0 %v3609_v12  ;;  %v3611_v54 = vld [vmem:[%s8412_s2 + $0x480] sm:$0xff]  ;;  %v3594_v12 = vld [vmem:[%s8412_s2 + $0x3f8] sm:$0xff] }
 0x339   : > { %4275 = vmatpush3.msra.mxu1 %v3512_v63  ;;  %4379 = vmatprep.subr.mxu0 %v3624_v43  ;;  %v3641_v63 = vrot.slane %v8054_v21, %v3640_v55  ;;  %v3578_v43 = vld [vmem:[%s8412_s2 + $0x378] sm:$0xff] }
 0x33a   : > { %4276 = vmatprep.subr.mxu1 %v3527_v24  ;;  %4380 = vmatpush3.msra.mxu0 %v3608_v6  ;;  %v3661_v24 = vrot.slane %v8054_v21, %v3660_v17  ;;  %v3593_v6 = vld [vmem:[%s8412_s2 + $0x3f0] sm:$0xff]  ;;  %v3592_v21 = vld [vmem:[%s8412_s2 + $0x3e8] sm:$0xff] }
 0x33b   : > { %4277 = vmatpush3.msra.mxu1 %v3511_v1  ;;  %4381 = vmatprep.subr.mxu0 %v3623_v45  ;;  %v3595_v1 = vld [vmem:[%s8412_s2 + $0x400] sm:$0xff]  ;;  %v3577_v45 = vld [vmem:[%s8412_s2 + $0x370] sm:$0xff] }
 0x33c   : > { %4278 = vmatprep.subr.mxu1 %v3526_v27  ;;  %4382 = vmatpush3.msra.mxu0 %v3607_v53  ;;  %v3576_v27 = vld [vmem:[%s8412_s2 + $0x368] sm:$0xff]  ;;  %v3591_v53 = vld [vmem:[%s8412_s2 + $0x3e0] sm:$0xff] }
 0x33d   : > { %4279 = vmatpush3.msra.mxu1 %v3510_v60  ;;  %4383 = vmatprep.subr.mxu0 %v3622_v0  ;;  %v3575_v60 = vld [vmem:[%s8412_s2 + $0x360] sm:$0xff]  ;;  %v3590_v0 = vld [vmem:[%s8412_s2 + $0x3d8] sm:$0xff] }
 0x33e   : > { %4280 = vmatprep.subr.mxu1 %v3525_v13  ;;  %4384 = vmatpush3.msra.mxu0 %v3606_v33  ;;  %v3574_v13 = vld [vmem:[%s8412_s2 + $0x358] sm:$0xff]  ;;  %v3589_v33 = vld [vmem:[%s8412_s2 + $0x3d0] sm:$0xff] }
 0x33f   : > { %4281 = vmatpush3.msra.mxu1 %v3509_v61  ;;  %4385 = vmatprep.subr.mxu0 %v3621_v62  ;;  %v3573_v61 = vld [vmem:[%s8412_s2 + $0x350] sm:$0xff]  ;;  %v3588_v62 = vld [vmem:[%s8412_s2 + $0x3c8] sm:$0xff] }
 0x340   : > { %4282 = vmatprep.subr.mxu1 %v3524_v8  ;;  %4386 = vmatpush3.msra.mxu0 %v3605_v28  ;;  %v3572_v8 = vld [vmem:[%s8412_s2 + $0x348] sm:$0xff]  ;;  %v3587_v28 = vld [vmem:[%s8412_s2 + $0x3c0] sm:$0xff] }
 0x341   : > { %4283 = vmatpush3.msra.mxu1 %v3508_v26  ;;  %4387 = vmatprep.subr.mxu0 %v3620_v49  ;;  %v3571_v26 = vld [vmem:[%s8412_s2 + $0x340] sm:$0xff]  ;;  %v3586_v49 = vld [vmem:[%s8412_s2 + $0x3b8] sm:$0xff] }
 0x342   : > { %4284 = vmatprep.subr.mxu1 %v3523_v10  ;;  %4388 = vmatpush3.msra.mxu0 %v3604_v31  ;;  %v3570_v10 = vld [vmem:[%s8412_s2 + $0x338] sm:$0xff]  ;;  %v3585_v31 = vld [vmem:[%s8412_s2 + $0x3b0] sm:$0xff] }
 0x343   : > { %4285 = vmatpush3.msra.mxu1 %v3507_v2  ;;  %4389 = vmatprep.subr.mxu0 %v3619_v46  ;;  %v3569_v46 = vld [vmem:[%s8412_s2 + $0x330] sm:$0xff] }
 0x344   : > { %4286 = vmatprep.subr.mxu1 %v3522_v47  ;;  %4390 = vmatpush3.msra.mxu0 %v3603_v25  ;;  %v3584_v47 = vld [vmem:[%s8412_s2 + $0x3a8] sm:$0xff] }
 0x345   : > { %4287 = vmatpush3.msra.mxu1 %v3506_v14  ;;  %4391 = vmatprep.subr.mxu0 %v3618_v11  ;;  %v3568_v14 = vld [vmem:[%s8412_s2 + $0x328] sm:$0xff] }
 0x346   : > { %4288 = vmatprep.subr.mxu1 %v3521_v20  ;;  %4392 = vmatpush3.msra.mxu0 %v3602_v5  ;;  %v3583_v20 = vld [vmem:[%s8412_s2 + $0x3a0] sm:$0xff] }
 0x347   : > { %4289 = vmatpush3.msra.mxu1 %v3505_v38  ;;  %4393 = vmatprep.subr.mxu0 %v3617_v3  ;;  %v3567_v5 = vld [vmem:[%s8412_s2 + $0x320] sm:$0xff]  ;;  %v3582_v3 = vld [vmem:[%s8412_s2 + $0x398] sm:$0xff] }
 0x348   : > { %4290 = vmatprep.subr.mxu1 %v3520_v50  ;;  %4394 = vmatpush3.msra.mxu0 %v3601_v59  ;;  %v3022_v50 = vld [vmem:[#allocation2 + $0x8] sm:$0x3]  ;;  %v3566_v59 = vld [vmem:[%s8412_s2 + $0x318] sm:$0xff] }
 0x349   : > { %4291 = vmatpush3.msra.mxu1 %v3504_v29  ;;  %4395 = vmatprep.subr.mxu0 %v3616_v15  ;;  %v3581_v15 = vld [vmem:[%s8412_s2 + $0x390] sm:$0xff] }
 0x34a   : > { %4292 = vmatprep.subr.mxu1 %v3519_v19  ;;  %4396 = vmatpush3.msra.mxu0 %v3600_v9  ;;  %v3565_v19 = vld [vmem:[%s8412_s2 + $0x310] sm:$0xff] }
 0x34b   : > { %4293 = vmatpush3.msra.mxu1 %v3503_v35  ;;  %4397 = vmatprep.subr.mxu0 %v3615_v52  ;;  %v3580_v35 = vld [vmem:[%s8412_s2 + $0x388] sm:$0xff]  ;;  %v3579_v52 = vld [vmem:[%s8412_s2 + $0x380] sm:$0xff] }
 0x34c   : > { %4294 = vmatprep.subr.mxu1 %v3518_v37  ;;  %4398 = vmatpush3.msra.mxu0 %v3599_v44  ;;  %v3563_v37 = vld [vmem:[%s8412_s2 + $0x300] sm:$0xff] }
 0x34d   : > { %4295 = vmatpush3.msra.mxu1 %v3502_v7  ;;  %4399 = vmatprep.subr.mxu0 %v3614_v57 }
 0x34e   : > { %4296 = vmatprep.subr.mxu1 %v3517_v48  ;;  %4400 = vmatpush3.msra.mxu0 %v3598_v56 }
 0x34f   : > { %4297 = vmatpush3.msra.mxu1 %v3501_v41  ;;  %4401 = vmatprep.subr.mxu0 %v3613_v36 }
 0x350   : > { %4298 = vmatprep.subr.mxu1 %v3516_v34  ;;  %4402 = vmatpush3.msra.mxu0 %v3597_v32 }
 0x351   : > { %4299 = vmatpush3.msra.mxu1 %v3500_v30  ;;  %4403 = vmatprep.subr.mxu0 %v3612_v18 }
 0x352   : > { %4300 = vmatprep.subr.mxu1 %v3515_v40  ;;  %4404 = vmatpush3.msra.mxu0 %v3596_v51 }
 0x353   : > { %4301 = vmatpush3.msra.mxu1 %v3499_v58  ;;  %4405 = vmatprep.subr.mxu0 %v3611_v54 }
 0x354   : > { %3815 = vmatmul.mubr.f32.vlgmr.msra.gmra.mxu1 %v3641_v63  ;;  %4340 = vmatprep.subr.mxu1 %v3594_v12 }
 0x355   : > { %4341 = vmatpush3.msra.mxu1 %v3578_v43  ;;  %3954 = vmatprep.mubr.f32.mxu1 %v3661_v24 }
 0x356   : > { %4342 = vmatprep.subr.mxu1 %v3593_v6  ;;  %4406 = vmatpush3.msra.mxu0 %v3595_v1 }
 0x357   : > { %4343 = vmatpush3.msra.mxu1 %v3577_v45 }
 0x358   : > { %4344 = vmatprep.subr.mxu1 %v3592_v21 }
 0x359   : > { %4345 = vmatpush3.msra.mxu1 %v3576_v27 }
 0x35a   : > { %4346 = vmatprep.subr.mxu1 %v3591_v53 }
 0x35b   : > { %4347 = vmatpush3.msra.mxu1 %v3575_v60 }
 0x35c   : > { %4348 = vmatprep.subr.mxu1 %v3590_v0 }
 0x35d   : > { %4349 = vmatpush3.msra.mxu1 %v3574_v13 }
 0x35e   : > { %4350 = vmatprep.subr.mxu1 %v3589_v33 }
 0x35f   : > { %4351 = vmatpush3.msra.mxu1 %v3573_v61 }
 0x360   : > { %4352 = vmatprep.subr.mxu1 %v3588_v62 }
 0x361   : > { %4353 = vmatpush3.msra.mxu1 %v3572_v8 }
 0x362   : > { %4354 = vmatprep.subr.mxu1 %v3587_v28 }
 0x363   : > { %4355 = vmatpush3.msra.mxu1 %v3571_v26 }
 0x364   : > { %v3373_v2 = vpop.f32.mrf.mxu0  ;;  %4356 = vmatprep.subr.mxu1 %v3586_v49 }
 0x365   : > { %4357 = vmatpush3.msra.mxu1 %v3570_v10 }
 0x366   : > { %v3375_v25 = vpop.f32.mrf.mxu0  ;;  %4358 = vmatprep.subr.mxu1 %v3585_v31 }
 0x367   : > { %v3437_v11 = vcombine.low %v3373_v2, %v3375_v25  ;;  %4359 = vmatpush3.msra.mxu1 %v3569_v46 }
 0x368   : > { %4360 = vmatprep.subr.mxu1 %v3584_v47 }
 0x369   : > { %v3444_v38 = vrot.slane %v3437_v11, %v8045_v23  ;;  %4361 = vmatpush3.msra.mxu1 %v3568_v14 }
 0x36a   : > { %4362 = vmatprep.subr.mxu1 %v3583_v20 }
 0x36b   : > { %v3451_v29 = vrot.slane %v3444_v38, %v8045_v23  ;;  %4363 = vmatpush3.msra.mxu1 %v3567_v5  ;;  %v3564_v23 = vld [vmem:[%s8412_s2 + $0x308] sm:$0xff] }
 0x36c   : > { %4364 = vmatprep.subr.mxu1 %v3582_v3 }
 0x36d   : > { %v3455_v9 = vadd.f32 %v3451_v29, %v3022_v50  ;;  %4365 = vmatpush3.msra.mxu1 %v3566_v59 }
 0x36e   : > { %4366 = vmatprep.subr.mxu1 %v3581_v15 }
 0x36f   : > { %3461 = vst.msk [vmem:[#allocation2 + $0x8] sm:$0x3] %vm8036_vm2, %v3455_v9  ;;  %4367 = vmatpush3.msra.mxu1 %v3565_v19 }
 0x370   : > { %4368 = vmatprep.subr.mxu1 %v3580_v35 }
 0x371   : > { %4369 = vmatpush3.msra.mxu1 %v3564_v23 }
 0x372   : > { %4370 = vmatprep.subr.mxu1 %v3579_v52 }
 0x373   : > { %4371 = vmatpush3.msra.mxu1 %v3563_v37 }
 0x374   : > { %3955 = vmatmul.mubr.f32.vlgmr.msra.gmra.mxu1 %v8073_v42  ;;  %v3627_v42 = vld [vmem:[%s8413_s3] sm:$0x1] }
 0x376   : > { %v3466_v44 = vld [vmem:[#allocation2 + $0x8] sm:$0x3] }
 0x377   : > { %v3665_v39 = vrot.slane %v3466_v44, %v3632_v22  ;;  %v3669_v7 = vrot.slane %v3466_v44, %v3636_v16 }
 0x379   : > { %4024 = vmatprep.mubr.f32.mxu0 %v3669_v7 }
 0x37a   : > { %4025 = vmatmul.mubr.f32.vlgmr.msra.gmra.mxu0 %v3665_v39 }
 0x3f4   : > { %v4267_v57 = vpop.f32.mrf.mxu1  ;;  %v4337_v34 = vpop.f32.mrf.mxu0 }
 0x3f6   : > { %v4268_v48 = vpop.f32.mrf.mxu1  ;;  %v4338_v22 = vpop.f32.mrf.mxu0 }
 0x3f7   : > { %v4269_v36 = vadd.f32 %v4268_v48, %v4267_v57  ;;  %v4339_v18 = vadd.f32 %v4338_v22, %v4337_v34 }
 0x3f9   : > { %v3747_v30 = vadd.f32 %v4269_v36, %v3627_v42 }
 0x414   : > { %v4302_v56 = vpop.f32.mrf.mxu1 }
 0x416   : > { %v4303_v41 = vpop.f32.mrf.mxu1 }
 0x417   : > { %v4304_v32 = vadd.f32 %v4303_v41, %v4302_v56 }
 0x419   : > { %v3817_v4 = vadd.f32 %v4304_v32, %v3747_v30 }
 0x41b   : > { %v3887_v51 = vadd.f32 %v4339_v18, %v3817_v4 }
 0x434   : > { %v4372_v55 = vpop.f32.mrf.mxu1 }
 0x436   : > { %v4373_v16 = vpop.f32.mrf.mxu1 }
 0x437   : > { %v4374_v40 = vadd.f32 %v4373_v16, %v4372_v55 }
 0x439   : > { %v3957_v54 = vadd.f32 %v4374_v40, %v3887_v51 }
 0x43a   : > { %v4407_v17 = vpop.f32.mrf.mxu0 }
 0x43c   : > { %v4408_v58 = vpop.f32.mrf.mxu0 }
 0x43d   : > { %v4409_v12 = vadd.f32 %v4408_v58, %v4407_v17 }
 0x43f   : > { %v4027_v63 = vadd.f32 %v4409_v12, %v3957_v54 }
 0x441   : > { %4030 = vst [vmem:[%s212_s6] sm:$0x1] %v4027_v63 }
 0x442   : > { %5159 = shalt.err (!%p5156_p5)
}
 0x443   : > { %s5160_s21 = scalar_lea.hbm %s4042_s10, 16  ;;  %s5164_s26 = scalar_lea.hbm %s8414_s4, 32 }
 0x444   : > { %p5161_p6 = scmp.ne.s32.totalorder %s4042_s10, %s5160_s21  ;;  %p5165_p10 = scmp.lt.s32.totalorder %s4042_s10, %s8414_s4 }
 0x445   : > { %p5166_p11 = scmp.lt.s32.totalorder %s5164_s26, %s5160_s21 }
 0x446   : > { %p5162_p7 = pnand %p5161_p6, %p5294_p4 }
 0x447   : > { %p5167_p12 = por %p5166_p11, %p5165_p10 }
 0x448   : > { %p5163_p9 = pneg %p5162_p7 }
 0x44a   : > { %p5168_p13 = pnand %p5167_p12, %p5163_p9 }
 0x44c   : > { %5171 = shalt.err (!%p5168_p13)
}
 0x44d   : > { %4412 = dma.vmem_to_hbm [thread:$0]  (%p5294_p4), %s4045_s7, 16, %s4042_s10, %s4032_s11  }
 0x44e PF: > { %p4418_p0 = scmp.ge.s32.totalorder %s5222_s20, 2  ;;  %s4056_s5 = sand.u32 1, %s5202_s15  }
 0x44f   : > { %s4057_s6 = scalar_lea.sflag [#allocation4], %s4056_s5 }
 0x450   : > { %p4415_p1 = pnand %p4418_p0, %p5301_p8 }
 0x452   : > { %p4416_p2 = pneg %p4415_p1 }
 0x454   : > { %5197 = dma.done.wait (%p4416_p2), %s4057_s6, 16  }
 0x455   : > { %5199 = vsyncadd (%p4416_p2), %s4057_s6, 4294967280  ;;  %s17_s20 = sadd.s32 1, %s5222_s20   ;;  %s9419_s15 = smov %s5206_s16 }
 0x456   : > { %p14_p3 = scmp.ge.s32.totalorder %s17_s20, 4   ;;  %s9420_s16 = smov %s5210_s17 }
 0x457   : > { %s9421_s17 = smov %s5307_s28  ;;  %s9422_s18 = smov %s5218_s19 }
 0x458   : > { %s9423_s19 = smov %s9425_s23  ;;  %16 = sbr.rel (!%p14_p3) target bundleno = 4 (0x4), region = 79 }
 0x45d   :  { %4061 = vsyncpa [#allocation4], 1 }
 0x45e   :  { %4063 = vsyncpa [#allocation4 + $0x1], 1 }

</bundles_post_ra>
